<compile_context>
chip_gen: v7x
topology: tpu7x:2x2x1
jax: 0.10.0
libtpu: 0.0.40
codegen_flags: <defaults>
</compile_context>

<pallas_src>
import functools

import numpy as np
import jax
import jax.numpy as jnp
from jax.experimental import pallas as pl
from jax.experimental.pallas import tpu as pltpu


# ----------------------------------------------------------------------------
# Host-side constants (pure numpy, shape-dependent only)
# ----------------------------------------------------------------------------
def _interp_matrix(out_size: int, in_size: int) -> np.ndarray:
    """(out_size, in_size) bilinear interpolation matrix matching
    nn.UpsamplingBilinear2d (align_corners=True)."""
    if in_size == 1:
        return np.ones((out_size, 1), np.float32)
    if out_size == 1:
        m = np.zeros((1, in_size), np.float32)
        m[0, 0] = 1.0
        return m
    pos = np.arange(out_size, dtype=np.float64) * (in_size - 1) / (out_size - 1)
    lo = np.clip(np.floor(pos).astype(np.int64), 0, in_size - 2)
    frac = (pos - lo).astype(np.float32)
    rows = np.arange(out_size)
    m = np.zeros((out_size, in_size), np.float32)
    m[rows, lo] += 1.0 - frac
    m[rows, lo + 1] += frac
    return m


def _upsample_pad_matrix(h_in, w_in, h_out, w_out, pad):
    """(Hin*Win, L) matrix M such that x_flat @ M is the bilinear-upsampled
    image scattered into the row-major flatten of the zero-padded
    (h_out+2p, w_out+2p) frame (pad positions -> exact 0)."""
    hp, wp = h_out + 2 * pad, w_out + 2 * pad
    ah = _interp_matrix(h_out, h_in)                      # (Hout, Hin)
    aw = _interp_matrix(w_out, w_in)                      # (Wout, Win)
    k = np.einsum("hi,wj->hwij", ah, aw).reshape(h_out, w_out, h_in * w_in)
    m = np.zeros((hp, wp, h_in * w_in), np.float32)
    m[pad:pad + h_out, pad:pad + w_out] = k
    return np.ascontiguousarray(m.reshape(hp * wp, h_in * w_in).T)


def _valid_mask(h_out, w_out, pad):
    hp, wp = h_out + 2 * pad, w_out + 2 * pad
    m = np.zeros((hp, wp), np.float32)
    m[pad:pad + h_out, pad:pad + w_out] = 1.0
    return m.reshape(1, hp * wp)


# ----------------------------------------------------------------------------
# Fused forward kernel (one grid step = one batch image)
# ----------------------------------------------------------------------------
def _srnet_kernel(x_ref, up_ref, mask_ref,
                  w1_ref, b1_ref, w2_ref, b2_ref, w3_ref, b3_ref,
                  o_ref, act0, act1, act2, *, L, WP, G, ks):
    # Zero the scratch so guard columns / pad frame read as exact zeros.
    act0[...] = jnp.zeros_like(act0)
    act1[...] = jnp.zeros_like(act1)
    act2[...] = jnp.zeros_like(act2)

    # Bilinear upsample + zero-pad placement: ONE MXU matmul per image.
    # (pad positions of the result are 0 because those columns of up_ref are 0)
    act0[:, G:G + L] = jnp.dot(x_ref[0], up_ref[...],
                               preferred_element_type=jnp.float32)

    mask = mask_ref[...]                                # (1, L), 1 on valid px

    def conv_relu(src, w_ref, b_ref, k):
        """'same' conv + bias + ReLU in the padded-flat layout.

        src:   VMEM ref (Cin, 2G+L); activation occupies columns [G, G+L).
        w_ref: (Cout, k*k*Cin); column block t holds the (Cout, Cin) weight
               matrix of tap t = ki*k + kj.
        """
        cin, cout, r = src.shape[0], b_ref.shape[0], k // 2
        acc = jnp.zeros((cout, L), jnp.float32)
        for ki in range(k):
            for kj in range(k):
                d = (ki - r) * WP + (kj - r)            # flat shift of this tap
                t = ki * k + kj
                w_t = w_ref[:, t * cin:(t + 1) * cin]   # (Cout, Cin)
                slab = src[:, G + d:G + d + L]          # (Cin, L) lane slice
                acc = acc + jnp.dot(w_t, slab,
                                    preferred_element_type=jnp.float32)
        return jnp.maximum(acc + b_ref[...], 0.0)       # bias + ReLU

    # conv1 / conv2: re-zero the pad pixels (mask) so the next layer's taps see
    # correct zero 'same' padding, and keep the activation in VMEM scratch.
    act1[:, G:G + L] = conv_relu(act0, w1_ref, b1_ref, ks[0]) * mask
    act2[:, G:G + L] = conv_relu(act1, w2_ref, b2_ref, ks[1]) * mask
    # conv3: pad pixels are cropped by the caller, no masking needed.
    o_ref[0] = conv_relu(act2, w3_ref, b3_ref, ks[2])


# ----------------------------------------------------------------------------
# Wrapper
# ----------------------------------------------------------------------------
def srnet_forward(x, params, *, n_freq, timeframe):
    n, cin0, h_in, w_in = x.shape
    ks = (params["w1"].shape[2], params["w2"].shape[2], params["w3"].shape[2])
    pad = max(k // 2 for k in ks)                 # one shared halo (2) for all
    hp, wp = n_freq + 2 * pad, timeframe + 2 * pad
    L = hp * wp
    # guard columns >= max tap shift (pad*wp + pad), rounded to 128 lanes
    G = -(-(pad * wp + pad) // 128) * 128

    up = jnp.asarray(_upsample_pad_matrix(h_in, w_in, n_freq, timeframe, pad))
    mask = jnp.asarray(_valid_mask(n_freq, timeframe, pad))

    def flat_w(w):                                # OIHW -> (O, kh*kw*I)
        co, ci, kh, kw = w.shape
        return jnp.transpose(w, (0, 2, 3, 1)).reshape(co, kh * kw * ci).astype(jnp.float32)

    w1, w2, w3 = flat_w(params["w1"]), flat_w(params["w2"]), flat_w(params["w3"])
    b1 = params["b1"].reshape(-1, 1).astype(jnp.float32)
    b2 = params["b2"].reshape(-1, 1).astype(jnp.float32)
    b3 = params["b3"].reshape(-1, 1).astype(jnp.float32)
    c1, c2, c3 = w1.shape[0], w2.shape[0], w3.shape[0]

    x_flat = x.reshape(n, cin0, h_in * w_in).astype(jnp.float32)

    kernel = functools.partial(_srnet_kernel, L=L, WP=wp, G=G, ks=ks)
    const2 = lambda i: (0, 0)

    out_flat = pl.pallas_call(
        kernel,
        out_shape=jax.ShapeDtypeStruct((n, c3, L), jnp.float32),
        grid=(n,),
        in_specs=[
            pl.BlockSpec((1, cin0, h_in * w_in), lambda i: (i, 0, 0)),
            pl.BlockSpec(up.shape, const2),
            pl.BlockSpec(mask.shape, const2),
            pl.BlockSpec(w1.shape, const2), pl.BlockSpec(b1.shape, const2),
            pl.BlockSpec(w2.shape, const2), pl.BlockSpec(b2.shape, const2),
            pl.BlockSpec(w3.shape, const2), pl.BlockSpec(b3.shape, const2),
        ],
        out_specs=pl.BlockSpec((1, c3, L), lambda i: (i, 0, 0)),
        scratch_shapes=[
            pltpu.VMEM((cin0, 2 * G + L), jnp.float32),   # upsampled input
            pltpu.VMEM((c1, 2 * G + L), jnp.float32),     # conv1 output
            pltpu.VMEM((c2, 2 * G + L), jnp.float32),     # conv2 output
        ],
        compiler_params=pltpu.CompilerParams(
            dimension_semantics=("parallel",)),           # v7x: 1 image per TC
    )(x_flat, up, mask, w1, b1, w2, b2, w3, b3)

    # Crop the zero-pad frame back off (layout plumbing only; tiny).
    out = out_flat.reshape(n, c3, hp, wp)
    return out[:, :, pad:pad + n_freq, pad:pad + timeframe]


def init_params(key):
    ks = jax.random.split(key, 6)
    return {
        "w1": jax.random.normal(ks[0], (6, 2, 5, 5), jnp.float32) * 0.1,
        "b1": jax.random.normal(ks[1], (6,), jnp.float32) * 0.01,
        "w2": jax.random.normal(ks[2], (16, 6, 3, 3), jnp.float32) * 0.1,
        "b2": jax.random.normal(ks[3], (16,), jnp.float32) * 0.01,
        "w3": jax.random.normal(ks[4], (2, 16, 3, 3), jnp.float32) * 0.1,
        "b3": jax.random.normal(ks[5], (2,), jnp.float32) * 0.01,
    }


# Pure-JAX reference (same math) for a silent correctness sanity check.
def _reference_forward(x, params, *, n_freq, timeframe):
    n, c, h_in, w_in = x.shape
    ah = jnp.asarray(_interp_matrix(n_freq, h_in))
    aw = jnp.asarray(_interp_matrix(timeframe, w_in))
    x = jnp.einsum("oh,nchw,pw->ncop", ah, x.astype(jnp.float32), aw)

    def conv(x, w, b):
        y = jax.lax.conv_general_dilated(
            x, w, window_strides=(1, 1), padding="SAME",
            dimension_numbers=("NCHW", "OIHW", "NCHW"))
        return jax.nn.relu(y + b[None, :, None, None])

    x = conv(x, params["w1"], params["b1"])
    x = conv(x, params["w2"], params["b2"])
    x = conv(x, params["w3"], params["b3"])
    return x


if __name__ == "__main__":
    # Small shapes consistent with the module: SRNet(n_freq=32, timeframe=16),
    # input spectrogram x of shape (N=2, C=2, H=16, W=8) in NCHW.
    n_freq, timeframe = 32, 16
    key = jax.random.PRNGKey(0)
    key, xkey = jax.random.split(key)
    x = jax.random.normal(xkey, (2, 2, 16, 8), jnp.float32)
    params = init_params(key)

    fwd = jax.jit(functools.partial(srnet_forward,
                                    n_freq=n_freq, timeframe=timeframe))
    out = jax.block_until_ready(fwd(x, params))

    ref = _reference_forward(x, params, n_freq=n_freq, timeframe=timeframe)
    assert out.shape == (2, 2, n_freq, timeframe)
    np.testing.assert_allclose(np.asarray(out), np.asarray(ref),
                               rtol=1e-3, atol=1e-3)

    print("KERNEL_OK")
</pallas_src>

<mosaic_0001>
module attributes {stable_mosaic.version = 11 : i64} {
  func.func @_srnet_kernel(%arg0: i32, %arg1: memref<1x2x128xf32, #tpu.memory_space<vmem>>, %arg2: memref<128x720xf32, #tpu.memory_space<vmem>>, %arg3: memref<1x720xf32, #tpu.memory_space<vmem>>, %arg4: memref<6x50xf32, #tpu.memory_space<vmem>>, %arg5: memref<6x1xf32, #tpu.memory_space<vmem>>, %arg6: memref<16x54xf32, #tpu.memory_space<vmem>>, %arg7: memref<16x1xf32, #tpu.memory_space<vmem>>, %arg8: memref<2x144xf32, #tpu.memory_space<vmem>>, %arg9: memref<2x1xf32, #tpu.memory_space<vmem>>, %arg10: memref<1x2x720xf32, #tpu.memory_space<vmem>>, %arg11: memref<2x976xf32, #tpu.memory_space<vmem>>, %arg12: memref<6x976xf32, #tpu.memory_space<vmem>>, %arg13: memref<16x976xf32, #tpu.memory_space<vmem>>) attributes {dimension_semantics = [#tpu.dimension_semantics<parallel>], iteration_bounds = array<i64: 2>, scalar_prefetch = 0 : i64, scratch_operands = 3 : i64, tpu.core_type = #tpu.core_type<tc>, window_params = [{transform_indices = @transform_0, window_bounds = array<i64: 1, 2, 128>}, {pipeline_mode = #tpu.pipeline_mode<synchronous>, transform_indices = @transform_1, window_bounds = array<i64: 128, 720>}, {pipeline_mode = #tpu.pipeline_mode<synchronous>, transform_indices = @transform_2, window_bounds = array<i64: 1, 720>}, {pipeline_mode = #tpu.pipeline_mode<synchronous>, transform_indices = @transform_3, window_bounds = array<i64: 6, 50>}, {pipeline_mode = #tpu.pipeline_mode<synchronous>, transform_indices = @transform_4, window_bounds = array<i64: 6, 1>}, {pipeline_mode = #tpu.pipeline_mode<synchronous>, transform_indices = @transform_5, window_bounds = array<i64: 16, 54>}, {pipeline_mode = #tpu.pipeline_mode<synchronous>, transform_indices = @transform_6, window_bounds = array<i64: 16, 1>}, {pipeline_mode = #tpu.pipeline_mode<synchronous>, transform_indices = @transform_7, window_bounds = array<i64: 2, 144>}, {pipeline_mode = #tpu.pipeline_mode<synchronous>, transform_indices = @transform_8, window_bounds = array<i64: 2, 1>}, {transform_indices = @transform_9, window_bounds = array<i64: 1, 2, 720>}]} {
    %cst = arith.constant 0.000000e+00 : f32
    %0 = vector.broadcast %cst : f32 to vector<2x976xf32>
    %c0 = arith.constant 0 : index
    %c0_0 = arith.constant 0 : index
    %1 = vector.load %arg11[%c0, %c0_0] : memref<2x976xf32, #tpu.memory_space<vmem>>, vector<2x976xf32>
    tpu.vector_store %arg11[%c0, %c0_0], %0 {strides = array<i32>} : memref<2x976xf32, #tpu.memory_space<vmem>>, vector<2x976xf32>,
    %cst_1 = arith.constant 0.000000e+00 : f32
    %2 = vector.broadcast %cst_1 : f32 to vector<6x976xf32>
    %c0_2 = arith.constant 0 : index
    %c0_3 = arith.constant 0 : index
    %3 = vector.load %arg12[%c0_2, %c0_3] : memref<6x976xf32, #tpu.memory_space<vmem>>, vector<6x976xf32>
    tpu.vector_store %arg12[%c0_2, %c0_3], %2 {strides = array<i32>} : memref<6x976xf32, #tpu.memory_space<vmem>>, vector<6x976xf32>,
    %cst_4 = arith.constant 0.000000e+00 : f32
    %4 = vector.broadcast %cst_4 : f32 to vector<16x976xf32>
    %c0_5 = arith.constant 0 : index
    %c0_6 = arith.constant 0 : index
    %5 = vector.load %arg13[%c0_5, %c0_6] : memref<16x976xf32, #tpu.memory_space<vmem>>, vector<16x976xf32>
    tpu.vector_store %arg13[%c0_5, %c0_6], %4 {strides = array<i32>} : memref<16x976xf32, #tpu.memory_space<vmem>>, vector<16x976xf32>,
    %c0_7 = arith.constant 0 : index
    %c0_8 = arith.constant 0 : index
    %c0_9 = arith.constant 0 : index
    %6 = vector.load %arg1[%c0_7, %c0_8, %c0_9] : memref<1x2x128xf32, #tpu.memory_space<vmem>>, vector<1x2x128xf32>
    %7 = vector.shape_cast %6 : vector<1x2x128xf32> to vector<2x128xf32>
    %c0_10 = arith.constant 0 : index
    %c0_11 = arith.constant 0 : index
    %8 = vector.load %arg2[%c0_10, %c0_11] : memref<128x720xf32, #tpu.memory_space<vmem>>, vector<128x720xf32>
    %cst_12 = arith.constant dense<0.000000e+00> : vector<2x720xf32>
    %9 = tpu.matmul %7, %8, %cst_12 {dimension_numbers = #tpu.dot_dimension_numbers<[1], [0], [0], [1], [0, 0, 1, 1], [], []>} : vector<2x128xf32>, vector<128x720xf32>, vector<2x720xf32> -> vector<2x720xf32>
    %c0_13 = arith.constant 0 : index
    %c128 = arith.constant 128 : index
    %10 = vector.load %arg11[%c0_13, %c128] : memref<2x976xf32, #tpu.memory_space<vmem>>, vector<2x720xf32>
    tpu.vector_store %arg11[%c0_13, %c128], %9 {strides = array<i32>} : memref<2x976xf32, #tpu.memory_space<vmem>>, vector<2x720xf32>,
    %c0_14 = arith.constant 0 : index
    %c0_15 = arith.constant 0 : index
    %11 = vector.load %arg3[%c0_14, %c0_15] : memref<1x720xf32, #tpu.memory_space<vmem>>, vector<1x720xf32>
    %cst_16 = arith.constant 0.000000e+00 : f32
    %12 = vector.broadcast %cst_16 : f32 to vector<6x720xf32>
    %c0_17 = arith.constant 0 : index
    %c0_18 = arith.constant 0 : index
    %13 = vector.load %arg4[%c0_17, %c0_18] : memref<6x50xf32, #tpu.memory_space<vmem>>, vector<6x2xf32>
    %c0_19 = arith.constant 0 : index
    %c86 = arith.constant 86 : index
    %14 = vector.load %arg11[%c0_19, %c86] : memref<2x976xf32, #tpu.memory_space<vmem>>, vector<2x720xf32>
    %cst_20 = arith.constant dense<0.000000e+00> : vector<6x720xf32>
    %15 = tpu.matmul %13, %14, %cst_20 {dimension_numbers = #tpu.dot_dimension_numbers<[1], [0], [0], [1], [0, 0, 1, 1], [], []>} : vector<6x2xf32>, vector<2x720xf32>, vector<6x720xf32> -> vector<6x720xf32>
    %16 = arith.addf %12, %15 : vector<6x720xf32>
    %c0_21 = arith.constant 0 : index
    %c2 = arith.constant 2 : index
    %17 = vector.load %arg4[%c0_21, %c2] : memref<6x50xf32, #tpu.memory_space<vmem>>, vector<6x2xf32>
    %c0_22 = arith.constant 0 : index
    %c87 = arith.constant 87 : index
    %18 = vector.load %arg11[%c0_22, %c87] : memref<2x976xf32, #tpu.memory_space<vmem>>, vector<2x720xf32>
    %cst_23 = arith.constant dense<0.000000e+00> : vector<6x720xf32>
    %19 = tpu.matmul %17, %18, %cst_23 {dimension_numbers = #tpu.dot_dimension_numbers<[1], [0], [0], [1], [0, 0, 1, 1], [], []>} : vector<6x2xf32>, vector<2x720xf32>, vector<6x720xf32> -> vector<6x720xf32>
    %20 = arith.addf %16, %19 : vector<6x720xf32>
    %c0_24 = arith.constant 0 : index
    %c4 = arith.constant 4 : index
    %21 = vector.load %arg4[%c0_24, %c4] : memref<6x50xf32, #tpu.memory_space<vmem>>, vector<6x2xf32>
    %c0_25 = arith.constant 0 : index
    %c88 = arith.constant 88 : index
    %22 = vector.load %arg11[%c0_25, %c88] : memref<2x976xf32, #tpu.memory_space<vmem>>, vector<2x720xf32>
    %cst_26 = arith.constant dense<0.000000e+00> : vector<6x720xf32>
    %23 = tpu.matmul %21, %22, %cst_26 {dimension_numbers = #tpu.dot_dimension_numbers<[1], [0], [0], [1], [0, 0, 1, 1], [], []>} : vector<6x2xf32>, vector<2x720xf32>, vector<6x720xf32> -> vector<6x720xf32>
    %24 = arith.addf %20, %23 : vector<6x720xf32>
    %c0_27 = arith.constant 0 : index
    %c6 = arith.constant 6 : index
    %25 = vector.load %arg4[%c0_27, %c6] : memref<6x50xf32, #tpu.memory_space<vmem>>, vector<6x2xf32>
    %c0_28 = arith.constant 0 : index
    %c89 = arith.constant 89 : index
    %26 = vector.load %arg11[%c0_28, %c89] : memref<2x976xf32, #tpu.memory_space<vmem>>, vector<2x720xf32>
    %cst_29 = arith.constant dense<0.000000e+00> : vector<6x720xf32>
    %27 = tpu.matmul %25, %26, %cst_29 {dimension_numbers = #tpu.dot_dimension_numbers<[1], [0], [0], [1], [0, 0, 1, 1], [], []>} : vector<6x2xf32>, vector<2x720xf32>, vector<6x720xf32> -> vector<6x720xf32>
    %28 = arith.addf %24, %27 : vector<6x720xf32>
    %c0_30 = arith.constant 0 : index
    %c8 = arith.constant 8 : index
    %29 = vector.load %arg4[%c0_30, %c8] : memref<6x50xf32, #tpu.memory_space<vmem>>, vector<6x2xf32>
    %c0_31 = arith.constant 0 : index
    %c90 = arith.constant 90 : index
    %30 = vector.load %arg11[%c0_31, %c90] : memref<2x976xf32, #tpu.memory_space<vmem>>, vector<2x720xf32>
    %cst_32 = arith.constant dense<0.000000e+00> : vector<6x720xf32>
    %31 = tpu.matmul %29, %30, %cst_32 {dimension_numbers = #tpu.dot_dimension_numbers<[1], [0], [0], [1], [0, 0, 1, 1], [], []>} : vector<6x2xf32>, vector<2x720xf32>, vector<6x720xf32> -> vector<6x720xf32>
    %32 = arith.addf %28, %31 : vector<6x720xf32>
    %c0_33 = arith.constant 0 : index
    %c10 = arith.constant 10 : index
    %33 = vector.load %arg4[%c0_33, %c10] : memref<6x50xf32, #tpu.memory_space<vmem>>, vector<6x2xf32>
    %c0_34 = arith.constant 0 : index
    %c106 = arith.constant 106 : index
    %34 = vector.load %arg11[%c0_34, %c106] : memref<2x976xf32, #tpu.memory_space<vmem>>, vector<2x720xf32>
    %cst_35 = arith.constant dense<0.000000e+00> : vector<6x720xf32>
    %35 = tpu.matmul %33, %34, %cst_35 {dimension_numbers = #tpu.dot_dimension_numbers<[1], [0], [0], [1], [0, 0, 1, 1], [], []>} : vector<6x2xf32>, vector<2x720xf32>, vector<6x720xf32> -> vector<6x720xf32>
    %36 = arith.addf %32, %35 : vector<6x720xf32>
    %c0_36 = arith.constant 0 : index
    %c12 = arith.constant 12 : index
    %37 = vector.load %arg4[%c0_36, %c12] : memref<6x50xf32, #tpu.memory_space<vmem>>, vector<6x2xf32>
    %c0_37 = arith.constant 0 : index
    %c107 = arith.constant 107 : index
    %38 = vector.load %arg11[%c0_37, %c107] : memref<2x976xf32, #tpu.memory_space<vmem>>, vector<2x720xf32>
    %cst_38 = arith.constant dense<0.000000e+00> : vector<6x720xf32>
    %39 = tpu.matmul %37, %38, %cst_38 {dimension_numbers = #tpu.dot_dimension_numbers<[1], [0], [0], [1], [0, 0, 1, 1], [], []>} : vector<6x2xf32>, vector<2x720xf32>, vector<6x720xf32> -> vector<6x720xf32>
    %40 = arith.addf %36, %39 : vector<6x720xf32>
    %c0_39 = arith.constant 0 : index
    %c14 = arith.constant 14 : index
    %41 = vector.load %arg4[%c0_39, %c14] : memref<6x50xf32, #tpu.memory_space<vmem>>, vector<6x2xf32>
    %c0_40 = arith.constant 0 : index
    %c108 = arith.constant 108 : index
    %42 = vector.load %arg11[%c0_40, %c108] : memref<2x976xf32, #tpu.memory_space<vmem>>, vector<2x720xf32>
    %cst_41 = arith.constant dense<0.000000e+00> : vector<6x720xf32>
    %43 = tpu.matmul %41, %42, %cst_41 {dimension_numbers = #tpu.dot_dimension_numbers<[1], [0], [0], [1], [0, 0, 1, 1], [], []>} : vector<6x2xf32>, vector<2x720xf32>, vector<6x720xf32> -> vector<6x720xf32>
    %44 = arith.addf %40, %43 : vector<6x720xf32>
    %c0_42 = arith.constant 0 : index
    %c16 = arith.constant 16 : index
    %45 = vector.load %arg4[%c0_42, %c16] : memref<6x50xf32, #tpu.memory_space<vmem>>, vector<6x2xf32>
    %c0_43 = arith.constant 0 : index
    %c109 = arith.constant 109 : index
    %46 = vector.load %arg11[%c0_43, %c109] : memref<2x976xf32, #tpu.memory_space<vmem>>, vector<2x720xf32>
    %cst_44 = arith.constant dense<0.000000e+00> : vector<6x720xf32>
    %47 = tpu.matmul %45, %46, %cst_44 {dimension_numbers = #tpu.dot_dimension_numbers<[1], [0], [0], [1], [0, 0, 1, 1], [], []>} : vector<6x2xf32>, vector<2x720xf32>, vector<6x720xf32> -> vector<6x720xf32>
    %48 = arith.addf %44, %47 : vector<6x720xf32>
    %c0_45 = arith.constant 0 : index
    %c18 = arith.constant 18 : index
    %49 = vector.load %arg4[%c0_45, %c18] : memref<6x50xf32, #tpu.memory_space<vmem>>, vector<6x2xf32>
    %c0_46 = arith.constant 0 : index
    %c110 = arith.constant 110 : index
    %50 = vector.load %arg11[%c0_46, %c110] : memref<2x976xf32, #tpu.memory_space<vmem>>, vector<2x720xf32>
    %cst_47 = arith.constant dense<0.000000e+00> : vector<6x720xf32>
    %51 = tpu.matmul %49, %50, %cst_47 {dimension_numbers = #tpu.dot_dimension_numbers<[1], [0], [0], [1], [0, 0, 1, 1], [], []>} : vector<6x2xf32>, vector<2x720xf32>, vector<6x720xf32> -> vector<6x720xf32>
    %52 = arith.addf %48, %51 : vector<6x720xf32>
    %c0_48 = arith.constant 0 : index
    %c20 = arith.constant 20 : index
    %53 = vector.load %arg4[%c0_48, %c20] : memref<6x50xf32, #tpu.memory_space<vmem>>, vector<6x2xf32>
    %c0_49 = arith.constant 0 : index
    %c126 = arith.constant 126 : index
    %54 = vector.load %arg11[%c0_49, %c126] : memref<2x976xf32, #tpu.memory_space<vmem>>, vector<2x720xf32>
    %cst_50 = arith.constant dense<0.000000e+00> : vector<6x720xf32>
    %55 = tpu.matmul %53, %54, %cst_50 {dimension_numbers = #tpu.dot_dimension_numbers<[1], [0], [0], [1], [0, 0, 1, 1], [], []>} : vector<6x2xf32>, vector<2x720xf32>, vector<6x720xf32> -> vector<6x720xf32>
    %56 = arith.addf %52, %55 : vector<6x720xf32>
    %c0_51 = arith.constant 0 : index
    %c22 = arith.constant 22 : index
    %57 = vector.load %arg4[%c0_51, %c22] : memref<6x50xf32, #tpu.memory_space<vmem>>, vector<6x2xf32>
    %c0_52 = arith.constant 0 : index
    %c127 = arith.constant 127 : index
    %58 = vector.load %arg11[%c0_52, %c127] : memref<2x976xf32, #tpu.memory_space<vmem>>, vector<2x720xf32>
    %cst_53 = arith.constant dense<0.000000e+00> : vector<6x720xf32>
    %59 = tpu.matmul %57, %58, %cst_53 {dimension_numbers = #tpu.dot_dimension_numbers<[1], [0], [0], [1], [0, 0, 1, 1], [], []>} : vector<6x2xf32>, vector<2x720xf32>, vector<6x720xf32> -> vector<6x720xf32>
    %60 = arith.addf %56, %59 : vector<6x720xf32>
    %c0_54 = arith.constant 0 : index
    %c24 = arith.constant 24 : index
    %61 = vector.load %arg4[%c0_54, %c24] : memref<6x50xf32, #tpu.memory_space<vmem>>, vector<6x2xf32>
    %c0_55 = arith.constant 0 : index
    %c128_56 = arith.constant 128 : index
    %62 = vector.load %arg11[%c0_55, %c128_56] : memref<2x976xf32, #tpu.memory_space<vmem>>, vector<2x720xf32>
    %cst_57 = arith.constant dense<0.000000e+00> : vector<6x720xf32>
    %63 = tpu.matmul %61, %62, %cst_57 {dimension_numbers = #tpu.dot_dimension_numbers<[1], [0], [0], [1], [0, 0, 1, 1], [], []>} : vector<6x2xf32>, vector<2x720xf32>, vector<6x720xf32> -> vector<6x720xf32>
    %64 = arith.addf %60, %63 : vector<6x720xf32>
    %c0_58 = arith.constant 0 : index
    %c26 = arith.constant 26 : index
    %65 = vector.load %arg4[%c0_58, %c26] : memref<6x50xf32, #tpu.memory_space<vmem>>, vector<6x2xf32>
    %c0_59 = arith.constant 0 : index
    %c129 = arith.constant 129 : index
    %66 = vector.load %arg11[%c0_59, %c129] : memref<2x976xf32, #tpu.memory_space<vmem>>, vector<2x720xf32>
    %cst_60 = arith.constant dense<0.000000e+00> : vector<6x720xf32>
    %67 = tpu.matmul %65, %66, %cst_60 {dimension_numbers = #tpu.dot_dimension_numbers<[1], [0], [0], [1], [0, 0, 1, 1], [], []>} : vector<6x2xf32>, vector<2x720xf32>, vector<6x720xf32> -> vector<6x720xf32>
    %68 = arith.addf %64, %67 : vector<6x720xf32>
    %c0_61 = arith.constant 0 : index
    %c28 = arith.constant 28 : index
    %69 = vector.load %arg4[%c0_61, %c28] : memref<6x50xf32, #tpu.memory_space<vmem>>, vector<6x2xf32>
    %c0_62 = arith.constant 0 : index
    %c130 = arith.constant 130 : index
    %70 = vector.load %arg11[%c0_62, %c130] : memref<2x976xf32, #tpu.memory_space<vmem>>, vector<2x720xf32>
    %cst_63 = arith.constant dense<0.000000e+00> : vector<6x720xf32>
    %71 = tpu.matmul %69, %70, %cst_63 {dimension_numbers = #tpu.dot_dimension_numbers<[1], [0], [0], [1], [0, 0, 1, 1], [], []>} : vector<6x2xf32>, vector<2x720xf32>, vector<6x720xf32> -> vector<6x720xf32>
    %72 = arith.addf %68, %71 : vector<6x720xf32>
    %c0_64 = arith.constant 0 : index
    %c30 = arith.constant 30 : index
    %73 = vector.load %arg4[%c0_64, %c30] : memref<6x50xf32, #tpu.memory_space<vmem>>, vector<6x2xf32>
    %c0_65 = arith.constant 0 : index
    %c146 = arith.constant 146 : index
    %74 = vector.load %arg11[%c0_65, %c146] : memref<2x976xf32, #tpu.memory_space<vmem>>, vector<2x720xf32>
    %cst_66 = arith.constant dense<0.000000e+00> : vector<6x720xf32>
    %75 = tpu.matmul %73, %74, %cst_66 {dimension_numbers = #tpu.dot_dimension_numbers<[1], [0], [0], [1], [0, 0, 1, 1], [], []>} : vector<6x2xf32>, vector<2x720xf32>, vector<6x720xf32> -> vector<6x720xf32>
    %76 = arith.addf %72, %75 : vector<6x720xf32>
    %c0_67 = arith.constant 0 : index
    %c32 = arith.constant 32 : index
    %77 = vector.load %arg4[%c0_67, %c32] : memref<6x50xf32, #tpu.memory_space<vmem>>, vector<6x2xf32>
    %c0_68 = arith.constant 0 : index
    %c147 = arith.constant 147 : index
    %78 = vector.load %arg11[%c0_68, %c147] : memref<2x976xf32, #tpu.memory_space<vmem>>, vector<2x720xf32>
    %cst_69 = arith.constant dense<0.000000e+00> : vector<6x720xf32>
    %79 = tpu.matmul %77, %78, %cst_69 {dimension_numbers = #tpu.dot_dimension_numbers<[1], [0], [0], [1], [0, 0, 1, 1], [], []>} : vector<6x2xf32>, vector<2x720xf32>, vector<6x720xf32> -> vector<6x720xf32>
    %80 = arith.addf %76, %79 : vector<6x720xf32>
    %c0_70 = arith.constant 0 : index
    %c34 = arith.constant 34 : index
    %81 = vector.load %arg4[%c0_70, %c34] : memref<6x50xf32, #tpu.memory_space<vmem>>, vector<6x2xf32>
    %c0_71 = arith.constant 0 : index
    %c148 = arith.constant 148 : index
    %82 = vector.load %arg11[%c0_71, %c148] : memref<2x976xf32, #tpu.memory_space<vmem>>, vector<2x720xf32>
    %cst_72 = arith.constant dense<0.000000e+00> : vector<6x720xf32>
    %83 = tpu.matmul %81, %82, %cst_72 {dimension_numbers = #tpu.dot_dimension_numbers<[1], [0], [0], [1], [0, 0, 1, 1], [], []>} : vector<6x2xf32>, vector<2x720xf32>, vector<6x720xf32> -> vector<6x720xf32>
    %84 = arith.addf %80, %83 : vector<6x720xf32>
    %c0_73 = arith.constant 0 : index
    %c36 = arith.constant 36 : index
    %85 = vector.load %arg4[%c0_73, %c36] : memref<6x50xf32, #tpu.memory_space<vmem>>, vector<6x2xf32>
    %c0_74 = arith.constant 0 : index
    %c149 = arith.constant 149 : index
    %86 = vector.load %arg11[%c0_74, %c149] : memref<2x976xf32, #tpu.memory_space<vmem>>, vector<2x720xf32>
    %cst_75 = arith.constant dense<0.000000e+00> : vector<6x720xf32>
    %87 = tpu.matmul %85, %86, %cst_75 {dimension_numbers = #tpu.dot_dimension_numbers<[1], [0], [0], [1], [0, 0, 1, 1], [], []>} : vector<6x2xf32>, vector<2x720xf32>, vector<6x720xf32> -> vector<6x720xf32>
    %88 = arith.addf %84, %87 : vector<6x720xf32>
    %c0_76 = arith.constant 0 : index
    %c38 = arith.constant 38 : index
    %89 = vector.load %arg4[%c0_76, %c38] : memref<6x50xf32, #tpu.memory_space<vmem>>, vector<6x2xf32>
    %c0_77 = arith.constant 0 : index
    %c150 = arith.constant 150 : index
    %90 = vector.load %arg11[%c0_77, %c150] : memref<2x976xf32, #tpu.memory_space<vmem>>, vector<2x720xf32>
    %cst_78 = arith.constant dense<0.000000e+00> : vector<6x720xf32>
    %91 = tpu.matmul %89, %90, %cst_78 {dimension_numbers = #tpu.dot_dimension_numbers<[1], [0], [0], [1], [0, 0, 1, 1], [], []>} : vector<6x2xf32>, vector<2x720xf32>, vector<6x720xf32> -> vector<6x720xf32>
    %92 = arith.addf %88, %91 : vector<6x720xf32>
    %c0_79 = arith.constant 0 : index
    %c40 = arith.constant 40 : index
    %93 = vector.load %arg4[%c0_79, %c40] : memref<6x50xf32, #tpu.memory_space<vmem>>, vector<6x2xf32>
    %c0_80 = arith.constant 0 : index
    %c166 = arith.constant 166 : index
    %94 = vector.load %arg11[%c0_80, %c166] : memref<2x976xf32, #tpu.memory_space<vmem>>, vector<2x720xf32>
    %cst_81 = arith.constant dense<0.000000e+00> : vector<6x720xf32>
    %95 = tpu.matmul %93, %94, %cst_81 {dimension_numbers = #tpu.dot_dimension_numbers<[1], [0], [0], [1], [0, 0, 1, 1], [], []>} : vector<6x2xf32>, vector<2x720xf32>, vector<6x720xf32> -> vector<6x720xf32>
    %96 = arith.addf %92, %95 : vector<6x720xf32>
    %c0_82 = arith.constant 0 : index
    %c42 = arith.constant 42 : index
    %97 = vector.load %arg4[%c0_82, %c42] : memref<6x50xf32, #tpu.memory_space<vmem>>, vector<6x2xf32>
    %c0_83 = arith.constant 0 : index
    %c167 = arith.constant 167 : index
    %98 = vector.load %arg11[%c0_83, %c167] : memref<2x976xf32, #tpu.memory_space<vmem>>, vector<2x720xf32>
    %cst_84 = arith.constant dense<0.000000e+00> : vector<6x720xf32>
    %99 = tpu.matmul %97, %98, %cst_84 {dimension_numbers = #tpu.dot_dimension_numbers<[1], [0], [0], [1], [0, 0, 1, 1], [], []>} : vector<6x2xf32>, vector<2x720xf32>, vector<6x720xf32> -> vector<6x720xf32>
    %100 = arith.addf %96, %99 : vector<6x720xf32>
    %c0_85 = arith.constant 0 : index
    %c44 = arith.constant 44 : index
    %101 = vector.load %arg4[%c0_85, %c44] : memref<6x50xf32, #tpu.memory_space<vmem>>, vector<6x2xf32>
    %c0_86 = arith.constant 0 : index
    %c168 = arith.constant 168 : index
    %102 = vector.load %arg11[%c0_86, %c168] : memref<2x976xf32, #tpu.memory_space<vmem>>, vector<2x720xf32>
    %cst_87 = arith.constant dense<0.000000e+00> : vector<6x720xf32>
    %103 = tpu.matmul %101, %102, %cst_87 {dimension_numbers = #tpu.dot_dimension_numbers<[1], [0], [0], [1], [0, 0, 1, 1], [], []>} : vector<6x2xf32>, vector<2x720xf32>, vector<6x720xf32> -> vector<6x720xf32>
    %104 = arith.addf %100, %103 : vector<6x720xf32>
    %c0_88 = arith.constant 0 : index
    %c46 = arith.constant 46 : index
    %105 = vector.load %arg4[%c0_88, %c46] : memref<6x50xf32, #tpu.memory_space<vmem>>, vector<6x2xf32>
    %c0_89 = arith.constant 0 : index
    %c169 = arith.constant 169 : index
    %106 = vector.load %arg11[%c0_89, %c169] : memref<2x976xf32, #tpu.memory_space<vmem>>, vector<2x720xf32>
    %cst_90 = arith.constant dense<0.000000e+00> : vector<6x720xf32>
    %107 = tpu.matmul %105, %106, %cst_90 {dimension_numbers = #tpu.dot_dimension_numbers<[1], [0], [0], [1], [0, 0, 1, 1], [], []>} : vector<6x2xf32>, vector<2x720xf32>, vector<6x720xf32> -> vector<6x720xf32>
    %108 = arith.addf %104, %107 : vector<6x720xf32>
    %c0_91 = arith.constant 0 : index
    %c48 = arith.constant 48 : index
    %109 = vector.load %arg4[%c0_91, %c48] : memref<6x50xf32, #tpu.memory_space<vmem>>, vector<6x2xf32>
    %c0_92 = arith.constant 0 : index
    %c170 = arith.constant 170 : index
    %110 = vector.load %arg11[%c0_92, %c170] : memref<2x976xf32, #tpu.memory_space<vmem>>, vector<2x720xf32>
    %cst_93 = arith.constant dense<0.000000e+00> : vector<6x720xf32>
    %111 = tpu.matmul %109, %110, %cst_93 {dimension_numbers = #tpu.dot_dimension_numbers<[1], [0], [0], [1], [0, 0, 1, 1], [], []>} : vector<6x2xf32>, vector<2x720xf32>, vector<6x720xf32> -> vector<6x720xf32>
    %112 = arith.addf %108, %111 : vector<6x720xf32>
    %c0_94 = arith.constant 0 : index
    %c0_95 = arith.constant 0 : index
    %113 = vector.load %arg5[%c0_94, %c0_95] : memref<6x1xf32, #tpu.memory_space<vmem>>, vector<6x1xf32>
    %114 = vector.broadcast %113 : vector<6x1xf32> to vector<6x720xf32>
    %115 = arith.addf %112, %114 : vector<6x720xf32>
    %cst_96 = arith.constant 0.000000e+00 : f32
    %116 = vector.broadcast %cst_96 : f32 to vector<6x720xf32>
    %117 = arith.maximumf %115, %116 : vector<6x720xf32>
    %118 = vector.broadcast %11 : vector<1x720xf32> to vector<6x720xf32>
    %119 = arith.mulf %117, %118 : vector<6x720xf32>
    %c0_97 = arith.constant 0 : index
    %c128_98 = arith.constant 128 : index
    %120 = vector.load %arg12[%c0_97, %c128_98] : memref<6x976xf32, #tpu.memory_space<vmem>>, vector<6x720xf32>
    tpu.vector_store %arg12[%c0_97, %c128_98], %119 {strides = array<i32>} : memref<6x976xf32, #tpu.memory_space<vmem>>, vector<6x720xf32>,
    %cst_99 = arith.constant 0.000000e+00 : f32
    %121 = vector.broadcast %cst_99 : f32 to vector<16x720xf32>
    %c0_100 = arith.constant 0 : index
    %c0_101 = arith.constant 0 : index
    %122 = vector.load %arg6[%c0_100, %c0_101] : memref<16x54xf32, #tpu.memory_space<vmem>>, vector<16x6xf32>
    %c0_102 = arith.constant 0 : index
    %c107_103 = arith.constant 107 : index
    %123 = vector.load %arg12[%c0_102, %c107_103] : memref<6x976xf32, #tpu.memory_space<vmem>>, vector<6x720xf32>
    %cst_104 = arith.constant dense<0.000000e+00> : vector<16x720xf32>
    %124 = tpu.matmul %122, %123, %cst_104 {dimension_numbers = #tpu.dot_dimension_numbers<[1], [0], [0], [1], [0, 0, 1, 1], [], []>} : vector<16x6xf32>, vector<6x720xf32>, vector<16x720xf32> -> vector<16x720xf32>
    %125 = arith.addf %121, %124 : vector<16x720xf32>
    %c0_105 = arith.constant 0 : index
    %c6_106 = arith.constant 6 : index
    %126 = vector.load %arg6[%c0_105, %c6_106] : memref<16x54xf32, #tpu.memory_space<vmem>>, vector<16x6xf32>
    %c0_107 = arith.constant 0 : index
    %c108_108 = arith.constant 108 : index
    %127 = vector.load %arg12[%c0_107, %c108_108] : memref<6x976xf32, #tpu.memory_space<vmem>>, vector<6x720xf32>
    %cst_109 = arith.constant dense<0.000000e+00> : vector<16x720xf32>
    %128 = tpu.matmul %126, %127, %cst_109 {dimension_numbers = #tpu.dot_dimension_numbers<[1], [0], [0], [1], [0, 0, 1, 1], [], []>} : vector<16x6xf32>, vector<6x720xf32>, vector<16x720xf32> -> vector<16x720xf32>
    %129 = arith.addf %125, %128 : vector<16x720xf32>
    %c0_110 = arith.constant 0 : index
    %c12_111 = arith.constant 12 : index
    %130 = vector.load %arg6[%c0_110, %c12_111] : memref<16x54xf32, #tpu.memory_space<vmem>>, vector<16x6xf32>
    %c0_112 = arith.constant 0 : index
    %c109_113 = arith.constant 109 : index
    %131 = vector.load %arg12[%c0_112, %c109_113] : memref<6x976xf32, #tpu.memory_space<vmem>>, vector<6x720xf32>
    %cst_114 = arith.constant dense<0.000000e+00> : vector<16x720xf32>
    %132 = tpu.matmul %130, %131, %cst_114 {dimension_numbers = #tpu.dot_dimension_numbers<[1], [0], [0], [1], [0, 0, 1, 1], [], []>} : vector<16x6xf32>, vector<6x720xf32>, vector<16x720xf32> -> vector<16x720xf32>
    %133 = arith.addf %129, %132 : vector<16x720xf32>
    %c0_115 = arith.constant 0 : index
    %c18_116 = arith.constant 18 : index
    %134 = vector.load %arg6[%c0_115, %c18_116] : memref<16x54xf32, #tpu.memory_space<vmem>>, vector<16x6xf32>
    %c0_117 = arith.constant 0 : index
    %c127_118 = arith.constant 127 : index
    %135 = vector.load %arg12[%c0_117, %c127_118] : memref<6x976xf32, #tpu.memory_space<vmem>>, vector<6x720xf32>
    %cst_119 = arith.constant dense<0.000000e+00> : vector<16x720xf32>
    %136 = tpu.matmul %134, %135, %cst_119 {dimension_numbers = #tpu.dot_dimension_numbers<[1], [0], [0], [1], [0, 0, 1, 1], [], []>} : vector<16x6xf32>, vector<6x720xf32>, vector<16x720xf32> -> vector<16x720xf32>
    %137 = arith.addf %133, %136 : vector<16x720xf32>
    %c0_120 = arith.constant 0 : index
    %c24_121 = arith.constant 24 : index
    %138 = vector.load %arg6[%c0_120, %c24_121] : memref<16x54xf32, #tpu.memory_space<vmem>>, vector<16x6xf32>
    %c0_122 = arith.constant 0 : index
    %c128_123 = arith.constant 128 : index
    %139 = vector.load %arg12[%c0_122, %c128_123] : memref<6x976xf32, #tpu.memory_space<vmem>>, vector<6x720xf32>
    %cst_124 = arith.constant dense<0.000000e+00> : vector<16x720xf32>
    %140 = tpu.matmul %138, %139, %cst_124 {dimension_numbers = #tpu.dot_dimension_numbers<[1], [0], [0], [1], [0, 0, 1, 1], [], []>} : vector<16x6xf32>, vector<6x720xf32>, vector<16x720xf32> -> vector<16x720xf32>
    %141 = arith.addf %137, %140 : vector<16x720xf32>
    %c0_125 = arith.constant 0 : index
    %c30_126 = arith.constant 30 : index
    %142 = vector.load %arg6[%c0_125, %c30_126] : memref<16x54xf32, #tpu.memory_space<vmem>>, vector<16x6xf32>
    %c0_127 = arith.constant 0 : index
    %c129_128 = arith.constant 129 : index
    %143 = vector.load %arg12[%c0_127, %c129_128] : memref<6x976xf32, #tpu.memory_space<vmem>>, vector<6x720xf32>
    %cst_129 = arith.constant dense<0.000000e+00> : vector<16x720xf32>
    %144 = tpu.matmul %142, %143, %cst_129 {dimension_numbers = #tpu.dot_dimension_numbers<[1], [0], [0], [1], [0, 0, 1, 1], [], []>} : vector<16x6xf32>, vector<6x720xf32>, vector<16x720xf32> -> vector<16x720xf32>
    %145 = arith.addf %141, %144 : vector<16x720xf32>
    %c0_130 = arith.constant 0 : index
    %c36_131 = arith.constant 36 : index
    %146 = vector.load %arg6[%c0_130, %c36_131] : memref<16x54xf32, #tpu.memory_space<vmem>>, vector<16x6xf32>
    %c0_132 = arith.constant 0 : index
    %c147_133 = arith.constant 147 : index
    %147 = vector.load %arg12[%c0_132, %c147_133] : memref<6x976xf32, #tpu.memory_space<vmem>>, vector<6x720xf32>
    %cst_134 = arith.constant dense<0.000000e+00> : vector<16x720xf32>
    %148 = tpu.matmul %146, %147, %cst_134 {dimension_numbers = #tpu.dot_dimension_numbers<[1], [0], [0], [1], [0, 0, 1, 1], [], []>} : vector<16x6xf32>, vector<6x720xf32>, vector<16x720xf32> -> vector<16x720xf32>
    %149 = arith.addf %145, %148 : vector<16x720xf32>
    %c0_135 = arith.constant 0 : index
    %c42_136 = arith.constant 42 : index
    %150 = vector.load %arg6[%c0_135, %c42_136] : memref<16x54xf32, #tpu.memory_space<vmem>>, vector<16x6xf32>
    %c0_137 = arith.constant 0 : index
    %c148_138 = arith.constant 148 : index
    %151 = vector.load %arg12[%c0_137, %c148_138] : memref<6x976xf32, #tpu.memory_space<vmem>>, vector<6x720xf32>
    %cst_139 = arith.constant dense<0.000000e+00> : vector<16x720xf32>
    %152 = tpu.matmul %150, %151, %cst_139 {dimension_numbers = #tpu.dot_dimension_numbers<[1], [0], [0], [1], [0, 0, 1, 1], [], []>} : vector<16x6xf32>, vector<6x720xf32>, vector<16x720xf32> -> vector<16x720xf32>
    %153 = arith.addf %149, %152 : vector<16x720xf32>
    %c0_140 = arith.constant 0 : index
    %c48_141 = arith.constant 48 : index
    %154 = vector.load %arg6[%c0_140, %c48_141] : memref<16x54xf32, #tpu.memory_space<vmem>>, vector<16x6xf32>
    %c0_142 = arith.constant 0 : index
    %c149_143 = arith.constant 149 : index
    %155 = vector.load %arg12[%c0_142, %c149_143] : memref<6x976xf32, #tpu.memory_space<vmem>>, vector<6x720xf32>
    %cst_144 = arith.constant dense<0.000000e+00> : vector<16x720xf32>
    %156 = tpu.matmul %154, %155, %cst_144 {dimension_numbers = #tpu.dot_dimension_numbers<[1], [0], [0], [1], [0, 0, 1, 1], [], []>} : vector<16x6xf32>, vector<6x720xf32>, vector<16x720xf32> -> vector<16x720xf32>
    %157 = arith.addf %153, %156 : vector<16x720xf32>
    %c0_145 = arith.constant 0 : index
    %c0_146 = arith.constant 0 : index
    %158 = vector.load %arg7[%c0_145, %c0_146] : memref<16x1xf32, #tpu.memory_space<vmem>>, vector<16x1xf32>
    %159 = vector.broadcast %158 : vector<16x1xf32> to vector<16x720xf32>
    %160 = arith.addf %157, %159 : vector<16x720xf32>
    %cst_147 = arith.constant 0.000000e+00 : f32
    %161 = vector.broadcast %cst_147 : f32 to vector<16x720xf32>
    %162 = arith.maximumf %160, %161 : vector<16x720xf32>
    %163 = vector.broadcast %11 : vector<1x720xf32> to vector<16x720xf32>
    %164 = arith.mulf %162, %163 : vector<16x720xf32>
    %c0_148 = arith.constant 0 : index
    %c128_149 = arith.constant 128 : index
    %165 = vector.load %arg13[%c0_148, %c128_149] : memref<16x976xf32, #tpu.memory_space<vmem>>, vector<16x720xf32>
    tpu.vector_store %arg13[%c0_148, %c128_149], %164 {strides = array<i32>} : memref<16x976xf32, #tpu.memory_space<vmem>>, vector<16x720xf32>,
    %cst_150 = arith.constant 0.000000e+00 : f32
    %166 = vector.broadcast %cst_150 : f32 to vector<2x720xf32>
    %c0_151 = arith.constant 0 : index
    %c0_152 = arith.constant 0 : index
    %167 = vector.load %arg8[%c0_151, %c0_152] : memref<2x144xf32, #tpu.memory_space<vmem>>, vector<2x16xf32>
    %c0_153 = arith.constant 0 : index
    %c107_154 = arith.constant 107 : index
    %168 = vector.load %arg13[%c0_153, %c107_154] : memref<16x976xf32, #tpu.memory_space<vmem>>, vector<16x720xf32>
    %cst_155 = arith.constant dense<0.000000e+00> : vector<2x720xf32>
    %169 = tpu.matmul %167, %168, %cst_155 {dimension_numbers = #tpu.dot_dimension_numbers<[1], [0], [0], [1], [0, 0, 1, 1], [], []>} : vector<2x16xf32>, vector<16x720xf32>, vector<2x720xf32> -> vector<2x720xf32>
    %170 = arith.addf %166, %169 : vector<2x720xf32>
    %c0_156 = arith.constant 0 : index
    %c16_157 = arith.constant 16 : index
    %171 = vector.load %arg8[%c0_156, %c16_157] : memref<2x144xf32, #tpu.memory_space<vmem>>, vector<2x16xf32>
    %c0_158 = arith.constant 0 : index
    %c108_159 = arith.constant 108 : index
    %172 = vector.load %arg13[%c0_158, %c108_159] : memref<16x976xf32, #tpu.memory_space<vmem>>, vector<16x720xf32>
    %cst_160 = arith.constant dense<0.000000e+00> : vector<2x720xf32>
    %173 = tpu.matmul %171, %172, %cst_160 {dimension_numbers = #tpu.dot_dimension_numbers<[1], [0], [0], [1], [0, 0, 1, 1], [], []>} : vector<2x16xf32>, vector<16x720xf32>, vector<2x720xf32> -> vector<2x720xf32>
    %174 = arith.addf %170, %173 : vector<2x720xf32>
    %c0_161 = arith.constant 0 : index
    %c32_162 = arith.constant 32 : index
    %175 = vector.load %arg8[%c0_161, %c32_162] : memref<2x144xf32, #tpu.memory_space<vmem>>, vector<2x16xf32>
    %c0_163 = arith.constant 0 : index
    %c109_164 = arith.constant 109 : index
    %176 = vector.load %arg13[%c0_163, %c109_164] : memref<16x976xf32, #tpu.memory_space<vmem>>, vector<16x720xf32>
    %cst_165 = arith.constant dense<0.000000e+00> : vector<2x720xf32>
    %177 = tpu.matmul %175, %176, %cst_165 {dimension_numbers = #tpu.dot_dimension_numbers<[1], [0], [0], [1], [0, 0, 1, 1], [], []>} : vector<2x16xf32>, vector<16x720xf32>, vector<2x720xf32> -> vector<2x720xf32>
    %178 = arith.addf %174, %177 : vector<2x720xf32>
    %c0_166 = arith.constant 0 : index
    %c48_167 = arith.constant 48 : index
    %179 = vector.load %arg8[%c0_166, %c48_167] : memref<2x144xf32, #tpu.memory_space<vmem>>, vector<2x16xf32>
    %c0_168 = arith.constant 0 : index
    %c127_169 = arith.constant 127 : index
    %180 = vector.load %arg13[%c0_168, %c127_169] : memref<16x976xf32, #tpu.memory_space<vmem>>, vector<16x720xf32>
    %cst_170 = arith.constant dense<0.000000e+00> : vector<2x720xf32>
    %181 = tpu.matmul %179, %180, %cst_170 {dimension_numbers = #tpu.dot_dimension_numbers<[1], [0], [0], [1], [0, 0, 1, 1], [], []>} : vector<2x16xf32>, vector<16x720xf32>, vector<2x720xf32> -> vector<2x720xf32>
    %182 = arith.addf %178, %181 : vector<2x720xf32>
    %c0_171 = arith.constant 0 : index
    %c64 = arith.constant 64 : index
    %183 = vector.load %arg8[%c0_171, %c64] : memref<2x144xf32, #tpu.memory_space<vmem>>, vector<2x16xf32>
    %c0_172 = arith.constant 0 : index
    %c128_173 = arith.constant 128 : index
    %184 = vector.load %arg13[%c0_172, %c128_173] : memref<16x976xf32, #tpu.memory_space<vmem>>, vector<16x720xf32>
    %cst_174 = arith.constant dense<0.000000e+00> : vector<2x720xf32>
    %185 = tpu.matmul %183, %184, %cst_174 {dimension_numbers = #tpu.dot_dimension_numbers<[1], [0], [0], [1], [0, 0, 1, 1], [], []>} : vector<2x16xf32>, vector<16x720xf32>, vector<2x720xf32> -> vector<2x720xf32>
    %186 = arith.addf %182, %185 : vector<2x720xf32>
    %c0_175 = arith.constant 0 : index
    %c80 = arith.constant 80 : index
    %187 = vector.load %arg8[%c0_175, %c80] : memref<2x144xf32, #tpu.memory_space<vmem>>, vector<2x16xf32>
    %c0_176 = arith.constant 0 : index
    %c129_177 = arith.constant 129 : index
    %188 = vector.load %arg13[%c0_176, %c129_177] : memref<16x976xf32, #tpu.memory_space<vmem>>, vector<16x720xf32>
    %cst_178 = arith.constant dense<0.000000e+00> : vector<2x720xf32>
    %189 = tpu.matmul %187, %188, %cst_178 {dimension_numbers = #tpu.dot_dimension_numbers<[1], [0], [0], [1], [0, 0, 1, 1], [], []>} : vector<2x16xf32>, vector<16x720xf32>, vector<2x720xf32> -> vector<2x720xf32>
    %190 = arith.addf %186, %189 : vector<2x720xf32>
    %c0_179 = arith.constant 0 : index
    %c96 = arith.constant 96 : index
    %191 = vector.load %arg8[%c0_179, %c96] : memref<2x144xf32, #tpu.memory_space<vmem>>, vector<2x16xf32>
    %c0_180 = arith.constant 0 : index
    %c147_181 = arith.constant 147 : index
    %192 = vector.load %arg13[%c0_180, %c147_181] : memref<16x976xf32, #tpu.memory_space<vmem>>, vector<16x720xf32>
    %cst_182 = arith.constant dense<0.000000e+00> : vector<2x720xf32>
    %193 = tpu.matmul %191, %192, %cst_182 {dimension_numbers = #tpu.dot_dimension_numbers<[1], [0], [0], [1], [0, 0, 1, 1], [], []>} : vector<2x16xf32>, vector<16x720xf32>, vector<2x720xf32> -> vector<2x720xf32>
    %194 = arith.addf %190, %193 : vector<2x720xf32>
    %c0_183 = arith.constant 0 : index
    %c112 = arith.constant 112 : index
    %195 = vector.load %arg8[%c0_183, %c112] : memref<2x144xf32, #tpu.memory_space<vmem>>, vector<2x16xf32>
    %c0_184 = arith.constant 0 : index
    %c148_185 = arith.constant 148 : index
    %196 = vector.load %arg13[%c0_184, %c148_185] : memref<16x976xf32, #tpu.memory_space<vmem>>, vector<16x720xf32>
    %cst_186 = arith.constant dense<0.000000e+00> : vector<2x720xf32>
    %197 = tpu.matmul %195, %196, %cst_186 {dimension_numbers = #tpu.dot_dimension_numbers<[1], [0], [0], [1], [0, 0, 1, 1], [], []>} : vector<2x16xf32>, vector<16x720xf32>, vector<2x720xf32> -> vector<2x720xf32>
    %198 = arith.addf %194, %197 : vector<2x720xf32>
    %c0_187 = arith.constant 0 : index
    %c128_188 = arith.constant 128 : index
    %199 = vector.load %arg8[%c0_187, %c128_188] : memref<2x144xf32, #tpu.memory_space<vmem>>, vector<2x16xf32>
    %c0_189 = arith.constant 0 : index
    %c149_190 = arith.constant 149 : index
    %200 = vector.load %arg13[%c0_189, %c149_190] : memref<16x976xf32, #tpu.memory_space<vmem>>, vector<16x720xf32>
    %cst_191 = arith.constant dense<0.000000e+00> : vector<2x720xf32>
    %201 = tpu.matmul %199, %200, %cst_191 {dimension_numbers = #tpu.dot_dimension_numbers<[1], [0], [0], [1], [0, 0, 1, 1], [], []>} : vector<2x16xf32>, vector<16x720xf32>, vector<2x720xf32> -> vector<2x720xf32>
    %202 = arith.addf %198, %201 : vector<2x720xf32>
    %c0_192 = arith.constant 0 : index
    %c0_193 = arith.constant 0 : index
    %203 = vector.load %arg9[%c0_192, %c0_193] : memref<2x1xf32, #tpu.memory_space<vmem>>, vector<2x1xf32>
    %204 = vector.broadcast %203 : vector<2x1xf32> to vector<2x720xf32>
    %205 = arith.addf %202, %204 : vector<2x720xf32>
    %cst_194 = arith.constant 0.000000e+00 : f32
    %206 = vector.broadcast %cst_194 : f32 to vector<2x720xf32>
    %207 = arith.maximumf %205, %206 : vector<2x720xf32>
    %c0_195 = arith.constant 0 : index
    %c0_196 = arith.constant 0 : index
    %c0_197 = arith.constant 0 : index
    %208 = vector.load %arg10[%c0_195, %c0_196, %c0_197] : memref<1x2x720xf32, #tpu.memory_space<vmem>>, vector<1x2x720xf32>
    %209 = vector.shape_cast %208 : vector<1x2x720xf32> to vector<2x720xf32>
    %210 = vector.shape_cast %207 : vector<2x720xf32> to vector<1x2x720xf32>
    tpu.vector_store %arg10[%c0_195, %c0_196, %c0_197], %210 {strides = array<i32>} : memref<1x2x720xf32, #tpu.memory_space<vmem>>, vector<1x2x720xf32>,
    return
  }
  func.func @transform_0(%arg0: i32) -> (i32, i32, i32) {
    %c0_i32 = arith.constant 0 : i32
    %c0_i32_0 = arith.constant 0 : i32
    %c0_i32_1 = arith.constant 0 : i32
    return %arg0, %c0_i32, %c0_i32_0 : i32, i32, i32
  }
  func.func @transform_1(%arg0: i32) -> (i32, i32) {
    %c0_i32 = arith.constant 0 : i32
    %c0_i32_0 = arith.constant 0 : i32
    %c0_i32_1 = arith.constant 0 : i32
    return %c0_i32, %c0_i32_0 : i32, i32
  }
  func.func @transform_2(%arg0: i32) -> (i32, i32) {
    %c0_i32 = arith.constant 0 : i32
    %c0_i32_0 = arith.constant 0 : i32
    %c0_i32_1 = arith.constant 0 : i32
    return %c0_i32, %c0_i32_0 : i32, i32
  }
  func.func @transform_3(%arg0: i32) -> (i32, i32) {
    %c0_i32 = arith.constant 0 : i32
    %c0_i32_0 = arith.constant 0 : i32
    %c0_i32_1 = arith.constant 0 : i32
    return %c0_i32, %c0_i32_0 : i32, i32
  }
  func.func @transform_4(%arg0: i32) -> (i32, i32) {
    %c0_i32 = arith.constant 0 : i32
    %c0_i32_0 = arith.constant 0 : i32
    %c0_i32_1 = arith.constant 0 : i32
    return %c0_i32, %c0_i32_0 : i32, i32
  }
  func.func @transform_5(%arg0: i32) -> (i32, i32) {
    %c0_i32 = arith.constant 0 : i32
    %c0_i32_0 = arith.constant 0 : i32
    %c0_i32_1 = arith.constant 0 : i32
    return %c0_i32, %c0_i32_0 : i32, i32
  }
  func.func @transform_6(%arg0: i32) -> (i32, i32) {
    %c0_i32 = arith.constant 0 : i32
    %c0_i32_0 = arith.constant 0 : i32
    %c0_i32_1 = arith.constant 0 : i32
    return %c0_i32, %c0_i32_0 : i32, i32
  }
  func.func @transform_7(%arg0: i32) -> (i32, i32) {
    %c0_i32 = arith.constant 0 : i32
    %c0_i32_0 = arith.constant 0 : i32
    %c0_i32_1 = arith.constant 0 : i32
    return %c0_i32, %c0_i32_0 : i32, i32
  }
  func.func @transform_8(%arg0: i32) -> (i32, i32) {
    %c0_i32 = arith.constant 0 : i32
    %c0_i32_0 = arith.constant 0 : i32
    %c0_i32_1 = arith.constant 0 : i32
    return %c0_i32, %c0_i32_0 : i32, i32
  }
  func.func @transform_9(%arg0: i32) -> (i32, i32, i32) {
    %c0_i32 = arith.constant 0 : i32
    %c0_i32_0 = arith.constant 0 : i32
    %c0_i32_1 = arith.constant 0 : i32
    return %arg0, %c0_i32, %c0_i32_0 : i32, i32, i32
  }
}

</mosaic_0001>

<bundles_post_ra>
// kernel: srnet_forward.1
= control target key start
LH: loop header
LB: loop body
LE: loop exit
PB: predicated region body
PF: predicated region fallthrough
CT: control target
= control target key end

     0   :  { %s14574_s30 = smov 0   ;;  %s17055_s0 = inlined_call_operand.vmem [shape: f32[2,2,128], index: 0, kind: input, shape index: {}]   ;;  %s17056_s1 = inlined_call_operand.vmem [shape: f32[128,720], index: 1, kind: input, shape index: {}]   ;;  %s17057_s2 = inlined_call_operand.vmem [shape: f32[1,720], index: 2, kind: input, shape index: {}]   ;;  %s17058_s3 = inlined_call_operand.vmem [shape: f32[6,50], index: 3, kind: input, shape index: {}]   ;;  %s17059_s4 = inlined_call_operand.vmem [shape: f32[6,1], index: 4, kind: input, shape index: {}]   ;;  %s17060_s5 = inlined_call_operand.vmem [shape: f32[16,54], index: 5, kind: input, shape index: {}]   ;;  %s17061_s6 = inlined_call_operand.vmem [shape: f32[16,1], index: 6, kind: input, shape index: {}]   ;;  %s17062_s7 = inlined_call_operand.vmem [shape: f32[2,144], index: 7, kind: input, shape index: {}]   ;;  %s17063_s8 = inlined_call_operand.vmem [shape: f32[2,1], index: 8, kind: input, shape index: {}]   ;;  %s17064_s9 = inlined_call_operand.vmem [shape: f32[2,2,720], index: 9, kind: output, shape index: {}]  }
   0x1 LB: > { %s13251_s10 = sadd.s32 4294967295, %s14474_s30   ;;  %p13255_p0 = scmp.ge.s32.totalorder %s14474_s30, 1  ;;  %s14474_s30 = sphi %s14574_s30, %s19_s30  }
   0x2   : > { %p286_p1 = scmp.lt.s32.totalorder %s14474_s30, 3 }
   0x4   : > { %p287_p2 = pnand %p13255_p0, %p286_p1 }
   0x5   : > { %v367_v0 = vld [vmem:[%s17056_s1 + $0x8] sm:$0xff] (!%p287_p2)  ;;  %v373_v1 = vld [vmem:[%s17056_s1 + $0x38] sm:$0xff] (!%p287_p2)  ;;  %v366_v2 = vld [vmem:[%s17056_s1] sm:$0xff] (!%p287_p2)  ;;  %v14476_v7 = vmov (!%p287_p2), 0.0   ;;  %p14702_p3 = scmp.lt.s32.totalorder (!%p287_p2), %s13251_s10, 1  ;;  %vm331_vm0 = vcmask (!%p287_p2), 1041408  }
   0x6   : > { %290 = sbr.rel (%p287_p2) target bundleno = 1996 (0x7cc), region = 56  ;;  %v13639_v3 = vpack.c.bf16 (!%p287_p2), %v373_v1, %v367_v0  ;;  %v372_v4 = vld [vmem:[%s17056_s1 + $0x30] sm:$0xff] (!%p287_p2)  ;;  %v379_v5 = vld [vmem:[%s17056_s1 + $0x68] sm:$0xff] (!%p287_p2)  ;;  %v385_v6 = vld [vmem:[%s17056_s1 + $0x98] sm:$0xff] (!%p287_p2)  ;;  %526 = vmatprep.mubr.f32.mxu1 (!%p287_p2), %v14476_v7  ;;  %330 = vst [vmem:[#allocation2] sm:$0xff] (!%p287_p2), %v14476_v7  ;;  %668 = vmatprep.mubr.f32.mxu0 (!%p287_p2), %v14476_v7  ;;  %vm332_vm1 = vcmask (!%p287_p2), 1043458  }
   0x7   : > { %339 = vst [vmem:[#allocation3] sm:$0x3f] (!%p287_p2), %v14476_v7  ;;  %340 = vst [vmem:[#allocation3 + $0x8] sm:$0x3f] (!%p287_p2), %v14476_v7  ;;  %v13641_v8 = vpack.c.bf16 (!%p287_p2), %v372_v4, %v366_v2  ;;  %v13643_v9 = vpack.c.bf16 (!%p287_p2), %v385_v6, %v379_v5  ;;  %v378_v10 = vld [vmem:[%s17056_s1 + $0x60] sm:$0xff] (!%p287_p2)  ;;  %v384_v11 = vld [vmem:[%s17056_s1 + $0x90] sm:$0xff] (!%p287_p2) }
   0x8   : > { %341 = vst [vmem:[#allocation3 + $0x10] sm:$0x3f] (!%p287_p2), %v14476_v7  ;;  %342 = vst [vmem:[#allocation3 + $0x18] sm:$0x3f] (!%p287_p2), %v14476_v7  ;;  %v391_v12 = vld [vmem:[%s17056_s1 + $0xc8] sm:$0xff] (!%p287_p2)  ;;  %13640 = vmatprep.subr.bf16.mxu1 (!%p287_p2), %v13639_v3  ;;  %v397_v13 = vld [vmem:[%s17056_s1 + $0xf8] sm:$0xff] (!%p287_p2)  ;;  %v13645_v14 = vpack.c.bf16 (!%p287_p2), %v384_v11, %v378_v10 }
   0x9   : > { %343 = vst [vmem:[#allocation3 + $0x20] sm:$0x3f] (!%p287_p2), %v14476_v7  ;;  %344 = vst [vmem:[#allocation3 + $0x28] sm:$0x3f] (!%p287_p2), %v14476_v7  ;;  %13642 = vmatpush1.bf16.msra.mxu1 (!%p287_p2), %v13641_v8  ;;  %v13647_v15 = vpack.c.bf16 (!%p287_p2), %v397_v13, %v391_v12  ;;  %v390_v16 = vld [vmem:[%s17056_s1 + $0xc0] sm:$0xff] (!%p287_p2)  ;;  %v396_v17 = vld [vmem:[%s17056_s1 + $0xf0] sm:$0xff] (!%p287_p2) }
   0xa   : > { %345 = vst [vmem:[#allocation3 + $0x30] sm:$0x3f] (!%p287_p2), %v14476_v7  ;;  %348 = vst [vmem:[#allocation4] sm:$0xff] (!%p287_p2), %v14476_v7  ;;  %13644 = vmatprep.subr.bf16.mxu1 (!%p287_p2), %v13643_v9  ;;  %v403_v18 = vld [vmem:[%s17056_s1 + $0x128] sm:$0xff] (!%p287_p2)  ;;  %v409_v19 = vld [vmem:[%s17056_s1 + $0x158] sm:$0xff] (!%p287_p2)  ;;  %v13649_v20 = vpack.c.bf16 (!%p287_p2), %v396_v17, %v390_v16  ;;  %vm334_vm2 = vcmask (!%p287_p2), 1045508  }
   0xb   : > { %354 = vst [vmem:[#allocation4 + $0x30] sm:$0xff] (!%p287_p2), %v14476_v7  ;;  %363 = vst [vmem:[#allocation4 + $0x70] sm:$0xff] (!%p287_p2), %v14476_v7  ;;  %v13651_v21 = vpack.c.bf16 (!%p287_p2), %v409_v19, %v403_v18  ;;  %v402_v22 = vld [vmem:[%s17056_s1 + $0x120] sm:$0xff] (!%p287_p2)  ;;  %v408_v23 = vld [vmem:[%s17056_s1 + $0x150] sm:$0xff] (!%p287_p2)  ;;  %vm336_vm3 = vcmask (!%p287_p2), 654342   ;;  %s14477_s20 = smov (!%p287_p2), 124  }
   0xc   : > { %v415_v24 = vld [vmem:[%s17056_s1 + $0x188] sm:$0xff] (!%p287_p2)  ;;  %v421_v25 = vld [vmem:[%s17056_s1 + $0x1b8] sm:$0xff] (!%p287_p2)  ;;  %v13653_v26 = vpack.c.bf16 (!%p287_p2), %v408_v23, %v402_v22  ;;  %v414_v27 = vld [vmem:[%s17056_s1 + $0x180] sm:$0xff] (!%p287_p2)  ;;  %s14478_s27 = smov (!%p287_p2), 122   ;;  %s14480_s11 = smov (!%p287_p2), 120   ;;  %vm709_vm7 = vcmask (!%p287_p2), 650242  }
   0xd   : > { %13646 = vmatpush1.bf16.msra.mxu1 %v13645_v14  ;;  %v371_v28 = vld [vmem:[%s17056_s1 + $0x28] sm:$0xff]  ;;  %v377_v29 = vld [vmem:[%s17056_s1 + $0x58] sm:$0xff]  ;;  %v13655_v30 = vpack.c.bf16 %v421_v25, %v415_v24  ;;  %v420_v31 = vld [vmem:[%s17056_s1 + $0x1b0] sm:$0xff]  ;;  %s17076_s10 = smov (!%p14702_p3, %s13251_s10), 1  ;;  %s14482_s12 = smov 40   ;;  %vm768_vm9 = vcmask 334848  }
   0xe   : > { %13648 = vmatprep.subr.bf16.mxu1 %v13647_v15  ;;  %v13703_v32 = vpack.c.bf16 %v377_v29, %v371_v28  ;;  %v370_v33 = vld [vmem:[%s17056_s1 + $0x20] sm:$0xff]  ;;  %v376_v34 = vld [vmem:[%s17056_s1 + $0x50] sm:$0xff]  ;;  %v427_v35 = vld [vmem:[%s17056_s1 + $0x1e8] sm:$0xff]  ;;  %v13657_v41 = vpack.c.bf16 %v420_v31, %v414_v27  ;;  %s13256_s23 = sshll.u32 %s17076_s10, 1  ;;  %s14483_s13 = smov 41   ;;  %vm775_vm10 = vcmask 15360  }
   0xf   : > { %v433_v36 = vld [vmem:[%s17056_s1 + $0x218] sm:$0xff]  ;;  %v13705_v37 = vpack.c.bf16 %v376_v34, %v370_v33  ;;  %v383_v38 = vld [vmem:[%s17056_s1 + $0x88] sm:$0xff]  ;;  %v382_v40 = vld [vmem:[%s17056_s1 + $0x80] sm:$0xff]  ;;  %s324_s24 = scalar_lea.vmem %s17055_s0, %s13256_s23  ;;  %s14479_s23 = smov 126   ;;  %vm1017_vm11 = vcmask 343040   ;;  %vm1306_vm12 = vcmask 326656  }
  0x10   : > { %13704 = vmatprep.subr.bf16.mxu0 %v13703_v32  ;;  %v389_v39 = vld [vmem:[%s17056_s1 + $0xb8] sm:$0xff]  ;;  %v426_v42 = vld [vmem:[%s17056_s1 + $0x1e0] sm:$0xff]  ;;  %v432_v43 = vld [vmem:[%s17056_s1 + $0x210] sm:$0xff]  ;;  %v13659_v46 = vpack.c.bf16 %v433_v36, %v427_v35  ;;  %s14484_s14 = smov 39   ;;  %s14485_s15 = smov 42   ;;  %vm1601_vm13 = vcmask 318464  }
  0x11   : > { %13650 = vmatpush1.bf16.msra.mxu1 %v13649_v20  ;;  %13706 = vmatpush1.bf16.msra.mxu0 %v13705_v37  ;;  %v13707_v44 = vpack.c.bf16 %v389_v39, %v383_v38  ;;  %v388_v45 = vld [vmem:[%s17056_s1 + $0xb0] sm:$0xff]  ;;  %v439_v47 = vld [vmem:[%s17056_s1 + $0x248] sm:$0xff]  ;;  %v445_v48 = vld [vmem:[%s17056_s1 + $0x278] sm:$0xff]  ;;  %v13661_v55 = vpack.c.bf16 %v432_v43, %v426_v42  ;;  %s14486_s16 = smov 38   ;;  %s14487_s17 = smov 22   ;;  %vm1896_vm14 = vcmask 310272  }
  0x12   : > { %13652 = vmatprep.subr.bf16.mxu1 %v13651_v21  ;;  %v13709_v49 = vpack.c.bf16 %v388_v45, %v382_v40  ;;  %v395_v50 = vld [vmem:[%s17056_s1 + $0xe8] sm:$0xff]  ;;  %v401_v51 = vld [vmem:[%s17056_s1 + $0x118] sm:$0xff]  ;;  %v394_v52 = vld [vmem:[%s17056_s1 + $0xe0] sm:$0xff]  ;;  %v13663_v60 = vpack.c.bf16 %v445_v48, %v439_v47  ;;  %s14490_s25 = smov 20   ;;  %s14491_s26 = smov 116   ;;  %vm2191_vm15 = vcmask 179200  }
  0x13   : > { %13708 = vmatprep.subr.bf16.mxu0 %v13707_v44  ;;  %v400_v53 = vld [vmem:[%s17056_s1 + $0x110] sm:$0xff]  ;;  %v13711_v54 = vpack.c.bf16 %v401_v51, %v395_v50  ;;  %v438_v56 = vld [vmem:[%s17056_s1 + $0x240] sm:$0xff]  ;;  %v407_v58 = vld [vmem:[%s17056_s1 + $0x148] sm:$0xff]  ;;  %s14495_s18 = smov 18   ;;  %s14497_s21 = smov 2  }
  0x14   : > { %v13713_v57 = vpack.c.bf16 %v400_v53, %v394_v52  ;;  %v413_v59 = vld [vmem:[%s17056_s1 + $0x178] sm:$0xff]  ;;  %v444_v61 = vld [vmem:[%s17056_s1 + $0x270] sm:$0xff]  ;;  %v406_v63 = vld [vmem:[%s17056_s1 + $0x140] sm:$0xff]  ;;  %s14498_s29 = smov 108   ;;  %s14501_s22 = smov 104  }
  0x15   : > { %13654 = vmatpush1.bf16.msra.mxu1 %v13653_v26  ;;  %13710 = vmatpush1.bf16.msra.mxu0 %v13709_v49  ;;  %v13715_v62 = vpack.c.bf16 %v413_v59, %v407_v58  ;;  %v412_v0 = vld [vmem:[%s17056_s1 + $0x170] sm:$0xff]  ;;  %v451_v1 = vld [vmem:[%s17056_s1 + $0x2a8] sm:$0xff]  ;;  %v457_v2 = vld [vmem:[%s17056_s1 + $0x2d8] sm:$0xff]  ;;  %v13665_v5 = vpack.c.bf16 %v444_v61, %v438_v56  ;;  %s14502_s28 = smov 127   ;;  %s14506_s19 = smov 109  }
  0x16   : > { %13656 = vmatprep.subr.bf16.mxu1 %v13655_v30  ;;  %13712 = vmatprep.subr.bf16.mxu0 %v13711_v54  ;;  %v419_v3 = vld [vmem:[%s17056_s1 + $0x1a8] sm:$0xff]  ;;  %v425_v4 = vld [vmem:[%s17056_s1 + $0x1d8] sm:$0xff]  ;;  %v450_v6 = vld [vmem:[%s17056_s1 + $0x2a0] sm:$0xff]  ;;  %v13717_v9 = vpack.c.bf16 %v412_v0, %v406_v63  ;;  %v13667_v10 = vpack.c.bf16 %v457_v2, %v451_v1 }
  0x17   : > { %v456_v8 = vld [vmem:[%s17056_s1 + $0x2d0] sm:$0xff]  ;;  %v369_v11 = vld [vmem:[%s17056_s1 + $0x18] sm:$0xff]  ;;  %v13719_v12 = vpack.c.bf16 %v425_v4, %v419_v3  ;;  %v418_v13 = vld [vmem:[%s17056_s1 + $0x1a0] sm:$0xff] }
  0x18   : > { %v424_v14 = vld [vmem:[%s17056_s1 + $0x1d0] sm:$0xff]  ;;  %v375_v15 = vld [vmem:[%s17056_s1 + $0x48] sm:$0xff]  ;;  %v437_v17 = vld [vmem:[%s17056_s1 + $0x238] sm:$0xff]  ;;  %v13669_v18 = vpack.c.bf16 %v456_v8, %v450_v6 }
  0x19   : > { %13658 = vmatpush1.bf16.msra.mxu1 %v13657_v41  ;;  %13714 = vmatpush1.bf16.msra.mxu0 %v13713_v57  ;;  %v431_v16 = vld [vmem:[%s17056_s1 + $0x208] sm:$0xff]  ;;  %v368_v19 = vld [vmem:[%s17056_s1 + $0x10] sm:$0xff]  ;;  %v374_v20 = vld [vmem:[%s17056_s1 + $0x40] sm:$0xff]  ;;  %v13721_v21 = vpack.c.bf16 %v424_v14, %v418_v13  ;;  %v13671_v22 = vpack.c.bf16 %v375_v15, %v369_v11 }
  0x1a   : > { %13660 = vmatprep.subr.bf16.mxu1 %v13659_v46  ;;  %13716 = vmatprep.subr.bf16.mxu0 %v13715_v62  ;;  %v381_v23 = vld [vmem:[%s17056_s1 + $0x78] sm:$0xff]  ;;  %v13723_v24 = vpack.c.bf16 %v437_v17, %v431_v16  ;;  %v430_v25 = vld [vmem:[%s17056_s1 + $0x200] sm:$0xff]  ;;  %v436_v26 = vld [vmem:[%s17056_s1 + $0x230] sm:$0xff]  ;;  %v13673_v31 = vpack.c.bf16 %v374_v20, %v368_v19 }
  0x1b   : > { %v387_v27 = vld [vmem:[%s17056_s1 + $0xa8] sm:$0xff]  ;;  %v449_v29 = vld [vmem:[%s17056_s1 + $0x298] sm:$0xff]  ;;  %v14803_v30 = vld [vmem:[%s324_s24] sm:$0x3]  ;;  %v13725_v34 = vpack.c.bf16 %v436_v26, %v430_v25  ;;  %s14488_s24 = smov 21  }
  0x1c   : > { %v443_v28 = vld [vmem:[%s17056_s1 + $0x268] sm:$0xff]  ;;  %v380_v32 = vld [vmem:[%s17056_s1 + $0x70] sm:$0xff]  ;;  %v386_v33 = vld [vmem:[%s17056_s1 + $0xa0] sm:$0xff]  ;;  %v13675_v35 = vpack.c.bf16 %v387_v27, %v381_v23  ;;  %v14481_v27 = vmov 1983009808  }
  0x1d   : > { %13662 = vmatpush1.bf16.msra.mxu1 %v13661_v55  ;;  %13718 = vmatpush1.bf16.msra.mxu0 %v13717_v9  ;;  %v393_v36 = vld [vmem:[%s17056_s1 + $0xd8] sm:$0xff]  ;;  %v13727_v37 = vpack.c.bf16 %v449_v29, %v443_v28  ;;  %v442_v38 = vld [vmem:[%s17056_s1 + $0x260] sm:$0xff]  ;;  %v448_v39 = vld [vmem:[%s17056_s1 + $0x290] sm:$0xff]  ;;  %v13677_v43 = vpack.c.bf16 %v386_v33, %v380_v32  ;;  %v684_v28 = vunpack.c.l.s4 %v14481_v27  ;;  %v686_v29 = vlaneseq }
  0x1e   : > { %13664 = vmatprep.subr.bf16.mxu1 %v13663_v60  ;;  %13720 = vmatprep.subr.bf16.mxu0 %v13719_v12  ;;  %v399_v40 = vld [vmem:[%s17056_s1 + $0x108] sm:$0xff]  ;;  %v461_v42 = vld [vmem:[%s17056_s1 + $0x2f8] sm:$0xff]  ;;  %v392_v44 = vld [vmem:[%s17056_s1 + $0xd0] sm:$0xff]  ;;  %v13729_v45 = vpack.c.bf16 %v448_v39, %v442_v38 }
  0x1f   : > { %v455_v41 = vld [vmem:[%s17056_s1 + $0x2c8] sm:$0xff]  ;;  %v13679_v46 = vpack.c.bf16 %v399_v40, %v393_v36  ;;  %v398_v47 = vld [vmem:[%s17056_s1 + $0x100] sm:$0xff]  ;;  %v460_v50 = vld [vmem:[%s17056_s1 + $0x2f0] sm:$0xff] }
  0x20   : > { %v13731_v48 = vpack.c.bf16 %v461_v42, %v455_v41  ;;  %v454_v49 = vld [vmem:[%s17056_s1 + $0x2c0] sm:$0xff]  ;;  %v405_v51 = vld [vmem:[%s17056_s1 + $0x138] sm:$0xff]  ;;  %v411_v52 = vld [vmem:[%s17056_s1 + $0x168] sm:$0xff]  ;;  %v13681_v53 = vpack.c.bf16 %v398_v47, %v392_v44 }
  0x21   : > { %13666 = vmatpush1.bf16.msra.mxu1 %v13665_v5  ;;  %13722 = vmatpush1.bf16.msra.mxu0 %v13721_v21  ;;  %v13733_v54 = vpack.c.bf16 %v460_v50, %v454_v49  ;;  %v13683_v55 = vpack.c.bf16 %v411_v52, %v405_v51  ;;  %v404_v56 = vld [vmem:[%s17056_s1 + $0x130] sm:$0xff]  ;;  %v410_v57 = vld [vmem:[%s17056_s1 + $0x160] sm:$0xff]  ;;  %v417_v58 = vld [vmem:[%s17056_s1 + $0x198] sm:$0xff] }
  0x22   : > { %13668 = vmatprep.subr.bf16.mxu1 %v13667_v10  ;;  %13724 = vmatprep.subr.bf16.mxu0 %v13723_v24  ;;  %v423_v59 = vld [vmem:[%s17056_s1 + $0x1c8] sm:$0xff]  ;;  %v13685_v60 = vpack.c.bf16 %v410_v57, %v404_v56  ;;  %v416_v62 = vld [vmem:[%s17056_s1 + $0x190] sm:$0xff]  ;;  %v422_v63 = vld [vmem:[%s17056_s1 + $0x1c0] sm:$0xff] }
  0x23   : > { %v13687_v61 = vpack.c.bf16 %v423_v59, %v417_v58  ;;  %v429_v0 = vld [vmem:[%s17056_s1 + $0x1f8] sm:$0xff]  ;;  %v435_v1 = vld [vmem:[%s17056_s1 + $0x228] sm:$0xff]  ;;  %v13689_v2 = vpack.c.bf16 %v422_v63, %v416_v62  ;;  %v428_v4 = vld [vmem:[%s17056_s1 + $0x1f0] sm:$0xff] }
  0x24   : > { %v13691_v3 = vpack.c.bf16 %v435_v1, %v429_v0  ;;  %v434_v5 = vld [vmem:[%s17056_s1 + $0x220] sm:$0xff]  ;;  %v441_v6 = vld [vmem:[%s17056_s1 + $0x258] sm:$0xff]  ;;  %v447_v8 = vld [vmem:[%s17056_s1 + $0x288] sm:$0xff] }
  0x25   : > { %13670 = vmatpush1.bf16.msra.mxu1 %v13669_v18  ;;  %13726 = vmatpush1.bf16.msra.mxu0 %v13725_v34  ;;  %v13693_v9 = vpack.c.bf16 %v434_v5, %v428_v4  ;;  %v13695_v10 = vpack.c.bf16 %v447_v8, %v441_v6  ;;  %v440_v11 = vld [vmem:[%s17056_s1 + $0x250] sm:$0xff]  ;;  %v446_v12 = vld [vmem:[%s17056_s1 + $0x280] sm:$0xff]  ;;  %v453_v13 = vld [vmem:[%s17056_s1 + $0x2b8] sm:$0xff] }
  0x26   : > { %13672 = vmatprep.subr.bf16.mxu1 %v13671_v22  ;;  %13728 = vmatprep.subr.bf16.mxu0 %v13727_v37  ;;  %v459_v14 = vld [vmem:[%s17056_s1 + $0x2e8] sm:$0xff]  ;;  %v13697_v15 = vpack.c.bf16 %v446_v12, %v440_v11  ;;  %v452_v17 = vld [vmem:[%s17056_s1 + $0x2b0] sm:$0xff]  ;;  %v458_v18 = vld [vmem:[%s17056_s1 + $0x2e0] sm:$0xff] }
  0x27   : > { %v13699_v16 = vpack.c.bf16 %v459_v14, %v453_v13  ;;  %v13701_v19 = vpack.c.bf16 %v458_v18, %v452_v17  ;;  %vm333_vm4 = vmor %vm332_vm1, %vm331_vm0  ;;  %v1251_v20 = vld [vmem:[%s17058_s3] sm:$0x3f]  ;;  %vm2486_vm1 = vcmask 171008  }
  0x28   : > { %527 = vmatmul.mubr.f32.vlgmr.msra.gmra.mrb[0].mxu1 %v14803_v30  ;;  %vm335_vm5 = vmor %vm334_vm2, %vm333_vm4  ;;  %1255 = vrot.lane.b32.xlu0 %v1251_v20, %s14477_s20  ;;  %v1546_v21 = vld [vmem:[%s17058_s3] sm:$0x3f]  ;;  %s14489_s20 = smov 118   ;;  %vm2781_vm2 = vcmask 162816   ;;  %vm3371_vm4 = vcmask 146432  }
  0x29   : > { %13674 = vmatpush1.bf16.msra.mxu1 %v13673_v31  ;;  %597 = vmatprep.mubr.f32.mxu1 %v14476_v7  ;;  %vm337_vm6 = vmor %vm336_vm3, %vm335_vm5  ;;  %v14918_v22 = vld [vmem:[%s17058_s3] sm:$0x3f]  ;;  %v14926_v31 = vshrl.u32 %v686_v29, 7  ;;  %vm3076_vm3 = vcmask 154624   ;;  %vm3960_vm5 = vcmask 7168  }
  0x2a   : > { %13676 = vmatprep.subr.bf16.mxu1 %v13675_v35  ;;  %13730 = vmatpush1.bf16.msra.mxu0 %v13729_v45  ;;  %338 = vst.msk [vmem:[#allocation2 + $0x8] sm:$0xff] %vm337_vm6, %v14476_v7  ;;  %v1841_v23 = vld [vmem:[%s17058_s3] sm:$0x3f]  ;;  %vm14932_vm8 = vmor %vm709_vm7, %vm331_vm0  ;;  %vm4511_vm6 = vcmask 1039360   ;;  %vm4795_vm7 = vcmask 1031168  }
  0x2b   : > { %13732 = vmatprep.subr.bf16.mxu0 %v13731_v48  ;;  %717 = vrot.lane.b32.xlu1 %v14918_v22, %s14479_s23 }
  0x2c   : > { %1550 = vrot.lane.b32.xlu0 %v1546_v21, %s14478_s27 }
  0x2d   : > { %13678 = vmatpush1.bf16.msra.mxu1 %v13677_v43 }
  0x2e   : > { %13680 = vmatprep.subr.bf16.mxu1 %v13679_v46  ;;  %13734 = vmatpush1.bf16.msra.mxu0 %v13733_v54 }
  0x30   : > { %1845 = vrot.lane.b32.xlu0 %v1841_v23, %s14480_s11  ;;  %s14492_s11 = smov 19  }
  0x31   : > { %13682 = vmatpush1.bf16.msra.mxu1 %v13681_v53  ;;  %669 = vmatmul.mubr.f32.vlgmr.msra.gmra.mrb[0].mxu0 %v14803_v30 }
  0x32   : > { %13684 = vmatprep.subr.bf16.mxu1 %v13683_v55  ;;  %854 = vmatprep.mubr.f32.mxu0 %v14476_v7 }
  0x35   : > { %13686 = vmatpush1.bf16.msra.mxu1 %v13685_v60 }
  0x36   : > { %13688 = vmatprep.subr.bf16.mxu1 %v13687_v61 }
  0x39   : > { %13690 = vmatpush1.bf16.msra.mxu1 %v13689_v2 }
  0x3a   : > { %13692 = vmatprep.subr.bf16.mxu1 %v13691_v3 }
  0x3d   : > { %13694 = vmatpush1.bf16.msra.mxu1 %v13693_v9 }
  0x3e   : > { %13696 = vmatprep.subr.bf16.mxu1 %v13695_v10  ;;  %v2136_v10 = vld [vmem:[%s17058_s3] sm:$0x3f] }
  0x41   : > { %13698 = vmatpush1.bf16.msra.mxu1 %v13697_v15 }
  0x42   : > { %13700 = vmatprep.subr.bf16.mxu1 %v13699_v16  ;;  %v2431_v16 = vld [vmem:[%s17058_s3] sm:$0x3f] }
  0x45   : > { %13702 = vmatpush1.bf16.msra.mxu1 %v13701_v19 }
  0x48   : > { %598 = vmatmul.mubr.f32.vlgmr.msra.gmra.mrb[2].mxu1 %v14803_v30  ;;  %v685_v30 = vunpack.c.0.s8 %v684_v28 }
  0x49   : > { %925 = vmatprep.mubr.f32.mxu1 %v14476_v7 }
  0x4a   : > { %v14929_v34 = vsub.s32 %v685_v30, %v14926_v31 }
  0x9a   : > { %v15055_v23 = vpop.permute.xlu0 %1255 }
  0xfb   : > { %v528_v24 = vpop.f32.mrb[0].mxu1 }
  0xfc   : > { %v530_v25 = vpop.f32.mrb[1].mxu1 }
  0xfd   : > { %v681_v26 = vcombine.low %v528_v24, %v530_v25  ;;  %v2726_v24 = vld [vmem:[%s17058_s3] sm:$0x3f]  ;;  %v15062_v25 = vpop.permute.xlu0 %1550 }
  0xff   : > { %v689_v41 = vrot.slane %v681_v26, %v14929_v34 }
 0x101   : > { %v15072_v30 = vpop.permute.xlu0 %1845 }
 0x104   : > { %v670_v32 = vpop.f32.mrb[0].mxu0 }
 0x105   : > { %v672_v33 = vpop.f32.mrb[1].mxu0 }
 0x106   : > { %v698_v35 = vcombine.low %v670_v32, %v672_v33  ;;  %v15074_v32 = vpop.permute.xlu1 %717 }
 0x108   : > { %v705_v37 = vrot.slane %v698_v35, %v14929_v34  ;;  %v3021_v35 = vld [vmem:[%s17058_s3] sm:$0x3f] }
 0x10a   : > { %711 = vst.msk [vmem:[#allocation2 + $0xa] sm:$0xf] %vm14932_vm8, %v705_v37 }
 0x11b   : > { %v599_v38 = vpop.f32.mrb[2].mxu1 }
 0x11c   : > { %v601_v39 = vpop.f32.mrb[3].mxu1 }
 0x11d   : > { %v682_v40 = vcombine.low %v599_v38, %v601_v39 }
 0x11f   : > { %v14941_v42 = vrot.slane %v682_v40, %v14929_v34 }
 0x121   : > { %v14944_v43 = vcombine.low %v689_v41, %v14941_v42 }
 0x123   : > { %708 = vst [vmem:[#allocation2 + $0x2] sm:$0xff] %v14944_v43 }
 0x12a   : > { %v1252_v44 = vld [vmem:[#allocation2] sm:$0xff]  ;;  %v715_v45 = vld [vmem:[#allocation2 + $0x8] sm:$0x3f] }
 0x12b   : > { %v14948_v46 = vrot.slane %v1252_v44, %v14929_v34  ;;  %v745_v47 = vrot.slane %v715_v45, %v14929_v34  ;;  %v721_v48 = vcombine.high %v1252_v44, %v1252_v44  ;;  %v1253_v49 = vld [vmem:[#allocation2 + $0x8] sm:$0x3f]  ;;  %v738_v52 = vcombine.high %v715_v45, %v715_v45 }
 0x12c   : > { %v1283_v50 = vrot.slane %v1253_v49, %v14929_v34  ;;  %v1548_v53 = vld [vmem:[#allocation2 + $0x8] sm:$0x3f]  ;;  %v1276_v59 = vcombine.high %v1253_v49, %v1253_v49 }
 0x12d   : > { %1292 = vrot.lane.b32.xlu1 %v14948_v46, %s14482_s12  ;;  %762 = vrot.lane.b32.xlu0 %v745_v47, %s14483_s13  ;;  %v14963_v51 = vrot.slane %v721_v48, %v14929_v34  ;;  %v1578_v54 = vrot.slane %v1548_v53, %v14929_v34  ;;  %v752_v55 = vrot.slane %v738_v52, %v14929_v34  ;;  %v1843_v63 = vld [vmem:[#allocation2 + $0x8] sm:$0x3f] }
 0x12e   : > { %v753_v56 = vcombine.high %v745_v47, %v745_v47  ;;  %v14977_v57 = vcombine.high %v14948_v46, %v14948_v46  ;;  %v1291_v58 = vcombine.high %v1283_v50, %v1283_v50  ;;  %v1290_v60 = vrot.slane %v1276_v59, %v14929_v34  ;;  %v2138_v4 = vld [vmem:[#allocation2 + $0x8] sm:$0x3f] }
 0x12f   : > { %v1586_v61 = vcombine.high %v1578_v54, %v1578_v54  ;;  %v1571_v62 = vcombine.high %v1548_v53, %v1548_v53  ;;  %v1873_v1 = vrot.slane %v1843_v63, %v14929_v34  ;;  %v15005_v3 = vcombine.high %v14963_v51, %v14963_v51  ;;  %v2433_v11 = vld [vmem:[#allocation2 + $0x8] sm:$0x3f]  ;;  %v3316_v53 = vld [vmem:[%s17058_s3] sm:$0x3f] }
 0x130   : > { %v2168_v5 = vrot.slane %v2138_v4, %v14929_v34  ;;  %v1866_v6 = vcombine.high %v1843_v63, %v1843_v63  ;;  %v2463_v12 = vrot.slane %v2433_v11, %v14929_v34  ;;  %v2161_v13 = vcombine.high %v2138_v4, %v2138_v4  ;;  %v2728_v18 = vld [vmem:[#allocation2 + $0x8] sm:$0x3f] }
 0x131   : > { %1587 = vrot.lane.b32.xlu1 %v14948_v46, %s14484_s14  ;;  %1003 = vrot.lane.b32.xlu0 %v14948_v46, %s14485_s15  ;;  %v1585_v0 = vrot.slane %v1571_v62, %v14929_v34  ;;  %v1881_v2 = vcombine.high %v1873_v1, %v1873_v1  ;;  %v2456_v17 = vcombine.high %v2433_v11, %v2433_v11  ;;  %v3023_v27 = vld [vmem:[#allocation2 + $0x8] sm:$0x3f] }
 0x132   : > { %v2176_v8 = vcombine.high %v2168_v5, %v2168_v5  ;;  %v1880_v9 = vrot.slane %v1866_v6, %v14929_v34  ;;  %v2471_v14 = vcombine.high %v2463_v12, %v2463_v12  ;;  %v2175_v15 = vrot.slane %v2161_v13, %v14929_v34  ;;  %v3318_v48 = vld [vmem:[#allocation2 + $0x8] sm:$0x3f] }
 0x133   : > { %v2470_v19 = vrot.slane %v2456_v17, %v14929_v34  ;;  %v2758_v20 = vrot.slane %v2728_v18, %v14929_v34  ;;  %v2751_v26 = vcombine.high %v2728_v18, %v2728_v18  ;;  %v3053_v29 = vrot.slane %v3023_v27, %v14929_v34  ;;  %v3907_v18 = vld [vmem:[#allocation2 + $0x8] sm:$0x3f] }
 0x134   : > { %v3046_v41 = vcombine.high %v3023_v27, %v3023_v27  ;;  %v3348_v52 = vrot.slane %v3318_v48, %v14929_v34 }
 0x135   : > { %1882 = vrot.lane.b32.xlu1 %v14948_v46, %s14486_s16  ;;  %1011 = vrot.lane.b32.xlu0 %v745_v47, %s14485_s15  ;;  %v2766_v21 = vcombine.high %v2758_v20, %v2758_v20  ;;  %v2765_v28 = vrot.slane %v2751_v26, %v14929_v34  ;;  %v3061_v33 = vcombine.high %v3053_v29, %v3053_v29 }
 0x136   : > { %v3060_v47 = vrot.slane %v3046_v41, %v14929_v34 }
 0x139   : > { %1300 = vrot.lane.b32.xlu0 %v1283_v50, %s14482_s12  ;;  %758 = vrot.lane.b32.xlu1 %v14963_v51, %s14483_s13 }
 0x13d   : > { %1595 = vrot.lane.b32.xlu0 %v1578_v54, %s14484_s14  ;;  %766 = vrot.lane.b32.xlu1 %v752_v55, %s14483_s13 }
 0x141   : > { %764 = vrot.lane.b32.xlu0 %v753_v56, %s14483_s13  ;;  %1007 = vrot.lane.b32.xlu1 %v14963_v51, %s14485_s15 }
 0x145   : > { %1005 = vrot.lane.b32.xlu0 %v14977_v57, %s14485_s15  ;;  %1013 = vrot.lane.b32.xlu1 %v753_v56, %s14485_s15  ;;  %v3356_v56 = vcombine.high %v3348_v52, %v3348_v52 }
 0x149   : > { %1015 = vrot.lane.b32.xlu0 %v752_v55, %s14485_s15  ;;  %1294 = vrot.lane.b32.xlu1 %v14977_v57, %s14482_s12 }
 0x14d   : > { %1296 = vrot.lane.b32.xlu0 %v14963_v51, %s14482_s12  ;;  %1302 = vrot.lane.b32.xlu1 %v1291_v58, %s14482_s12 }
 0x151   : > { %1304 = vrot.lane.b32.xlu0 %v1290_v60, %s14482_s12  ;;  %1589 = vrot.lane.b32.xlu1 %v14977_v57, %s14484_s14  ;;  %v3341_v60 = vcombine.high %v3318_v48, %v3318_v48 }
 0x153   : > { %v3355_v63 = vrot.slane %v3341_v60, %v14929_v34 }
 0x155   : > { %1591 = vrot.lane.b32.xlu0 %v14963_v51, %s14484_s14  ;;  %1597 = vrot.lane.b32.xlu1 %v1586_v61, %s14484_s14 }
 0x159   : > { %1599 = vrot.lane.b32.xlu0 %v1585_v0, %s14484_s14  ;;  %1884 = vrot.lane.b32.xlu1 %v14977_v57, %s14486_s16  ;;  %v3613_v0 = vld [vmem:[#allocation2 + $0x8] sm:$0x3f] }
 0x15a   : > { %v3643_v4 = vrot.slane %v3613_v0, %v14929_v34 }
 0x15d   : > { %1886 = vrot.lane.b32.xlu0 %v14963_v51, %s14486_s16  ;;  %1892 = vrot.lane.b32.xlu1 %v1881_v2, %s14486_s16 }
 0x161   : > { %2179 = vrot.lane.b32.xlu1 %v14977_v57, %s14487_s17  ;;  %760 = vrot.lane.b32.xlu0 %v15005_v3, %s14483_s13 }
 0x165   : > { %2177 = vrot.lane.b32.xlu1 %v14948_v46, %s14487_s17  ;;  %1890 = vrot.lane.b32.xlu0 %v1873_v1, %s14486_s16 }
 0x169   : > { %2187 = vrot.lane.b32.xlu1 %v2176_v8, %s14487_s17  ;;  %1894 = vrot.lane.b32.xlu0 %v1880_v9, %s14486_s16  ;;  %v3651_v9 = vcombine.high %v3643_v4, %v3643_v4 }
 0x16d   : > { %2474 = vrot.lane.b32.xlu1 %v14977_v57, %s14488_s24  ;;  %2181 = vrot.lane.b32.xlu0 %v14963_v51, %s14487_s17 }
 0x171   : > { %1009 = vrot.lane.b32.xlu1 %v15005_v3, %s14485_s15  ;;  %2140 = vrot.lane.b32.xlu0 %v2136_v10, %s14489_s20  ;;  %s14496_s20 = smov 110   ;;  %s14503_s15 = smov 102  }
 0x175   : > { %2472 = vrot.lane.b32.xlu1 %v14948_v46, %s14488_s24  ;;  %2185 = vrot.lane.b32.xlu0 %v2168_v5, %s14487_s17  ;;  %v3611_v5 = vld [vmem:[%s17058_s3] sm:$0x3f] }
 0x179   : > { %2482 = vrot.lane.b32.xlu1 %v2471_v14, %s14488_s24  ;;  %2189 = vrot.lane.b32.xlu0 %v2175_v15, %s14487_s17 }
 0x17d   : > { %1298 = vrot.lane.b32.xlu1 %v15005_v3, %s14482_s12  ;;  %2476 = vrot.lane.b32.xlu0 %v14963_v51, %s14488_s24  ;;  %s14493_s12 = smov 114  }
 0x181   : > { %2769 = vrot.lane.b32.xlu1 %v14977_v57, %s14490_s25  ;;  %2435 = vrot.lane.b32.xlu0 %v2431_v16, %s14491_s26 }
 0x185   : > { %2767 = vrot.lane.b32.xlu1 %v14948_v46, %s14490_s25  ;;  %2480 = vrot.lane.b32.xlu0 %v2463_v12, %s14488_s24  ;;  %v3636_v12 = vcombine.high %v3613_v0, %v3613_v0  ;;  %v15260_v0 = vld.sshfl [vmem:[#allocation2 + $0xa] sm:$0x33 pattern:$0x76325410] }
 0x187   : > { %v3650_v15 = vrot.slane %v3636_v12, %v14929_v34 }
 0x189   : > { %1593 = vrot.lane.b32.xlu1 %v15005_v3, %s14484_s14  ;;  %2484 = vrot.lane.b32.xlu0 %v2470_v19, %s14488_s24  ;;  %v3905_v19 = vld [vmem:[%s17058_s3] sm:$0x3f]  ;;  %s14508_s14 = smov 94  }
 0x18d   : > { %2777 = vrot.lane.b32.xlu1 %v2766_v21, %s14490_s25  ;;  %2771 = vrot.lane.b32.xlu0 %v14963_v51, %s14490_s25 }
 0x191   : > { %3064 = vrot.lane.b32.xlu1 %v14977_v57, %s14492_s11  ;;  %2730 = vrot.lane.b32.xlu0 %v2726_v24, %s14493_s12  ;;  %s14499_s12 = smov 1   ;;  %v3937_v24 = vrot.slane %v3907_v18, %v14929_v34 }
 0x193   : > { %v3945_v27 = vcombine.high %v3937_v24, %v3937_v24 }
 0x195   : > { %1888 = vrot.lane.b32.xlu1 %v15005_v3, %s14486_s16  ;;  %2775 = vrot.lane.b32.xlu0 %v2758_v20, %s14490_s25  ;;  %s17066_s16 = smov 112  }
 0x199   : > { %3062 = vrot.lane.b32.xlu1 %v14948_v46, %s14492_s11  ;;  %2779 = vrot.lane.b32.xlu0 %v2765_v28, %s14490_s25 }
 0x19d   : > { %3072 = vrot.lane.b32.xlu1 %v3061_v33, %s14492_s11  ;;  %3066 = vrot.lane.b32.xlu0 %v14963_v51, %s14492_s11  ;;  %v3930_v33 = vcombine.high %v3907_v18, %v3907_v18 }
 0x19f   : > { %v15082_v37 = vpop.permute.xlu1 %1292  ;;  %v15084_v38 = vpop.permute.xlu0 %762 }
 0x1a1   : > { %2183 = vrot.lane.b32.xlu1 %v15005_v3, %s14487_s17  ;;  %3025 = vrot.lane.b32.xlu0 %v3021_v35, %s17066_s16  ;;  %s14500_s17 = smov 106   ;;  %v4200_v35 = vld [vmem:[%s17058_s3] sm:$0x3f]  ;;  %s14511_s16 = smov 90  }
 0x1a3   : > { %v15089_v39 = vpop.permute.xlu1 %1587  ;;  %v15091_v40 = vpop.permute.xlu0 %1003 }
 0x1a5   : > { %3359 = vrot.lane.b32.xlu1 %v14977_v57, %s14495_s18  ;;  %3070 = vrot.lane.b32.xlu0 %v3053_v29, %s14492_s11 }
 0x1a7   : > { %v15096_v44 = vpop.permute.xlu1 %1882  ;;  %v15098_v45 = vpop.permute.xlu0 %1011 }
 0x1a9   : > { %3357 = vrot.lane.b32.xlu1 %v14948_v46, %s14495_s18  ;;  %3074 = vrot.lane.b32.xlu0 %v3060_v47, %s14492_s11 }
 0x1ab   : > { %v15104_v49 = vpop.permute.xlu0 %1300  ;;  %v15106_v50 = vpop.permute.xlu1 %758 }
 0x1ad   : > { %2478 = vrot.lane.b32.xlu1 %v15005_v3, %s14488_s24  ;;  %3361 = vrot.lane.b32.xlu0 %v14963_v51, %s14495_s18 }
 0x1af   : > { %v15116_v54 = vpop.permute.xlu0 %1595  ;;  %v15118_v55 = vpop.permute.xlu1 %766 }
 0x1b1   : > { %3367 = vrot.lane.b32.xlu1 %v3356_v56, %s14495_s18  ;;  %3320 = vrot.lane.b32.xlu0 %v3316_v53, %s14496_s20  ;;  %v3944_v53 = vrot.slane %v3930_v33, %v14929_v34  ;;  %v15218_v56 = vrot.slane %v14944_v43, %v14929_v34  ;;  %v14467_v43 = vcombine.low %v14941_v42, %v14941_v42 }
 0x1b3   : > { %v15122_v58 = vpop.permute.xlu0 %764  ;;  %v15124_v59 = vpop.permute.xlu1 %1007 }
 0x1b4   : > { %v774_v47 = vsel %vm768_vm9, %v15122_v58, %v15118_v55 }
 0x1b5   : > { %3654 = vrot.lane.b32.xlu1 %v14977_v57, %s14497_s21  ;;  %3365 = vrot.lane.b32.xlu0 %v3348_v52, %s14495_s18  ;;  %v773_v52 = vsel %vm768_vm9, %v15084_v38, %v15122_v58 }
 0x1b7   : > { %v15129_v61 = vpop.permute.xlu0 %1005  ;;  %v15131_v62 = vpop.permute.xlu1 %1013 }
 0x1b8   : > { %v1018_v60 = vsel %vm1017_vm11, %v15091_v40, %v15129_v61 }
 0x1b9   : > { %2773 = vrot.lane.b32.xlu1 %v15005_v3, %s14490_s25  ;;  %3369 = vrot.lane.b32.xlu0 %v3355_v63, %s14495_s18  ;;  %v15241_v63 = vcombine.high %v15218_v56, %v15218_v56 }
 0x1bb   : > { %v15137_v1 = vpop.permute.xlu0 %1015  ;;  %v15139_v2 = vpop.permute.xlu1 %1294 }
 0x1bd   : > { %3652 = vrot.lane.b32.xlu1 %v14948_v46, %s14497_s21  ;;  %3656 = vrot.lane.b32.xlu0 %v14963_v51, %s14497_s21 }
 0x1bf   : > { %v15149_v6 = vpop.permute.xlu0 %1296  ;;  %v15151_v8 = vpop.permute.xlu1 %1302 }
 0x1c1   : > { %3662 = vrot.lane.b32.xlu1 %v3651_v9, %s14497_s21  ;;  %3615 = vrot.lane.b32.xlu0 %v3611_v5, %s14498_s29 }
 0x1c3   : > { %v15155_v10 = vpop.permute.xlu0 %1304  ;;  %v15157_v11 = vpop.permute.xlu1 %1589 }
 0x1c5   : > { %3068 = vrot.lane.b32.xlu1 %v15005_v3, %s14492_s11  ;;  %3660 = vrot.lane.b32.xlu0 %v3643_v4, %s14497_s21  ;;  %v4466_v4 = vld [vmem:[%s17058_s3] sm:$0x3f] }
 0x1c7   : > { %v15162_v13 = vpop.permute.xlu0 %1591  ;;  %v15164_v14 = vpop.permute.xlu1 %1597 }
 0x1c9   : > { %3948 = vrot.lane.b32.xlu1 %v14977_v57, %s14499_s12  ;;  %3664 = vrot.lane.b32.xlu0 %v3650_v15, %s14497_s21  ;;  %v15274_v15 = vcombine.high %v15260_v0, %v15260_v0 }
 0x1cb   : > { %v15170_v16 = vpop.permute.xlu0 %1599  ;;  %v15172_v17 = vpop.permute.xlu1 %1884 }
 0x1cd   : > { %3946 = vrot.lane.b32.xlu1 %v14948_v46, %s14499_s12  ;;  %3950 = vrot.lane.b32.xlu0 %v14963_v51, %s14499_s12 }
 0x1cf   : > { %v15181_v20 = vpop.permute.xlu0 %1886  ;;  %v15183_v21 = vpop.permute.xlu1 %1892 }
 0x1d1   : > { %3363 = vrot.lane.b32.xlu1 %v15005_v3, %s14495_s18  ;;  %3909 = vrot.lane.b32.xlu0 %v3905_v19, %s14500_s17  ;;  %v1023_v19 = vsel %vm1017_vm11, %v15131_v62, %v15137_v1  ;;  %v1308_v1 = vsel %vm1306_vm12, %v15139_v2, %v15149_v6  ;;  %s14505_s18 = smov 98  }
 0x1d3   : > { %v15189_v26 = vpop.permute.xlu1 %2179  ;;  %v761_v51 = vpop.permute.xlu0 %760 }
 0x1d4   : > { %v771_v28 = vsel %vm768_vm9, %v15106_v50, %v761_v51  ;;  %v772_v29 = vsel %vm768_vm9, %v761_v51, %v15084_v38  ;;  %v1019_v38 = vsel %vm1017_vm11, %v15129_v61, %v15124_v59  ;;  %v15254_v61 = vrot.slane %v14467_v43, %v14929_v34 }
 0x1d5   : > { %3956 = vrot.lane.b32.xlu1 %v3945_v27, %s14499_s12  ;;  %3954 = vrot.lane.b32.xlu0 %v3937_v24, %s14499_s12  ;;  %v1606_v43 = vsel %vm1601_vm13, %v15116_v54, %v15164_v14 }
 0x1d6   : > { %13261 = vmatprep.subr.msk.mxu1 %vm331_vm0, %v772_v29  ;;  %v1312_v29 = vsel %vm1306_vm12, %v15151_v8, %v15155_v10  ;;  %v1603_v10 = vsel %vm1601_vm13, %v15157_v11, %v15162_v13 }
 0x1d7   : > { %13262 = vmatpush1.msk.msra.mxu1 %vm331_vm0, %v771_v28  ;;  %v15202_v41 = vpop.permute.xlu1 %2177  ;;  %v15207_v48 = vpop.permute.xlu0 %1890 }
 0x1d8   : > { %13263 = vmatmul.mubr.msk.f32.vlgmr.msra.gmra.mrb[4].mxu1 %vm775_vm10, %v15074_v32  ;;  %13264 = vmatprep.subr.msk.mxu1 %vm331_vm0, %v774_v47 }
 0x1d9   : > { %13265 = vmatpush1.msk.msra.mxu1 %vm331_vm0, %v773_v52  ;;  %4204 = vrot.lane.b32.xlu1 %v4200_v35, %s14501_s22 }
 0x1da   : > { %3958 = vrot.lane.b32.xlu0 %v3944_v53, %s14499_s12  ;;  %13267 = vmatprep.subr.msk.mxu1 %vm331_vm0, %v1019_v38  ;;  %v1607_v38 = vsel %vm1601_vm13, %v15164_v14, %v15170_v16 }
 0x1db   : > { %996 = vmatprep.mubr.f32.mxu1 %v14476_v7  ;;  %v15228_v55 = vpop.permute.xlu1 %2187  ;;  %v15230_v58 = vpop.permute.xlu0 %1894 }
 0x1dc   : > { %13266 = vmatmul.mubr.msk.f32.vlgmr.msra.gmra.mrb[6].mxu1 %vm775_vm10, %v15074_v32 }
 0x1dd   : > { %13268 = vmatpush1.msk.msra.mxu1 %vm331_vm0, %v1018_v60  ;;  %3658 = vrot.lane.b32.xlu1 %v15005_v3, %s14497_s21  ;;  %s14504_s21 = smov 100  }
 0x1de   : > { %4501 = vrot.lane.b32.xlu0 %v15241_v63, %s14502_s28  ;;  %1102 = vmatprep.mubr.f32.mxu1 %v14476_v7 }
 0x1df   : > { %v15249_v42 = vpop.permute.xlu1 %2474  ;;  %v15251_v40 = vpop.permute.xlu0 %2181 }
 0x1e0   : > { %13269 = vmatmul.mubr.msk.f32.vlgmr.msra.gmra.mrb[8].mxu1 %vm775_vm10, %v14918_v22 }
 0x1e1   : > { %4503 = vrot.lane.b32.xlu1 %v15254_v61, %s14502_s28  ;;  %1173 = vmatprep.mubr.f32.mxu1 %v14476_v7 }
 0x1e2   : > { %4499 = vrot.lane.b32.xlu0 %v15218_v56, %s14502_s28 }
 0x1e3   : > { %v1010_v5 = vpop.permute.xlu1 %1009  ;;  %v15268_v9 = vpop.permute.xlu0 %2140 }
 0x1e4   : > { %v1020_v12 = vsel %vm1017_vm11, %v15124_v59, %v1010_v5  ;;  %v1021_v18 = vsel %vm1017_vm11, %v1010_v5, %v15098_v45  ;;  %v1022_v59 = vsel %vm1017_vm11, %v15098_v45, %v15131_v62  ;;  %v1307_v45 = vsel %vm1306_vm12, %v15082_v37, %v15139_v2 }
 0x1e5   : > { %4470 = vrot.lane.b32.xlu1 %v4466_v4, %s14503_s15  ;;  %13270 = vmatprep.subr.msk.mxu1 %vm331_vm0, %v1021_v18  ;;  %v1898_v4 = vsel %vm1896_vm14, %v15172_v17, %v15181_v20  ;;  %s17065_s15 = smov 96   ;;  %vm5079_vm11 = vcmask 900096  }
 0x1e6   : > { %4509 = vrot.lane.b32.xlu0 %v15274_v15, %s14502_s28  ;;  %13271 = vmatpush1.msk.msra.mxu1 %vm331_vm0, %v1020_v12 }
 0x1e7   : > { %v15288_v24 = vpop.permute.xlu1 %2472  ;;  %13272 = vmatmul.mubr.msk.f32.vlgmr.msra.gmra.mrb[4].mxu1 %vm775_vm10, %v14918_v22  ;;  %13273 = vmatprep.subr.msk.mxu1 %vm331_vm0, %v1023_v19  ;;  %v15293_v51 = vpop.permute.xlu0 %2185  ;;  %v1902_v19 = vsel %vm1896_vm14, %v15183_v21, %v15230_v58  ;;  %v2193_v58 = vsel %vm2191_vm15, %v15189_v26, %v15251_v40 }
 0x1e8   : > { %13274 = vmatpush1.msk.msra.mxu1 %vm331_vm0, %v1022_v59  ;;  %1244 = vmatprep.mubr.f32.mxu1 %v14476_v7  ;;  %v4750_v7 = vld [vmem:[%s17058_s3] sm:$0x3f] }
 0x1e9   : > { %3952 = vrot.lane.b32.xlu1 %v15005_v3, %s14499_s12  ;;  %13276 = vmatprep.subr.msk.mxu1 %vm331_vm0, %v1308_v1  ;;  %v15318_v3 = vld [vmem:[#allocation4] sm:$0xff] }
 0x1ea   : > { %4787 = vrot.lane.b32.xlu0 %v15254_v61, %s14479_s23 }
 0x1eb   : > { %v15308_v62 = vpop.permute.xlu1 %2482  ;;  %13275 = vmatmul.mubr.msk.f32.vlgmr.msra.gmra.mrb[6].mxu1 %vm775_vm10, %v14918_v22  ;;  %v15312_v27 = vpop.permute.xlu0 %2189 }
 0x1ec   : > { %13277 = vmatpush1.msk.msra.mxu1 %vm331_vm0, %v1307_v45  ;;  %1391 = vmatprep.mubr.f32.mxu1 %v15318_v3 }
 0x1ed   : > { %4507 = vrot.lane.b32.xlu1 %v15260_v0, %s14502_s28 }
 0x1ee   : > { %4754 = vrot.lane.b32.xlu0 %v4750_v7, %s14504_s21  ;;  %s17073_s21 = smov 112  }
 0x1ef   : > { %v1299_v37 = vpop.permute.xlu1 %1298  ;;  %13278 = vmatmul.mubr.msk.f32.vlgmr.msra.gmra.mrb[8].mxu1 %vm775_vm10, %v15055_v23  ;;  %v15325_v22 = vpop.permute.xlu0 %2476 }
 0x1f0   : > { %v1309_v2 = vsel %vm1306_vm12, %v15149_v6, %v1299_v37  ;;  %v1310_v28 = vsel %vm1306_vm12, %v1299_v37, %v15104_v49  ;;  %1462 = vmatprep.mubr.f32.mxu1 %v15318_v3  ;;  %v1311_v6 = vsel %vm1306_vm12, %v15104_v49, %v15151_v8  ;;  %v1602_v49 = vsel %vm1601_vm13, %v15089_v39, %v15157_v11 }
 0x1f1   : > { %4785 = vrot.lane.b32.xlu1 %v15241_v63, %s14479_s23  ;;  %13279 = vmatprep.subr.msk.mxu1 %vm331_vm0, %v1310_v28  ;;  %v2487_v28 = vsel %vm2486_vm1, %v15288_v24, %v15249_v42  ;;  %vm5363_vm12 = vcmask 891904  }
 0x1f2   : > { %4791 = vrot.lane.b32.xlu0 %v15260_v0, %s14479_s23  ;;  %13280 = vmatpush1.msk.msra.mxu1 %vm331_vm0, %v1309_v2 }
 0x1f3   : > { %v15344_v33 = vpop.permute.xlu1 %2769  ;;  %13281 = vmatmul.mubr.msk.f32.vlgmr.msra.gmra.mrb[4].mxu1 %vm775_vm10, %v15055_v23  ;;  %13282 = vmatprep.subr.msk.mxu1 %vm331_vm0, %v1312_v29  ;;  %v15349_v35 = vpop.permute.xlu0 %2435 }
 0x1f4   : > { %13283 = vmatpush1.msk.msra.mxu1 %vm331_vm0, %v1311_v6  ;;  %1533 = vmatprep.mubr.f32.mxu1 %v15318_v3 }
 0x1f5   : > { %4783 = vrot.lane.b32.xlu1 %v15218_v56, %s14479_s23  ;;  %13285 = vmatprep.subr.msk.mxu1 %vm331_vm0, %v1603_v10 }
 0x1f6   : > { %5069 = vrot.lane.b32.xlu0 %v15241_v63, %s14496_s20 }
 0x1f7   : > { %v15364_v8 = vpop.permute.xlu1 %2767  ;;  %13284 = vmatmul.mubr.msk.f32.vlgmr.msra.gmra.mrb[6].mxu1 %vm775_vm10, %v15055_v23  ;;  %v15368_v47 = vpop.permute.xlu0 %2480  ;;  %v15382_v23 = vcombine.high %v15254_v61, %v15254_v61 }
 0x1f8   : > { %13286 = vmatpush1.msk.msra.mxu1 %vm331_vm0, %v1602_v49  ;;  %1686 = vmatprep.mubr.f32.mxu1 %v15318_v3 }
 0x1f9   : > { %4793 = vrot.lane.b32.xlu1 %v15274_v15, %s14479_s23 }
 0x1fa   : > { %5067 = vrot.lane.b32.xlu0 %v15218_v56, %s14496_s20 }
 0x1fb   : > { %v1594_v52 = vpop.permute.xlu1 %1593  ;;  %13287 = vmatmul.mubr.msk.f32.vlgmr.msra.gmra.mrb[8].mxu1 %vm775_vm10, %v15062_v25  ;;  %v15378_v39 = vpop.permute.xlu0 %2484 }
 0x1fc   : > { %v1604_v11 = vsel %vm1601_vm13, %v15162_v13, %v1594_v52  ;;  %v1605_v53 = vsel %vm1601_vm13, %v1594_v52, %v15116_v54  ;;  %1757 = vmatprep.mubr.f32.mxu1 %v15318_v3  ;;  %v5034_v13 = vld [vmem:[%s17058_s3] sm:$0x3f]  ;;  %v1897_v54 = vsel %vm1896_vm14, %v15096_v44, %v15172_v17  ;;  %v2492_v49 = vsel %vm2486_vm1, %v15308_v62, %v15378_v39 }
 0x1fd   : > { %5071 = vrot.lane.b32.xlu1 %v15254_v61, %s14496_s20  ;;  %13288 = vmatprep.subr.msk.mxu1 %vm331_vm0, %v1605_v53  ;;  %v5886_v39 = vld [vmem:[%s17058_s3] sm:$0x3f]  ;;  %vm5647_vm13 = vcmask 883712  }
 0x1fe   : > { %4505 = vrot.lane.b32.xlu0 %v15382_v23, %s14502_s28  ;;  %13289 = vmatpush1.msk.msra.mxu1 %vm331_vm0, %v1604_v11 }
 0x1ff   : > { %v15404_v60 = vpop.permute.xlu1 %2777  ;;  %13290 = vmatmul.mubr.msk.f32.vlgmr.msra.gmra.mrb[4].mxu1 %vm775_vm10, %v15062_v25  ;;  %13291 = vmatprep.subr.msk.mxu1 %vm331_vm0, %v1607_v38  ;;  %v15409_v16 = vpop.permute.xlu0 %2771 }
 0x200   : > { %13292 = vmatpush1.msk.msra.mxu1 %vm331_vm0, %v1606_v43  ;;  %1828 = vmatprep.mubr.f32.mxu1 %v15318_v3 }
 0x201   : > { %5038 = vrot.lane.b32.xlu1 %v5034_v13, %s14505_s18  ;;  %13294 = vmatprep.subr.msk.mxu1 %vm331_vm0, %v1898_v4 }
 0x202   : > { %5077 = vrot.lane.b32.xlu0 %v15274_v15, %s14496_s20 }
 0x203   : > { %v15423_v14 = vpop.permute.xlu1 %3064  ;;  %13293 = vmatmul.mubr.msk.f32.vlgmr.msra.gmra.mrb[6].mxu1 %vm775_vm10, %v15062_v25  ;;  %v15427_v5 = vpop.permute.xlu0 %2730  ;;  %v5318_v25 = vld [vmem:[%s17058_s3] sm:$0x3f] }
 0x204   : > { %13295 = vmatpush1.msk.msra.mxu1 %vm331_vm0, %v1897_v54  ;;  %1981 = vmatprep.mubr.f32.mxu1 %v15318_v3 }
 0x205   : > { %5075 = vrot.lane.b32.xlu1 %v15260_v0, %s14496_s20 }
 0x206   : > { %5355 = vrot.lane.b32.xlu0 %v15254_v61, %s14506_s19 }
 0x207   : > { %v1889_v12 = vpop.permute.xlu1 %1888  ;;  %13296 = vmatmul.mubr.msk.f32.vlgmr.msra.gmra.mrb[8].mxu1 %vm775_vm10, %v15072_v30  ;;  %v15437_v44 = vpop.permute.xlu0 %2775 }
 0x208   : > { %v1899_v17 = vsel %vm1896_vm14, %v15181_v20, %v1889_v12  ;;  %v1900_v18 = vsel %vm1896_vm14, %v1889_v12, %v15207_v48  ;;  %2052 = vmatprep.mubr.f32.mxu1 %v15318_v3  ;;  %v1901_v20 = vsel %vm1896_vm14, %v15207_v48, %v15183_v21  ;;  %v2192_v21 = vsel %vm2191_vm15, %v15202_v41, %v15189_v26 }
 0x209   : > { %5353 = vrot.lane.b32.xlu1 %v15241_v63, %s14506_s19  ;;  %13297 = vmatprep.subr.msk.mxu1 %vm331_vm0, %v1900_v18  ;;  %vm5931_vm14 = vcmask 875520  }
 0x20a   : > { %5322 = vrot.lane.b32.xlu0 %v5318_v25, %s17065_s15  ;;  %13298 = vmatpush1.msk.msra.mxu1 %vm331_vm0, %v1899_v17  ;;  %s14510_s15 = smov 92  }
 0x20b   : > { %v15458_v59 = vpop.permute.xlu1 %3062  ;;  %13299 = vmatmul.mubr.msk.f32.vlgmr.msra.gmra.mrb[4].mxu1 %vm775_vm10, %v15072_v30  ;;  %13300 = vmatprep.subr.msk.mxu1 %vm331_vm0, %v1902_v19  ;;  %v15463_v1 = vpop.permute.xlu0 %2779 }
 0x20c   : > { %13301 = vmatpush1.msk.msra.mxu1 %vm331_vm0, %v1901_v20  ;;  %2123 = vmatprep.mubr.f32.mxu1 %v15318_v3  ;;  %v2787_v54 = vsel %vm2781_vm2, %v15404_v60, %v15463_v1 }
 0x20d   : > { %4789 = vrot.lane.b32.xlu1 %v15382_v23, %s14479_s23  ;;  %13303 = vmatprep.subr.msk.mxu1 %vm331_vm0, %v2193_v58  ;;  %s17067_s23 = smov 107  }
 0x20e   : > { %5359 = vrot.lane.b32.xlu0 %v15260_v0, %s14506_s19 }
 0x20f   : > { %v15478_v48 = vpop.permute.xlu1 %3072  ;;  %13302 = vmatmul.mubr.msk.f32.vlgmr.msra.gmra.mrb[6].mxu1 %vm775_vm10, %v15072_v30  ;;  %v15482_v45 = vpop.permute.xlu0 %3066 }
 0x210   : > { %13304 = vmatpush1.msk.msra.mxu1 %vm331_vm0, %v2192_v21  ;;  %2276 = vmatprep.mubr.f32.mxu1 %v15318_v3 }
 0x211   : > { %5351 = vrot.lane.b32.xlu1 %v15218_v56, %s14506_s19 }
 0x212   : > { %5637 = vrot.lane.b32.xlu0 %v15241_v63, %s14498_s29  ;;  %v2197_v63 = vsel %vm2191_vm15, %v15228_v55, %v15312_v27  ;;  %v2488_v27 = vsel %vm2486_vm1, %v15249_v42, %v15325_v22 }
 0x213   : > { %v2184_v7 = vpop.permute.xlu1 %2183  ;;  %13305 = vmatmul.mubr.msk.f32.vlgmr.msra.gmra.mrb[8].mxu1 %vm775_vm10, %v15268_v9  ;;  %v15492_v26 = vpop.permute.xlu0 %3025 }
 0x214   : > { %v2194_v30 = vsel %vm2191_vm15, %v15251_v40, %v2184_v7  ;;  %v2195_v41 = vsel %vm2191_vm15, %v2184_v7, %v15293_v51  ;;  %2347 = vmatprep.mubr.f32.mxu1 %v15318_v3  ;;  %v2196_v40 = vsel %vm2191_vm15, %v15293_v51, %v15228_v55  ;;  %v5887_v55 = vld [vmem:[#allocation2 + $0x2] sm:$0xff]  ;;  %vm6215_vm15 = vcmask 867328  }
 0x215   : > { %5361 = vrot.lane.b32.xlu1 %v15274_v15, %s14506_s19  ;;  %13306 = vmatprep.subr.msk.mxu1 %vm331_vm0, %v2195_v41  ;;  %v5602_v51 = vld [vmem:[%s17058_s3] sm:$0x3f]  ;;  %v15579_v53 = vrot.slane %v5887_v55, %v14929_v34 }
 0x216   : > { %5073 = vrot.lane.b32.xlu0 %v15382_v23, %s14496_s20  ;;  %13307 = vmatpush1.msk.msra.mxu1 %vm331_vm0, %v2194_v30 }
 0x217   : > { %v15511_v37 = vpop.permute.xlu1 %3359  ;;  %13308 = vmatmul.mubr.msk.f32.vlgmr.msra.gmra.mrb[4].mxu1 %vm775_vm10, %v15268_v9  ;;  %13309 = vmatprep.subr.msk.mxu1 %vm331_vm0, %v2197_v63  ;;  %v15516_v2 = vpop.permute.xlu0 %3070  ;;  %v15601_v43 = vcombine.high %v15579_v53, %v15579_v53  ;;  %v6454_v63 = vld [vmem:[%s17058_s3] sm:$0x3f] }
 0x218   : > { %13310 = vmatpush1.msk.msra.mxu1 %vm331_vm0, %v2196_v40  ;;  %2418 = vmatprep.mubr.f32.mxu1 %v15318_v3  ;;  %v3081_v1 = vsel %vm3076_vm3, %v15516_v2, %v15478_v48 }
 0x219   : > { %5639 = vrot.lane.b32.xlu1 %v15254_v61, %s14498_s29  ;;  %13312 = vmatprep.subr.msk.mxu1 %vm331_vm0, %v2488_v27 }
 0x21a   : > { %5635 = vrot.lane.b32.xlu0 %v15218_v56, %s14498_s29  ;;  %v5894_v56 = vcombine.high %v5887_v55, %v5887_v55 }
 0x21b   : > { %v15534_v29 = vpop.permute.xlu1 %3357  ;;  %13311 = vmatmul.mubr.msk.f32.vlgmr.msra.gmra.mrb[6].mxu1 %vm775_vm10, %v15268_v9  ;;  %v15538_v61 = vpop.permute.xlu0 %3074 }
 0x21c   : > { %13313 = vmatpush1.msk.msra.mxu1 %vm331_vm0, %v2487_v28  ;;  %2571 = vmatprep.mubr.f32.mxu1 %v15318_v3  ;;  %v15551_v24 = vrot.slane %v5894_v56, %v14929_v34 }
 0x21d   : > { %5606 = vrot.lane.b32.xlu1 %v5602_v51, %s14508_s14  ;;  %s14515_s14 = smov 84  }
 0x21e   : > { %5645 = vrot.lane.b32.xlu0 %v15274_v15, %s14498_s29 }
 0x21f   : > { %v2479_v6 = vpop.permute.xlu1 %2478  ;;  %13314 = vmatmul.mubr.msk.f32.vlgmr.msra.gmra.mrb[8].mxu1 %vm775_vm10, %v15349_v35  ;;  %v15546_v42 = vpop.permute.xlu0 %3361 }
 0x220   : > { %v2489_v9 = vsel %vm2486_vm1, %v15325_v22, %v2479_v6  ;;  %v2490_v10 = vsel %vm2486_vm1, %v2479_v6, %v15368_v47  ;;  %2642 = vmatprep.mubr.f32.mxu1 %v15318_v3  ;;  %v2491_v22 = vsel %vm2486_vm1, %v15368_v47, %v15308_v62  ;;  %v2783_v62 = vsel %vm2781_vm2, %v15344_v33, %v15409_v16 }
 0x221   : > { %5643 = vrot.lane.b32.xlu1 %v15260_v0, %s14498_s29  ;;  %13315 = vmatprep.subr.msk.mxu1 %vm331_vm0, %v2490_v10  ;;  %v2782_v47 = vsel %vm2781_vm2, %v15364_v8, %v15344_v33  ;;  %v3373_v7 = vsel %vm3371_vm4, %v15511_v37, %v15546_v42 }
 0x222   : > { %5923 = vrot.lane.b32.xlu0 %v15551_v24, %s17067_s23  ;;  %13316 = vmatpush1.msk.msra.mxu1 %vm331_vm0, %v2489_v9 }
 0x223   : > { %v15568_v52 = vpop.permute.xlu1 %3367  ;;  %13317 = vmatmul.mubr.msk.f32.vlgmr.msra.gmra.mrb[4].mxu1 %vm775_vm10, %v15349_v35  ;;  %13318 = vmatprep.subr.msk.mxu1 %vm331_vm0, %v2492_v49  ;;  %v15573_v11 = vpop.permute.xlu0 %3320 }
 0x224   : > { %13319 = vmatpush1.msk.msra.mxu1 %vm331_vm0, %v2491_v22  ;;  %2713 = vmatprep.mubr.f32.mxu1 %v15318_v3 }
 0x225   : > { %5357 = vrot.lane.b32.xlu1 %v15382_v23, %s14506_s19  ;;  %13321 = vmatprep.subr.msk.mxu1 %vm331_vm0, %v2783_v62 }
 0x226   : > { %5890 = vrot.lane.b32.xlu0 %v5886_v39, %s14510_s15 }
 0x227   : > { %v15593_v38 = vpop.permute.xlu1 %3654  ;;  %13320 = vmatmul.mubr.msk.f32.vlgmr.msra.gmra.mrb[6].mxu1 %vm775_vm10, %v15349_v35  ;;  %v15597_v13 = vpop.permute.xlu0 %3365 }
 0x228   : > { %13322 = vmatpush1.msk.msra.mxu1 %vm331_vm0, %v2782_v47  ;;  %2866 = vmatprep.mubr.f32.mxu1 %v15318_v3  ;;  %v3376_v55 = vsel %vm3371_vm4, %v15597_v13, %v15568_v52  ;;  %v6738_v47 = vld [vmem:[%s17058_s3] sm:$0x3f] }
 0x229   : > { %5921 = vrot.lane.b32.xlu1 %v15601_v43, %s17067_s23 }
 0x22a   : > { %5927 = vrot.lane.b32.xlu0 %v15260_v0, %s17067_s23 }
 0x22b   : > { %v2774_v33 = vpop.permute.xlu1 %2773  ;;  %13323 = vmatmul.mubr.msk.f32.vlgmr.msra.gmra.mrb[8].mxu1 %vm775_vm10, %v15427_v5  ;;  %v15611_v35 = vpop.permute.xlu0 %3369 }
 0x22c   : > { %v2784_v8 = vsel %vm2781_vm2, %v15409_v16, %v2774_v33  ;;  %v2785_v4 = vsel %vm2781_vm2, %v2774_v33, %v15437_v44  ;;  %2937 = vmatprep.mubr.f32.mxu1 %v15318_v3  ;;  %v2786_v16 = vsel %vm2781_vm2, %v15437_v44, %v15404_v60  ;;  %v3077_v60 = vsel %vm3076_vm3, %v15458_v59, %v15423_v14 }
 0x22d   : > { %5919 = vrot.lane.b32.xlu1 %v15579_v53, %s17067_s23  ;;  %13324 = vmatprep.subr.msk.mxu1 %vm331_vm0, %v2785_v4  ;;  %v3082_v59 = vsel %vm3076_vm3, %v15478_v48, %v15538_v61  ;;  %v3372_v48 = vsel %vm3371_vm4, %v15534_v29, %v15511_v37  ;;  %v3377_v27 = vsel %vm3371_vm4, %v15568_v52, %v15611_v35 }
 0x22e   : > { %5641 = vrot.lane.b32.xlu0 %v15382_v23, %s14498_s29  ;;  %13325 = vmatpush1.msk.msra.mxu1 %vm331_vm0, %v2784_v8  ;;  %v3078_v23 = vsel %vm3076_vm3, %v15423_v14, %v15482_v45  ;;  %v6170_v14 = vld [vmem:[%s17058_s3] sm:$0x3f] }
 0x22f   : > { %v15630_v12 = vpop.permute.xlu1 %3652  ;;  %13326 = vmatmul.mubr.msk.f32.vlgmr.msra.gmra.mrb[4].mxu1 %vm775_vm10, %v15427_v5  ;;  %13327 = vmatprep.subr.msk.mxu1 %vm331_vm0, %v2787_v54  ;;  %v15635_v25 = vpop.permute.xlu0 %3656 }
 0x230   : > { %13328 = vmatpush1.msk.msra.mxu1 %vm331_vm0, %v2786_v16  ;;  %3008 = vmatprep.mubr.f32.mxu1 %v15318_v3  ;;  %v3667_v29 = vsel %vm775_vm10, %v15593_v38, %v15635_v25  ;;  %v3666_v61 = vsel %vm775_vm10, %v15630_v12, %v15593_v38 }
 0x231   : > { %5929 = vrot.lane.b32.xlu1 %v15274_v15, %s17067_s23  ;;  %13330 = vmatprep.subr.msk.mxu1 %vm331_vm0, %v3078_v23  ;;  %v7022_v23 = vld [vmem:[%s17058_s3] sm:$0x3f] }
 0x232   : > { %6205 = vrot.lane.b32.xlu0 %v15601_v43, %s14500_s17 }
 0x233   : > { %v15650_v44 = vpop.permute.xlu1 %3662  ;;  %13329 = vmatmul.mubr.msk.f32.vlgmr.msra.gmra.mrb[6].mxu1 %vm775_vm10, %v15427_v5  ;;  %v15654_v17 = vpop.permute.xlu0 %3615 }
 0x234   : > { %13331 = vmatpush1.msk.msra.mxu1 %vm331_vm0, %v3077_v60  ;;  %3161 = vmatprep.mubr.f32.mxu1 %v15318_v3 }
 0x235   : > { %6207 = vrot.lane.b32.xlu1 %v15551_v24, %s14500_s17 }
 0x236   : > { %6203 = vrot.lane.b32.xlu0 %v15579_v53, %s14500_s17 }
 0x237   : > { %v3069_v18 = vpop.permute.xlu1 %3068  ;;  %13332 = vmatmul.mubr.msk.f32.vlgmr.msra.gmra.mrb[8].mxu1 %vm775_vm10, %v15492_v26  ;;  %v15667_v5 = vpop.permute.xlu0 %3660 }
 0x238   : > { %v3079_v19 = vsel %vm3076_vm3, %v15482_v45, %v3069_v18  ;;  %v3080_v20 = vsel %vm3076_vm3, %v3069_v18, %v15516_v2  ;;  %3232 = vmatprep.mubr.f32.mxu1 %v15318_v3  ;;  %v15692_v45 = vcombine.high %v15551_v24, %v15551_v24  ;;  %v3670_v52 = vsel %vm775_vm10, %v15667_v5, %v15650_v44 }
 0x239   : > { %6174 = vrot.lane.b32.xlu1 %v6170_v14, %s14511_s16  ;;  %13333 = vmatprep.subr.msk.mxu1 %vm331_vm0, %v3080_v20 }
 0x23a   : > { %6213 = vrot.lane.b32.xlu0 %v15274_v15, %s14500_s17  ;;  %13334 = vmatpush1.msk.msra.mxu1 %vm331_vm0, %v3079_v19 }
 0x23b   : > { %v15685_v58 = vpop.permute.xlu1 %3948  ;;  %13335 = vmatmul.mubr.msk.f32.vlgmr.msra.gmra.mrb[4].mxu1 %vm775_vm10, %v15492_v26  ;;  %13336 = vmatprep.subr.msk.mxu1 %vm331_vm0, %v3082_v59  ;;  %v3665_v21 = vpop.permute.xlu0 %3664 }
 0x23c   : > { %13337 = vmatpush1.msk.msra.mxu1 %vm331_vm0, %v3081_v1  ;;  %3303 = vmatprep.mubr.f32.mxu1 %v15318_v3  ;;  %v3671_v22 = vsel %vm775_vm10, %v15650_v44, %v3665_v21 }
 0x23d   : > { %5925 = vrot.lane.b32.xlu1 %v15692_v45, %s17067_s23  ;;  %13339 = vmatprep.subr.msk.mxu1 %vm331_vm0, %v3373_v7  ;;  %s14512_s23 = smov 88   ;;  %v7306_v7 = vld [vmem:[%s17058_s3] sm:$0x3f] }
 0x23e   : > { %6491 = vrot.lane.b32.xlu0 %v15551_v24, %s14511_s16 }
 0x23f   : > { %v15707_v30 = vpop.permute.xlu1 %3946  ;;  %13338 = vmatmul.mubr.msk.f32.vlgmr.msra.gmra.mrb[6].mxu1 %vm775_vm10, %v15492_v26  ;;  %v15711_v41 = vpop.permute.xlu0 %3950 }
 0x240   : > { %13340 = vmatpush1.msk.msra.mxu1 %vm331_vm0, %v3372_v48  ;;  %3456 = vmatprep.mubr.f32.mxu1 %v15318_v3  ;;  %v3962_v62 = vsel %vm3960_vm5, %v15685_v58, %v15711_v41  ;;  %v3961_v38 = vsel %vm3960_vm5, %v15707_v30, %v15685_v58 }
 0x241   : > { %6211 = vrot.lane.b32.xlu1 %v15260_v0, %s14500_s17 }
 0x242   : > { %6458 = vrot.lane.b32.xlu0 %v6454_v63, %s14512_s23 }
 0x243   : > { %v3364_v40 = vpop.permute.xlu1 %3363  ;;  %13341 = vmatmul.mubr.msk.f32.vlgmr.msra.gmra.mrb[8].mxu1 %vm775_vm10, %v15573_v11  ;;  %v15723_v26 = vpop.permute.xlu0 %3909 }
 0x244   : > { %v3374_v37 = vsel %vm3371_vm4, %v15546_v42, %v3364_v40  ;;  %v3375_v2 = vsel %vm3371_vm4, %v3364_v40, %v15597_v13  ;;  %3527 = vmatprep.mubr.f32.mxu1 %v15318_v3  ;;  %vm6499_vm4 = vcmask 736256  }
 0x245   : > { %6489 = vrot.lane.b32.xlu1 %v15601_v43, %s14511_s16  ;;  %13342 = vmatprep.subr.msk.mxu1 %vm331_vm0, %v3375_v2 }
 0x246   : > { %6209 = vrot.lane.b32.xlu0 %v15692_v45, %s14500_s17  ;;  %13343 = vmatpush1.msk.msra.mxu1 %vm331_vm0, %v3374_v37  ;;  %s14513_s17 = smov 89  }
 0x247   : > { %v15742_v51 = vpop.permute.xlu1 %3956  ;;  %13344 = vmatmul.mubr.msk.f32.vlgmr.msra.gmra.mrb[4].mxu1 %vm775_vm10, %v15573_v11  ;;  %13345 = vmatprep.subr.msk.mxu1 %vm331_vm0, %v3377_v27  ;;  %v3955_v28 = vpop.permute.xlu0 %3954 }
 0x248   : > { %13346 = vmatpush1.msk.msra.mxu1 %vm331_vm0, %v3376_v55  ;;  %3598 = vmatprep.mubr.f32.mxu1 %v15318_v3  ;;  %v3965_v12 = vsel %vm3960_vm5, %v3955_v28, %v15742_v51 }
 0x249   : > { %6487 = vrot.lane.b32.xlu1 %v15579_v53, %s14511_s16  ;;  %13348 = vmatprep.subr.msk.mxu1 %vm331_vm0, %v3667_v29 }
 0x24a   : > { %6495 = vrot.lane.b32.xlu0 %v15260_v0, %s14511_s16 }
 0x24b   : > { %v15760_v56 = vpop.permute.xlu1 %4204  ;;  %13347 = vmatmul.mubr.msk.f32.vlgmr.msra.gmra.mrb[6].mxu1 %vm775_vm10, %v15573_v11 }
 0x24c   : > { %13349 = vmatpush1.msk.msra.mxu1 %vm331_vm0, %v3666_v61  ;;  %v3959_v6 = vpop.permute.xlu0 %3958  ;;  %3750 = vmatprep.mubr.f32.mxu1 %v15318_v3  ;;  %v13486_v61 = vld.sshfl [vmem:[#allocation2 + $0xa] sm:$0x33 pattern:$0x76325410] }
 0x24d   : > { %6497 = vrot.lane.b32.xlu1 %v15274_v15, %s14511_s16  ;;  %v3966_v16 = vsel %vm3960_vm5, %v15742_v51, %v3959_v6 }
 0x24e   : > { %6773 = vrot.lane.b32.xlu0 %v15601_v43, %s14513_s17 }
 0x24f   : > { %v3659_v42 = vpop.permute.xlu1 %3658  ;;  %13350 = vmatmul.mubr.msk.f32.vlgmr.msra.gmra.mrb[8].mxu1 %vm775_vm10, %v15654_v17 }
 0x250   : > { %v3668_v9 = vsel %vm775_vm10, %v15635_v25, %v3659_v42  ;;  %v15774_v10 = vpop.permute.xlu0 %4501  ;;  %v3669_v49 = vsel %vm775_vm10, %v3659_v42, %v15667_v5  ;;  %3821 = vmatprep.mubr.f32.mxu1 %v15318_v3 }
 0x251   : > { %6775 = vrot.lane.b32.xlu1 %v15551_v24, %s14513_s17  ;;  %13351 = vmatprep.subr.msk.mxu1 %vm331_vm0, %v3669_v49  ;;  %v7622_v49 = vcombine.high %v13486_v61, %v13486_v61 }
 0x252   : > { %6771 = vrot.lane.b32.xlu0 %v15579_v53, %s14513_s17  ;;  %13352 = vmatpush1.msk.msra.mxu1 %vm331_vm0, %v3668_v9 }
 0x253   : > { %v15790_v11 = vpop.permute.xlu1 %4503  ;;  %13353 = vmatmul.mubr.msk.f32.vlgmr.msra.gmra.mrb[4].mxu1 %vm775_vm10, %v15654_v17  ;;  %13354 = vmatprep.subr.msk.mxu1 %vm331_vm0, %v3671_v22 }
 0x254   : > { %v15795_v39 = vpop.permute.xlu0 %4499  ;;  %13355 = vmatpush1.msk.msra.mxu1 %vm331_vm0, %v3670_v52  ;;  %3892 = vmatprep.mubr.f32.mxu1 %v15318_v3  ;;  %v4513_v20 = vsel %vm4511_vm6, %v15774_v10, %v15790_v11 }
 0x255   : > { %6493 = vrot.lane.b32.xlu1 %v15692_v45, %s14511_s16  ;;  %13357 = vmatprep.subr.msk.mxu1 %vm331_vm0, %v3962_v62  ;;  %s14514_s16 = smov 86   ;;  %v4512_v59 = vsel %vm4511_vm6, %v15795_v39, %v15774_v10 }
 0x256   : > { %6777 = vrot.lane.b32.xlu0 %v15692_v45, %s14513_s17 }
 0x257   : > { %v15813_v13 = vpop.permute.xlu1 %4470  ;;  %13356 = vmatmul.mubr.msk.f32.vlgmr.msra.gmra.mrb[6].mxu1 %vm775_vm10, %v15654_v17 }
 0x258   : > { %13358 = vmatpush1.msk.msra.mxu1 %vm331_vm0, %v3961_v38  ;;  %v15818_v33 = vpop.permute.xlu0 %4509  ;;  %4045 = vmatprep.mubr.f32.mxu1 %v15318_v3 }
 0x259   : > { %6742 = vrot.lane.b32.xlu1 %v6738_v47, %s14514_s16 }
 0x25a   : > { %6781 = vrot.lane.b32.xlu0 %v15274_v15, %s14513_s17 }
 0x25b   : > { %v3953_v35 = vpop.permute.xlu1 %3952  ;;  %13359 = vmatmul.mubr.msk.f32.vlgmr.msra.gmra.mrb[8].mxu1 %vm775_vm10, %v15723_v26 }
 0x25c   : > { %v3963_v8 = vsel %vm3960_vm5, %v15711_v41, %v3953_v35  ;;  %v15828_v4 = vpop.permute.xlu0 %4787  ;;  %v3964_v54 = vsel %vm3960_vm5, %v3953_v35, %v3955_v28  ;;  %4116 = vmatprep.mubr.f32.mxu1 %v15318_v3 }
 0x25d   : > { %6779 = vrot.lane.b32.xlu1 %v15260_v0, %s14513_s17  ;;  %13360 = vmatprep.subr.msk.mxu1 %vm331_vm0, %v3964_v54  ;;  %s14516_s17 = smov 87  }
 0x25e   : > { %7059 = vrot.lane.b32.xlu0 %v15551_v24, %s14512_s23  ;;  %13361 = vmatpush1.msk.msra.mxu1 %vm331_vm0, %v3963_v8 }
 0x25f   : > { %v4508_v25 = vpop.permute.xlu1 %4507  ;;  %13362 = vmatmul.mubr.msk.f32.vlgmr.msra.gmra.mrb[4].mxu1 %vm775_vm10, %v15723_v26  ;;  %13363 = vmatprep.subr.msk.mxu1 %vm331_vm0, %v3966_v16 }
 0x260   : > { %v15848_v60 = vpop.permute.xlu0 %4754  ;;  %13364 = vmatpush1.msk.msra.mxu1 %vm331_vm0, %v3965_v12  ;;  %4187 = vmatprep.mubr.f32.mxu1 %v15318_v3  ;;  %v4516_v63 = vsel %vm4511_vm6, %v4508_v25, %v15818_v33 }
 0x261   : > { %7057 = vrot.lane.b32.xlu1 %v15601_v43, %s14512_s23  ;;  %13367 = vmatprep.subr.msk.mxu1 %vm331_vm0, %v15601_v43 }
 0x262   : > { %7026 = vrot.lane.b32.xlu0 %v7022_v23, %s14515_s14  ;;  %s14517_s14 = smov 82  }
 0x263   : > { %v4786_v44 = vpop.permute.xlu1 %4785  ;;  %13365 = vmatmul.mubr.msk.f32.vlgmr.msra.gmra.mrb[6].mxu1 %vm775_vm10, %v15723_v26 }
 0x264   : > { %13368 = vmatpush1.msk.msra.mxu1 %vm331_vm0, %v15579_v53  ;;  %v15860_v17 = vpop.permute.xlu0 %4791  ;;  %4311 = vmatprep.mubr.f32.mxu1 %v15318_v3  ;;  %v4797_v37 = vsel %vm4795_vm7, %v4786_v44, %v15828_v4 }
 0x265   : > { %13370 = vmatprep.subr.msk.mxu1 %vm331_vm0, %v15692_v45  ;;  %7055 = vrot.lane.b32.xlu1 %v15579_v53, %s14512_s23 }
 0x266   : > { %7063 = vrot.lane.b32.xlu0 %v15260_v0, %s14512_s23 }
 0x267   : > { %v4784_v14 = vpop.permute.xlu1 %4783  ;;  %13369 = vmatmul.mubr.msk.f32.vlgmr.msra.gmra.mrb[8].mxu1 %vm775_vm10, %v15760_v56 }
 0x268   : > { %13371 = vmatpush1.msk.msra.mxu1 %vm331_vm0, %v15551_v24  ;;  %v15873_v18 = vpop.permute.xlu0 %5069  ;;  %4382 = vmatprep.mubr.f32.mxu1 %v15318_v3 }
 0x269   : > { %13373 = vmatprep.subr.msk.mxu1 %vm331_vm0, %v15274_v15  ;;  %7061 = vrot.lane.b32.xlu1 %v15692_v45, %s14512_s23 }
 0x26a   : > { %7341 = vrot.lane.b32.xlu0 %v15601_v43, %s14516_s17 }
 0x26b   : > { %v15882_v5 = vpop.permute.xlu1 %4793  ;;  %13372 = vmatmul.mubr.msk.f32.vlgmr.msra.gmra.mrb[4].mxu1 %vm775_vm10, %v15760_v56 }
 0x26c   : > { %13374 = vmatpush1.msk.msra.mxu1 %vm331_vm0, %v15260_v0  ;;  %v15888_v19 = vpop.permute.xlu0 %5067  ;;  %4453 = vmatprep.mubr.f32.mxu1 %v15318_v3 }
 0x26d   : > { %13377 = vmatprep.subr.msk.mxu1 %vm331_vm0, %v4513_v20  ;;  %7065 = vrot.lane.b32.xlu1 %v15274_v15, %s14512_s23  ;;  %v5080_v6 = vsel %vm5079_vm11, %v15888_v19, %v15873_v18  ;;  %s17074_s23 = smov 96  }
 0x26e   : > { %7339 = vrot.lane.b32.xlu0 %v15579_v53, %s14516_s17 }
 0x26f   : > { %v15902_v1 = vpop.permute.xlu1 %5071  ;;  %13375 = vmatmul.mubr.msk.f32.vlgmr.msra.gmra.mrb[6].mxu1 %vm775_vm10, %v15760_v56  ;;  %v14519_v56 = vmov 0  }
 0x270   : > { %13378 = vmatpush1.msk.msra.mxu1 %vm331_vm0, %v4512_v59  ;;  %v4506_v58 = vpop.permute.xlu0 %4505  ;;  %4595 = vmatprep.mubr.f32.mxu1 %v15318_v3  ;;  %v5081_v29 = vsel %vm5079_vm11, %v15873_v18, %v15902_v1 }
 0x271   : > { %7343 = vrot.lane.b32.xlu1 %v15551_v24, %s14516_s17  ;;  %v4515_v21 = vsel %vm4511_vm6, %v4506_v58, %v4508_v25  ;;  %v4514_v48 = vsel %vm4511_vm6, %v15790_v11, %v4506_v58  ;;  %14188 = vset.pattern.permute.xlu0 %v14519_v56 }
 0x272   : > { %7345 = vrot.lane.b32.xlu0 %v15692_v45, %s14516_s17  ;;  %13380 = vmatprep.subr.msk.mxu1 %vm331_vm0, %v4515_v21 }
 0x273   : > { %v15919_v30 = vpop.permute.xlu1 %5038  ;;  %13379 = vmatmul.mubr.msk.f32.vlgmr.msra.gmra.mrb[8].mxu1 %vm775_vm10, %v15813_v13  ;;  %14189 = vset.pattern.permute.xlu1 %v14519_v56 }
 0x274   : > { %13381 = vmatpush1.msk.msra.mxu1 %vm331_vm0, %v4514_v48  ;;  %v15924_v41 = vpop.permute.xlu0 %5077  ;;  %4666 = vmatprep.mubr.f32.mxu1 %v15318_v3 }
 0x275   : > { %13383 = vmatprep.subr.msk.mxu1 %vm331_vm0, %v15818_v33  ;;  %7310 = vrot.lane.b32.xlu1 %v7306_v7, %s14517_s14 }
 0x276   : > { %7349 = vrot.lane.b32.xlu0 %v15274_v15, %s14516_s17  ;;  %v4796_v15 = vsel %vm4795_vm7, %v4784_v14, %v4786_v44 }
 0x277   : > { %v15933_v40 = vpop.permute.xlu1 %5075  ;;  %13382 = vmatmul.mubr.msk.f32.vlgmr.msra.gmra.mrb[4].mxu1 %vm775_vm10, %v15813_v13 }
 0x278   : > { %13384 = vmatpush1.msk.msra.mxu1 %vm331_vm0, %v4516_v63  ;;  %v15938_v26 = vpop.permute.xlu0 %5355  ;;  %4737 = vmatprep.mubr.f32.mxu1 %v15318_v3 }
 0x279   : > { %13387 = vmatprep.subr.msk.mxu1 %vm331_vm0, %v4797_v37  ;;  %7347 = vrot.lane.b32.xlu1 %v15260_v0, %s14516_s17 }
 0x27a   : > { %7625 = vrot.lane.b32.xlu0 %v15601_v43, %s14514_s16  ;;  %v7590_v43 = vld [vmem:[%s17058_s3] sm:$0x3f] }
 0x27b   : > { %v15949_v2 = vpop.permute.xlu1 %5353  ;;  %13385 = vmatmul.mubr.msk.f32.vlgmr.msra.gmra.mrb[6].mxu1 %vm775_vm10, %v15813_v13 }
 0x27c   : > { %13388 = vmatpush1.msk.msra.mxu1 %vm331_vm0, %v4796_v15  ;;  %v15954_v27 = vpop.permute.xlu0 %5322  ;;  %4879 = vmatprep.mubr.f32.mxu1 %v15318_v3  ;;  %v5365_v47 = vsel %vm5363_vm12, %v15949_v2, %v15938_v26 }
 0x27d   : > { %756 = vrot.lane.b32.xlu1 %v14977_v57, %s14483_s13 }
 0x27e   : > { %754 = vrot.lane.b32.xlu0 %v14948_v46, %s14483_s13  ;;  %s14518_s13 = smov 80   ;;  %v4800_v46 = vsel %vm4795_vm7, %v15860_v17, %v15882_v5 }
 0x27f   : > { %v4790_v0 = vpop.permute.xlu1 %4789  ;;  %13389 = vmatmul.mubr.msk.f32.vlgmr.msra.gmra.mrb[8].mxu1 %vm775_vm10, %v15848_v60 }
 0x280   : > { %v4798_v55 = vsel %vm4795_vm7, %v15828_v4, %v4790_v0  ;;  %v15968_v51 = vpop.permute.xlu0 %5359  ;;  %v4799_v28 = vsel %vm4795_vm7, %v4790_v0, %v15860_v17  ;;  %4950 = vmatprep.mubr.f32.mxu1 %v15318_v3  ;;  %vm6783_vm7 = vcmask 728064  }
 0x281   : > { %7627 = vrot.lane.b32.xlu1 %v15551_v24, %s14514_s16  ;;  %13390 = vmatprep.subr.msk.mxu1 %vm331_vm0, %v4799_v28 }
 0x282   : > { %7594 = vrot.lane.b32.xlu0 %v7590_v43, %s14518_s13  ;;  %13391 = vmatpush1.msk.msra.mxu1 %vm331_vm0, %v4798_v55 }
 0x283   : > { %v5352_v57 = vpop.permute.xlu1 %5351  ;;  %13392 = vmatmul.mubr.msk.f32.vlgmr.msra.gmra.mrb[4].mxu1 %vm775_vm10, %v15848_v60  ;;  %13393 = vmatprep.subr.msk.mxu1 %vm331_vm0, %v15882_v5 }
 0x284   : > { %v15985_v24 = vpop.permute.xlu0 %5637  ;;  %13394 = vmatpush1.msk.msra.mxu1 %vm331_vm0, %v4800_v46  ;;  %5021 = vmatprep.mubr.f32.mxu1 %v15318_v3  ;;  %v5364_v38 = vsel %vm5363_vm12, %v5352_v57, %v15949_v2 }
 0x285   : > { %7623 = vrot.lane.b32.xlu1 %v15579_v53, %s14514_s16  ;;  %13397 = vmatprep.subr.msk.mxu1 %vm331_vm0, %v5081_v29  ;;  %v7874_v53 = vld [vmem:[%s17059_s4] sm:$0x3f] }
 0x286   : > { %7631 = vrot.lane.b32.xlu0 %v13486_v61, %s14514_s16 }
 0x287   : > { %v5362_v42 = vpop.permute.xlu1 %5361  ;;  %13395 = vmatmul.mubr.msk.f32.vlgmr.msra.gmra.mrb[6].mxu1 %vm775_vm10, %v15848_v60 }
 0x288   : > { %13398 = vmatpush1.msk.msra.mxu1 %vm331_vm0, %v5080_v6  ;;  %v5074_v9 = vpop.permute.xlu0 %5073  ;;  %5163 = vmatprep.mubr.f32.mxu1 %v15318_v3  ;;  %v5368_v16 = vsel %vm5363_vm12, %v15968_v51, %v5362_v42 }
 0x289   : > { %7629 = vrot.lane.b32.xlu1 %v15692_v45, %s14514_s16  ;;  %v5083_v10 = vsel %vm5079_vm11, %v5074_v9, %v15933_v40  ;;  %v5082_v22 = vsel %vm5079_vm11, %v15902_v1, %v5074_v9  ;;  %v5084_v45 = vsel %vm5079_vm11, %v15933_v40, %v15924_v41  ;;  %vm7067_vm11 = vcmask 719872  }
 0x28a   : > { %13400 = vmatprep.subr.msk.mxu1 %vm331_vm0, %v5083_v10  ;;  %7877 = vperm.xlu0 %14188, %v7874_v53  }
 0x28b   : > { %v5640_v52 = vpop.permute.xlu1 %5639  ;;  %13399 = vmatmul.mubr.msk.f32.vlgmr.msra.gmra.mrb[8].mxu1 %vm775_vm10, %v15919_v30 }
 0x28c   : > { %13401 = vmatpush1.msk.msra.mxu1 %vm331_vm0, %v5082_v22  ;;  %v5636_v11 = vpop.permute.xlu0 %5635  ;;  %5234 = vmatprep.mubr.f32.mxu1 %v15318_v3  ;;  %v5649_v23 = vsel %vm5647_vm13, %v15985_v24, %v5640_v52 }
 0x28d   : > { %13403 = vmatprep.subr.msk.mxu1 %vm331_vm0, %v15924_v41  ;;  %7633 = vrot.lane.b32.xlu1 %v7622_v49, %s14514_s16  ;;  %v5648_v60 = vsel %vm5647_vm13, %v5636_v11, %v15985_v24 }
 0x28f   : > { %v5607_v39 = vpop.permute.xlu1 %5606  ;;  %13402 = vmatmul.mubr.msk.f32.vlgmr.msra.gmra.mrb[4].mxu1 %vm775_vm10, %v15919_v30 }
 0x290   : > { %13404 = vmatpush1.msk.msra.mxu1 %vm331_vm0, %v5084_v45  ;;  %v5646_v62 = vpop.permute.xlu0 %5645  ;;  %5305 = vmatprep.mubr.f32.mxu1 %v15318_v3 }
 0x291   : > { %13407 = vmatprep.subr.msk.mxu1 %vm331_vm0, %v5365_v47 }
 0x293   : > { %v5644_v13 = vpop.permute.xlu1 %5643  ;;  %13405 = vmatmul.mubr.msk.f32.vlgmr.msra.gmra.mrb[6].mxu1 %vm775_vm10, %v15919_v30 }
 0x294   : > { %13408 = vmatpush1.msk.msra.mxu1 %vm331_vm0, %v5364_v38  ;;  %v5924_v33 = vpop.permute.xlu0 %5923  ;;  %5447 = vmatprep.mubr.f32.mxu1 %v15318_v3  ;;  %v5652_v20 = vsel %vm5647_vm13, %v5644_v13, %v5646_v62 }
 0x297   : > { %v5358_v35 = vpop.permute.xlu1 %5357  ;;  %13409 = vmatmul.mubr.msk.f32.vlgmr.msra.gmra.mrb[8].mxu1 %vm775_vm10, %v15954_v27 }
 0x298   : > { %v5366_v8 = vsel %vm5363_vm12, %v15938_v26, %v5358_v35  ;;  %v16041_v4 = vpop.permute.xlu0 %5890  ;;  %v5367_v54 = vsel %vm5363_vm12, %v5358_v35, %v15968_v51  ;;  %5518 = vmatprep.mubr.f32.mxu1 %v15318_v3 }
 0x299   : > { %13410 = vmatprep.subr.msk.mxu1 %vm331_vm0, %v5367_v54 }
 0x29a   : > { %13411 = vmatpush1.msk.msra.mxu1 %vm331_vm0, %v5366_v8 }
 0x29b   : > { %v5922_v12 = vpop.permute.xlu1 %5921  ;;  %13412 = vmatmul.mubr.msk.f32.vlgmr.msra.gmra.mrb[4].mxu1 %vm775_vm10, %v15954_v27  ;;  %13413 = vmatprep.subr.msk.mxu1 %vm331_vm0, %v5362_v42 }
 0x29c   : > { %v5928_v25 = vpop.permute.xlu0 %5927  ;;  %13414 = vmatpush1.msk.msra.mxu1 %vm331_vm0, %v5368_v16  ;;  %5589 = vmatprep.mubr.f32.mxu1 %v15318_v3  ;;  %v5933_v58 = vsel %vm5931_vm14, %v5922_v12, %v5924_v33 }
 0x29d   : > { %13417 = vmatprep.subr.msk.mxu1 %vm331_vm0, %v5649_v23 }
 0x29f   : > { %v5920_v44 = vpop.permute.xlu1 %5919  ;;  %13415 = vmatmul.mubr.msk.f32.vlgmr.msra.gmra.mrb[6].mxu1 %vm775_vm10, %v15954_v27  ;;  %v16094_v27 = vld [vmem:[#allocation4] sm:$0xff] }
 0x2a0   : > { %13418 = vmatpush1.msk.msra.mxu1 %vm331_vm0, %v5648_v60  ;;  %v5642_v17 = vpop.permute.xlu0 %5641  ;;  %5731 = vmatprep.mubr.f32.mxu1 %v15318_v3  ;;  %v5932_v21 = vsel %vm5931_vm14, %v5920_v44, %v5922_v12 }
 0x2a1   : > { %v5651_v14 = vsel %vm5647_vm13, %v5642_v17, %v5644_v13  ;;  %v5650_v18 = vsel %vm5647_vm13, %v5640_v52, %v5642_v17 }
 0x2a2   : > { %13420 = vmatprep.subr.msk.mxu1 %vm331_vm0, %v5651_v14 }
 0x2a3   : > { %v5930_v5 = vpop.permute.xlu1 %5929  ;;  %13419 = vmatmul.mubr.msk.f32.vlgmr.msra.gmra.mrb[8].mxu1 %vm775_vm10, %v5607_v39 }
 0x2a4   : > { %13421 = vmatpush1.msk.msra.mxu1 %vm331_vm0, %v5650_v18  ;;  %v6206_v19 = vpop.permute.xlu0 %6205  ;;  %5802 = vmatprep.mubr.f32.mxu1 %v15318_v3  ;;  %v5936_v26 = vsel %vm5931_vm14, %v5928_v25, %v5930_v5 }
 0x2a5   : > { %13423 = vmatprep.subr.msk.mxu1 %vm331_vm0, %v5646_v62 }
 0x2a7   : > { %v6208_v59 = vpop.permute.xlu1 %6207  ;;  %13422 = vmatmul.mubr.msk.f32.vlgmr.msra.gmra.mrb[4].mxu1 %vm775_vm10, %v5607_v39 }
 0x2a8   : > { %13424 = vmatpush1.msk.msra.mxu1 %vm331_vm0, %v5652_v20  ;;  %v6204_v1 = vpop.permute.xlu0 %6203  ;;  %5873 = vmatprep.mubr.f32.mxu1 %v15318_v3  ;;  %v6217_v2 = vsel %vm6215_vm15, %v6206_v19, %v6208_v59 }
 0x2a9   : > { %13427 = vmatprep.subr.msk.mxu1 %vm331_vm0, %v5933_v58 }
 0x2ab   : > { %v6175_v7 = vpop.permute.xlu1 %6174  ;;  %13425 = vmatmul.mubr.msk.f32.vlgmr.msra.gmra.mrb[6].mxu1 %vm775_vm10, %v5607_v39 }
 0x2ac   : > { %13428 = vmatpush1.msk.msra.mxu1 %vm331_vm0, %v5932_v21  ;;  %v6214_v48 = vpop.permute.xlu0 %6213  ;;  %6015 = vmatprep.mubr.f32.mxu1 %v15318_v3 }
 0x2af   : > { %v5926_v30 = vpop.permute.xlu1 %5925  ;;  %13429 = vmatmul.mubr.msk.f32.vlgmr.msra.gmra.mrb[8].mxu1 %vm775_vm10, %v16041_v4 }
 0x2b0   : > { %v5934_v41 = vsel %vm5931_vm14, %v5924_v33, %v5926_v30  ;;  %v6492_v63 = vpop.permute.xlu0 %6491  ;;  %v5935_v40 = vsel %vm5931_vm14, %v5926_v30, %v5928_v25  ;;  %6086 = vmatprep.mubr.f32.mxu1 %v15318_v3  ;;  %v6216_v3 = vsel %vm6215_vm15, %v6204_v1, %v6206_v19 }
 0x2b1   : > { %13430 = vmatprep.subr.msk.mxu1 %vm331_vm0, %v5935_v40 }
 0x2b2   : > { %13431 = vmatpush1.msk.msra.mxu1 %vm331_vm0, %v5934_v41 }
 0x2b3   : > { %v6212_v37 = vpop.permute.xlu1 %6211  ;;  %13432 = vmatmul.mubr.msk.f32.vlgmr.msra.gmra.mrb[4].mxu1 %vm775_vm10, %v16041_v4  ;;  %13433 = vmatprep.subr.msk.mxu1 %vm331_vm0, %v5930_v5 }
 0x2b4   : > { %v6459_v15 = vpop.permute.xlu0 %6458  ;;  %13434 = vmatpush1.msk.msra.mxu1 %vm331_vm0, %v5936_v26  ;;  %6157 = vmatprep.mubr.f32.mxu1 %v16094_v27  ;;  %v6220_v57 = vsel %vm6215_vm15, %v6212_v37, %v6214_v48 }
 0x2b5   : > { %13437 = vmatprep.subr.msk.mxu1 %vm331_vm0, %v6217_v2 }
 0x2b7   : > { %v6490_v0 = vpop.permute.xlu1 %6489  ;;  %13435 = vmatmul.mubr.msk.f32.vlgmr.msra.gmra.mrb[6].mxu1 %vm775_vm10, %v16041_v4 }
 0x2b8   : > { %13438 = vmatpush1.msk.msra.mxu1 %vm331_vm0, %v6216_v3  ;;  %v6210_v43 = vpop.permute.xlu0 %6209  ;;  %6299 = vmatprep.mubr.f32.mxu1 %v16094_v27  ;;  %v6501_v61 = vsel %vm6499_vm4, %v6490_v0, %v6492_v63 }
 0x2b9   : > { %v6219_v55 = vsel %vm6215_vm15, %v6210_v43, %v6212_v37  ;;  %v6218_v51 = vsel %vm6215_vm15, %v6208_v59, %v6210_v43  ;;  %vm7351_vm15 = vcmask 711680  }
 0x2ba   : > { %13440 = vmatprep.subr.msk.mxu1 %vm331_vm0, %v6219_v55 }
 0x2bb   : > { %v6488_v28 = vpop.permute.xlu1 %6487  ;;  %13439 = vmatmul.mubr.msk.f32.vlgmr.msra.gmra.mrb[8].mxu1 %vm775_vm10, %v6175_v7 }
 0x2bc   : > { %13441 = vmatpush1.msk.msra.mxu1 %vm331_vm0, %v6218_v51  ;;  %v6496_v46 = vpop.permute.xlu0 %6495  ;;  %6370 = vmatprep.mubr.f32.mxu1 %v16094_v27  ;;  %v6500_v56 = vsel %vm6499_vm4, %v6488_v28, %v6490_v0 }
 0x2bd   : > { %13443 = vmatprep.subr.msk.mxu1 %vm331_vm0, %v6214_v48 }
 0x2bf   : > { %v6498_v24 = vpop.permute.xlu1 %6497  ;;  %13442 = vmatmul.mubr.msk.f32.vlgmr.msra.gmra.mrb[4].mxu1 %vm775_vm10, %v6175_v7 }
 0x2c0   : > { %13444 = vmatpush1.msk.msra.mxu1 %vm331_vm0, %v6220_v57  ;;  %v6774_v29 = vpop.permute.xlu0 %6773  ;;  %6441 = vmatprep.mubr.f32.mxu1 %v16094_v27  ;;  %v6504_v22 = vsel %vm6499_vm4, %v6496_v46, %v6498_v24  ;;  %v16208_v57 = vld [vmem:[#allocation3] sm:$0x3f] }
 0x2c1   : > { %13447 = vmatprep.subr.msk.mxu1 %vm331_vm0, %v6501_v61  ;;  %7957 = vrot.lane.b32.xlu0 %v16208_v57, %s14490_s25 }
 0x2c3   : > { %v6776_v6 = vpop.permute.xlu1 %6775  ;;  %13445 = vmatmul.mubr.msk.f32.vlgmr.msra.gmra.mrb[6].mxu1 %vm775_vm10, %v6175_v7 }
 0x2c4   : > { %13448 = vmatpush1.msk.msra.mxu1 %vm331_vm0, %v6500_v56  ;;  %v6772_v42 = vpop.permute.xlu0 %6771  ;;  %6583 = vmatprep.mubr.f32.mxu1 %v16094_v27  ;;  %v6785_v45 = vsel %vm6783_vm7, %v6774_v29, %v6776_v6  ;;  %v7895_v56 = vsub.s32 0, %v14926_v31 }
 0x2c5   : > { %v6784_v39 = vsel %vm6783_vm7, %v6772_v42, %v6774_v29 }
 0x2c7   : > { %v6494_v53 = vpop.permute.xlu1 %6493  ;;  %13449 = vmatmul.mubr.msk.f32.vlgmr.msra.gmra.mrb[8].mxu1 %vm775_vm10, %v6459_v15 }
 0x2c8   : > { %v6502_v9 = vsel %vm6499_vm4, %v6492_v63, %v6494_v53  ;;  %v6778_v10 = vpop.permute.xlu0 %6777  ;;  %v6503_v49 = vsel %vm6499_vm4, %v6494_v53, %v6496_v46  ;;  %6654 = vmatprep.mubr.f32.mxu1 %v16094_v27  ;;  %vm7635_vm4 = vcmask 703488   ;;  %v712_v53 = vld [vmem:[%s17057_s2] sm:$0x3f] }
 0x2c9   : > { %13450 = vmatprep.subr.msk.mxu1 %vm331_vm0, %v6503_v49  ;;  %v6786_v13 = vsel %vm6783_vm7, %v6776_v6, %v6778_v10 }
 0x2ca   : > { %13451 = vmatpush1.msk.msra.mxu1 %vm331_vm0, %v6502_v9  ;;  %v7899_v9 = vsub.s32 1, %v14926_v31 }
 0x2cb   : > { %v6743_v52 = vpop.permute.xlu1 %6742  ;;  %13452 = vmatmul.mubr.msk.f32.vlgmr.msra.gmra.mrb[4].mxu1 %vm775_vm10, %v6459_v15  ;;  %13453 = vmatprep.subr.msk.mxu1 %vm331_vm0, %v6498_v24  ;;  %v16215_v24 = vld [vmem:[%s17060_s5 + $0x8] sm:$0xff] }
 0x2cc   : > { %v6782_v11 = vpop.permute.xlu0 %6781  ;;  %13454 = vmatpush1.msk.msra.mxu1 %vm331_vm0, %v6504_v22  ;;  %6725 = vmatprep.mubr.f32.mxu1 %v16094_v27 }
 0x2cd   : > { %13457 = vmatprep.subr.msk.mxu1 %vm331_vm0, %v6785_v45  ;;  %7948 = vrot.lane.b32.xlu0 %v16215_v24, %s14478_s27  ;;  %v16225_v45 = vrot.slane %v712_v53, %v7895_v56 }
 0x2cf   : > { %v6780_v62 = vpop.permute.xlu1 %6779  ;;  %13455 = vmatmul.mubr.msk.f32.vlgmr.msra.gmra.mrb[6].mxu1 %vm775_vm10, %v6459_v15 }
 0x2d0   : > { %13458 = vmatpush1.msk.msra.mxu1 %vm331_vm0, %v6784_v39  ;;  %v7060_v47 = vpop.permute.xlu0 %7059  ;;  %v6787_v38 = vsel %vm6783_vm7, %v6778_v10, %v6780_v62  ;;  %6867 = vmatprep.mubr.f32.mxu1 %v16094_v27  ;;  %v6788_v8 = vsel %vm6783_vm7, %v6780_v62, %v6782_v11  ;;  %v7907_v39 = vsub.s32 3, %v14926_v31  ;;  %vm355_vm7 = vcmask 654336  }
 0x2d1   : > { %13460 = vmatprep.subr.msk.mxu1 %vm331_vm0, %v6787_v38 }
 0x2d3   : > { %v7058_v33 = vpop.permute.xlu1 %7057  ;;  %13459 = vmatmul.mubr.msk.f32.vlgmr.msra.gmra.mrb[8].mxu1 %vm775_vm10, %v6743_v52 }
 0x2d4   : > { %13461 = vmatpush1.msk.msra.mxu1 %vm331_vm0, %v6786_v13  ;;  %v7027_v35 = vpop.permute.xlu0 %7026  ;;  %6938 = vmatprep.mubr.f32.mxu1 %v16094_v27  ;;  %v7069_v16 = vsel %vm7067_vm11, %v7058_v33, %v7060_v47 }
 0x2d5   : > { %13463 = vmatprep.subr.msk.mxu1 %vm331_vm0, %v6782_v11 }
 0x2d7   : > { %v7056_v4 = vpop.permute.xlu1 %7055  ;;  %13462 = vmatmul.mubr.msk.f32.vlgmr.msra.gmra.mrb[4].mxu1 %vm775_vm10, %v6743_v52 }
 0x2d8   : > { %13464 = vmatpush1.msk.msra.mxu1 %vm331_vm0, %v6788_v8  ;;  %v7064_v54 = vpop.permute.xlu0 %7063  ;;  %7009 = vmatprep.mubr.f32.mxu1 %v16094_v27  ;;  %v7068_v12 = vsel %vm7067_vm11, %v7056_v4, %v7058_v33 }
 0x2d9   : > { %13467 = vmatprep.subr.msk.mxu1 %vm331_vm0, %v7069_v16 }
 0x2db   : > { %v7062_v25 = vpop.permute.xlu1 %7061  ;;  %13465 = vmatmul.mubr.msk.f32.vlgmr.msra.gmra.mrb[6].mxu1 %vm775_vm10, %v6743_v52  ;;  %v7903_v52 = vsub.s32 2, %v14926_v31 }
 0x2dc   : > { %13468 = vmatpush1.msk.msra.mxu1 %vm331_vm0, %v7068_v12  ;;  %v7342_v23 = vpop.permute.xlu0 %7341  ;;  %v7071_v60 = vsel %vm7067_vm11, %v7062_v25, %v7064_v54  ;;  %7151 = vmatprep.mubr.f32.mxu1 %v16094_v27  ;;  %v7070_v44 = vsel %vm7067_vm11, %v7060_v47, %v7062_v25  ;;  %v16228_v47 = vrot.slane %v712_v53, %v7899_v9 }
 0x2dd   : > { %13470 = vmatprep.subr.msk.mxu1 %vm331_vm0, %v7071_v60  ;;  %v16230_v8 = vrot.slane %v712_v53, %v7903_v52  ;;  %v16234_v25 = vrot.slane %v712_v53, %v7907_v39 }
 0x2df   : > { %v7066_v17 = vpop.permute.xlu1 %7065  ;;  %13469 = vmatmul.mubr.msk.f32.vlgmr.msra.gmra.mrb[8].mxu1 %vm775_vm10, %v7027_v35 }
 0x2e0   : > { %13471 = vmatpush1.msk.msra.mxu1 %vm331_vm0, %v7070_v44  ;;  %v7340_v14 = vpop.permute.xlu0 %7339  ;;  %7222 = vmatprep.mubr.f32.mxu1 %v16094_v27  ;;  %v7072_v18 = vsel %vm7067_vm11, %v7064_v54, %v7066_v17  ;;  %v7911_v54 = vsub.s32 4, %v14926_v31  ;;  %vm10593_vm11 = vcmask 130048  }
 0x2e1   : > { %13473 = vmatprep.subr.msk.mxu1 %vm331_vm0, %v7066_v17  ;;  %v7352_v59 = vsel %vm7351_vm15, %v7340_v14, %v7342_v23 }
 0x2e3   : > { %v7344_v5 = vpop.permute.xlu1 %7343  ;;  %13472 = vmatmul.mubr.msk.f32.vlgmr.msra.gmra.mrb[4].mxu1 %vm775_vm10, %v7027_v35 }
 0x2e4   : > { %13474 = vmatpush1.msk.msra.mxu1 %vm331_vm0, %v7072_v18  ;;  %v7346_v19 = vpop.permute.xlu0 %7345  ;;  %v7353_v20 = vsel %vm7351_vm15, %v7342_v23, %v7344_v5  ;;  %7293 = vmatprep.mubr.f32.mxu1 %v16094_v27  ;;  %v7915_v23 = vsub.s32 5, %v14926_v31 }
 0x2e5   : > { %13477 = vmatprep.subr.msk.mxu1 %vm331_vm0, %v7353_v20  ;;  %v7354_v30 = vsel %vm7351_vm15, %v7344_v5, %v7346_v19 }
 0x2e7   : > { %v7311_v1 = vpop.permute.xlu1 %7310  ;;  %13475 = vmatmul.mubr.msk.f32.vlgmr.msra.gmra.mrb[6].mxu1 %vm775_vm10, %v7027_v35 }
 0x2e8   : > { %13478 = vmatpush1.msk.msra.mxu1 %vm331_vm0, %v7352_v59  ;;  %v7350_v58 = vpop.permute.xlu0 %7349  ;;  %7435 = vmatprep.mubr.f32.mxu1 %v16094_v27 }
 0x2eb   : > { %v7348_v21 = vpop.permute.xlu1 %7347  ;;  %13479 = vmatmul.mubr.msk.f32.vlgmr.msra.gmra.mrb[8].mxu1 %vm775_vm10, %v7311_v1 }
 0x2ec   : > { %v7626_v7 = vpop.permute.xlu0 %7625  ;;  %v7355_v48 = vsel %vm7351_vm15, %v7346_v19, %v7348_v21  ;;  %7506 = vmatprep.mubr.f32.mxu1 %v16094_v27  ;;  %v7356_v41 = vsel %vm7351_vm15, %v7348_v21, %v7350_v58  ;;  %v16239_v19 = vrot.slane %v712_v53, %v7911_v54 }
 0x2ed   : > { %13480 = vmatprep.subr.msk.mxu1 %vm331_vm0, %v7355_v48 }
 0x2ee   : > { %13481 = vmatpush1.msk.msra.mxu1 %vm331_vm0, %v7354_v30 }
 0x2ef   : > { %v757_v63 = vpop.permute.xlu1 %756  ;;  %13482 = vmatmul.mubr.msk.f32.vlgmr.msra.gmra.mrb[4].mxu1 %vm775_vm10, %v7311_v1  ;;  %13483 = vmatprep.subr.msk.mxu1 %vm331_vm0, %v7350_v58  ;;  %v16242_v58 = vrot.slane %v712_v53, %v7915_v23 }
 0x2f0   : > { %v755_v40 = vpop.permute.xlu0 %754  ;;  %13484 = vmatpush1.msk.msra.mxu1 %vm331_vm0, %v7356_v41  ;;  %v770_v26 = vsel %vm768_vm9, %v757_v63, %v15106_v50  ;;  %7577 = vmatprep.mubr.f32.mxu1 %v16094_v27 }
 0x2f1   : > { %v769_v37 = vsel %vm768_vm9, %v755_v40, %v757_v63  ;;  %13258 = vmatprep.subr.msk.mxu0 %vm331_vm0, %v770_v26  ;;  %vm346_vm9 = vcmask 652288   ;;  %v16262_v40 = vld [vmem:[%s17060_s5] sm:$0xff] }
 0x2f2   : > { %13259 = vmatpush1.msk.msra.mxu0 %vm331_vm0, %v769_v37 }
 0x2f3   : > { %v7628_v15 = vpop.permute.xlu1 %7627  ;;  %13260 = vmatmul.mubr.msk.f32.vlgmr.msra.gmra.mrb[2].mxu0 %vm775_vm10, %v15074_v32  ;;  %13485 = vmatmul.mubr.msk.f32.vlgmr.msra.gmra.mrb[6].mxu1 %vm775_vm10, %v7311_v1 }
 0x2f4   : > { %v7637_v2 = vsel %vm7635_vm4, %v7626_v7, %v7628_v15  ;;  %7719 = vmatprep.mubr.f32.mxu1 %v16094_v27  ;;  %8059 = vmatprep.mubr.f32.mxu0 %v16094_v27  ;;  %v7595_v50 = vpop.permute.xlu0 %7594 }
 0x2f5   : > { %13487 = vmatprep.subr.msk.mxu1 %vm331_vm0, %v7637_v2 }
 0x2f7   : > { %v7624_v3 = vpop.permute.xlu1 %7623 }
 0x2f8   : > { %v7636_v0 = vsel %vm7635_vm4, %v7624_v3, %v7626_v7  ;;  %v7632_v43 = vpop.permute.xlu0 %7631 }
 0x2f9   : > { %13488 = vmatpush1.msk.msra.mxu1 %vm331_vm0, %v7636_v0 }
 0x2fa   : > { %13489 = vmatmul.mubr.msk.f32.vlgmr.msra.gmra.mrb[8].mxu1 %vm775_vm10, %v7595_v50 }
 0x2fb   : > { %v7630_v32 = vpop.permute.xlu1 %7629  ;;  %7790 = vmatprep.mubr.f32.mxu1 %v16094_v27 }
 0x2fc   : > { %v7638_v55 = vsel %vm7635_vm4, %v7628_v15, %v7630_v32  ;;  %v7639_v51 = vsel %vm7635_vm4, %v7630_v32, %v7632_v43 }
 0x2fd   : > { %13490 = vmatprep.subr.msk.mxu1 %vm331_vm0, %v7639_v51 }
 0x2fe   : > { %13491 = vmatpush1.msk.msra.mxu1 %vm331_vm0, %v7638_v55 }
 0x2ff   : > { %v7634_v28 = vpop.permute.xlu1 %7633  ;;  %13492 = vmatmul.mubr.msk.f32.vlgmr.msra.gmra.mrb[4].mxu1 %vm775_vm10, %v7595_v50 }
 0x300   : > { %v7640_v46 = vsel %vm7635_vm4, %v7632_v43, %v7634_v28  ;;  %13493 = vmatprep.subr.msk.mxu1 %vm331_vm0, %v7634_v28  ;;  %7861 = vmatprep.mubr.f32.mxu1 %v16094_v27 }
 0x301   : > { %13494 = vmatpush1.msk.msra.mxu1 %vm331_vm0, %v7640_v46  ;;  %vm7982_vm0 = vcmask 1045504   ;;  %v10442_v46 = vld [vmem:[%s17061_s6] sm:$0xff] }
 0x303   : > { %13495 = vmatmul.mubr.msk.f32.vlgmr.msra.gmra.mrb[6].mxu1 %vm775_vm10, %v7595_v50  ;;  %vm7977_vm10 = vcmask 48128  }
 0x309   : > { %v7878_v42 = vpop.permute.xlu0 %7877 }
 0x333   : > { %v7958_v2 = vpop.permute.xlu0 %7957 }
 0x33f   : > { %v7949_v50 = vpop.permute.xlu0 %7948 }
 0x3c6   : > { %v856_v29 = vpop.f32.mrb[2].mxu0 }
 0x3c7   : > { %v858_v61 = vpop.f32.mrb[3].mxu0 }
 0x3cd   : > { %v7721_v6 = vpop.f32.mrb[8].mxu1 }
 0x3ce   : > { %v13843_v10 = vadd.f32 %v7721_v6, %v856_v29  ;;  %v7723_v49 = vpop.f32.mrb[9].mxu1 }
 0x3cf   : > { %v13844_v22 = vadd.f32 %v7723_v49, %v858_v61 }
 0x3d0   : > { %v7880_v11 = vadd.f32 %v13843_v10, %v7878_v42 }
 0x3d1   : > { %v7881_v62 = vadd.f32 %v13844_v22, %v7878_v42 }
 0x3d2   : > { %v7886_v38 = vmax.f32 %v7880_v11, 0.0  ;;  %v7792_v13 = vpop.f32.mrb[4].mxu1 }
 0x3d3   : > { %v7887_v33 = vmax.f32 %v7881_v62, 0.0  ;;  %v7882_v35 = vadd.f32 %v7878_v42, %v7792_v13  ;;  %v7794_v4 = vpop.f32.mrb[5].mxu1 }
 0x3d4   : > { %v7923_v16 = vmul.f32 %v16225_v45, %v7886_v38  ;;  %v7883_v12 = vadd.f32 %v7878_v42, %v7794_v4 }
 0x3d5   : > { %v7888_v60 = vmax.f32 %v7882_v35, 0.0  ;;  %v7924_v44 = vmul.f32 %v16228_v47, %v7887_v33 }
 0x3d6   : > { %7929 = vst [vmem:[#allocation3 + $0x8] sm:$0x3f] %v7923_v16  ;;  %v7889_v17 = vmax.f32 %v7883_v12, 0.0  ;;  %v7863_v14 = vpop.f32.mrb[6].mxu1 }
 0x3d7   : > { %v7925_v18 = vmul.f32 %v16230_v8, %v7888_v60  ;;  %7930 = vst [vmem:[#allocation3 + $0x10] sm:$0x3f] %v7924_v44  ;;  %v7884_v5 = vadd.f32 %v7878_v42, %v7863_v14  ;;  %v7865_v20 = vpop.f32.mrb[7].mxu1 }
 0x3d8   : > { %v7926_v59 = vmul.f32 %v16234_v25, %v7889_v17  ;;  %v7885_v1 = vadd.f32 %v7878_v42, %v7865_v20 }
 0x3d9   : > { %7931 = vst [vmem:[#allocation3 + $0x18] sm:$0x3f] %v7925_v18  ;;  %v7890_v31 = vmax.f32 %v7884_v5, 0.0 }
 0x3da   : > { %7932 = vst [vmem:[#allocation3 + $0x20] sm:$0x3f] %v7926_v59  ;;  %v7891_v21 = vmax.f32 %v7885_v1, 0.0 }
 0x3db   : > { %v7927_v7 = vmul.f32 %v16239_v19, %v7890_v31 }
 0x3dc   : > { %v7928_v48 = vmul.f32 %v16242_v58, %v7891_v21 }
 0x3dd   : > { %7933 = vst [vmem:[#allocation3 + $0x28] sm:$0x3f] %v7927_v7  ;;  %v16246_v30 = vld [vmem:[#allocation3 + $0x8] sm:$0x3f] }
 0x3de   : > { %7934 = vst.msk [vmem:[#allocation3 + $0x30] sm:$0x3f] %vm346_vm9, %v7928_v48  ;;  %7959 = vrot.lane.b32.xlu1 %v16246_v30, %s14490_s25  ;;  %v16251_v41 = vld [vmem:[#allocation3 + $0x10] sm:$0x3f] }
 0x3e0   : > { %v16270_v37 = vld [vmem:[#allocation3 + $0x18] sm:$0x3f] }
 0x3e1   : > { %v16253_v63 = vld [vmem:[#allocation3 + $0x20] sm:$0x3f] }
 0x3e2   : > { %7961 = vrot.lane.b32.xlu1 %v16251_v41, %s14490_s25  ;;  %7965 = vrot.lane.b32.xlu0 %v16253_v63, %s14490_s25 }
 0x3e4   : > { %v16276_v15 = vld [vmem:[#allocation3 + $0x28] sm:$0x3f] }
 0x3e5   : > { %v16264_v26 = vld [vmem:[#allocation3 + $0x30] sm:$0x3f] }
 0x3e6   : > { %7946 = vrot.lane.b32.xlu1 %v16262_v40, %s14478_s27  ;;  %7969 = vrot.lane.b32.xlu0 %v16264_v26, %s14490_s25  ;;  %s17072_s27 = smov 107  }
 0x3ea   : > { %8230 = vrot.lane.b32.xlu0 %v16251_v41, %s14488_s24  ;;  %7963 = vrot.lane.b32.xlu1 %v16270_v37, %s14490_s25 }
 0x3ee   : > { %8232 = vrot.lane.b32.xlu0 %v16270_v37, %s14488_s24  ;;  %7967 = vrot.lane.b32.xlu1 %v16276_v15, %s14490_s25 }
 0x3f2   : > { %8236 = vrot.lane.b32.xlu0 %v16276_v15, %s14488_s24  ;;  %8228 = vrot.lane.b32.xlu1 %v16246_v30, %s14488_s24 }
 0x3f6   : > { %8499 = vrot.lane.b32.xlu0 %v16246_v30, %s14492_s11  ;;  %8226 = vrot.lane.b32.xlu1 %v16208_v57, %s14488_s24 }
 0x3fa   : > { %8497 = vrot.lane.b32.xlu0 %v16208_v57, %s14492_s11  ;;  %8234 = vrot.lane.b32.xlu1 %v16253_v63, %s14488_s24 }
 0x3fe   : > { %8495 = vrot.lane.b32.xlu0 %v16215_v24, %s14491_s26  ;;  %8238 = vrot.lane.b32.xlu1 %v16264_v26, %s14488_s24 }
 0x402   : > { %8505 = vrot.lane.b32.xlu0 %v16253_v63, %s14492_s11  ;;  %8501 = vrot.lane.b32.xlu1 %v16251_v41, %s14492_s11 }
 0x406   : > { %8509 = vrot.lane.b32.xlu0 %v16264_v26, %s14492_s11  ;;  %8493 = vrot.lane.b32.xlu1 %v16262_v40, %s14491_s26 }
 0x40a   : > { %8784 = vrot.lane.b32.xlu0 %v16251_v41, %s14499_s12  ;;  %8503 = vrot.lane.b32.xlu1 %v16270_v37, %s14492_s11 }
 0x40e   : > { %8776 = vrot.lane.b32.xlu0 %v16262_v40, %s14496_s20  ;;  %8507 = vrot.lane.b32.xlu1 %v16276_v15, %s14492_s11 }
 0x412   : > { %8786 = vrot.lane.b32.xlu0 %v16270_v37, %s14499_s12  ;;  %8782 = vrot.lane.b32.xlu1 %v16246_v30, %s14499_s12 }
 0x416   : > { %8790 = vrot.lane.b32.xlu0 %v16276_v15, %s14499_s12  ;;  %8780 = vrot.lane.b32.xlu1 %v16208_v57, %s14499_s12 }
 0x41a   : > { %9059 = vrot.lane.b32.xlu0 %v16262_v40, %s14501_s22  ;;  %8778 = vrot.lane.b32.xlu1 %v16215_v24, %s14496_s20 }
 0x41e   : > { %9328 = vrot.lane.b32.xlu0 %v16251_v41, %s14502_s28  ;;  %8788 = vrot.lane.b32.xlu1 %v16253_v63, %s14499_s12 }
 0x422   : > { %9326 = vrot.lane.b32.xlu0 %v16246_v30, %s14502_s28  ;;  %8792 = vrot.lane.b32.xlu1 %v16264_v26, %s14499_s12 }
 0x426   : > { %9324 = vrot.lane.b32.xlu0 %v16215_v24, %s14505_s18  ;;  %9061 = vrot.lane.b32.xlu1 %v16215_v24, %s14501_s22 }
 0x42a   : > { %9334 = vrot.lane.b32.xlu0 %v16276_v15, %s14502_s28  ;;  %9330 = vrot.lane.b32.xlu1 %v16270_v37, %s14502_s28 }
 0x42e   : > { %9608 = vrot.lane.b32.xlu0 %v16251_v41, %s14506_s19  ;;  %9322 = vrot.lane.b32.xlu1 %v16262_v40, %s14505_s18 }
 0x432   : > { %9606 = vrot.lane.b32.xlu0 %v16246_v30, %s14506_s19  ;;  %9332 = vrot.lane.b32.xlu1 %v16253_v63, %s14502_s28 }
 0x436   : > { %9604 = vrot.lane.b32.xlu0 %v16215_v24, %s14510_s15  ;;  %9336 = vrot.lane.b32.xlu1 %v16264_v26, %s14502_s28 }
 0x43a   : > { %9614 = vrot.lane.b32.xlu0 %v16276_v15, %s14506_s19  ;;  %9610 = vrot.lane.b32.xlu1 %v16270_v37, %s14506_s19 }
 0x43e   : > { %9888 = vrot.lane.b32.xlu0 %v16251_v41, %s14498_s29  ;;  %9602 = vrot.lane.b32.xlu1 %v16262_v40, %s14510_s15 }
 0x442   : > { %9886 = vrot.lane.b32.xlu0 %v16246_v30, %s14498_s29  ;;  %9612 = vrot.lane.b32.xlu1 %v16253_v63, %s14506_s19 }
 0x446   : > { %9884 = vrot.lane.b32.xlu0 %v16215_v24, %s14514_s16  ;;  %9616 = vrot.lane.b32.xlu1 %v16264_v26, %s14506_s19 }
 0x44a   : > { %9894 = vrot.lane.b32.xlu0 %v16276_v15, %s14498_s29  ;;  %9890 = vrot.lane.b32.xlu1 %v16270_v37, %s14498_s29 }
 0x44e   : > { %10168 = vrot.lane.b32.xlu0 %v16251_v41, %s17072_s27  ;;  %9882 = vrot.lane.b32.xlu1 %v16262_v40, %s14514_s16 }
 0x450   : > { %v7960_v3 = vpop.permute.xlu1 %7959 }
 0x451   : > { %v7971_v55 = vsel %vm2781_vm2, %v7958_v2, %v7960_v3 }
 0x452   : > { %10166 = vrot.lane.b32.xlu0 %v16246_v30, %s17072_s27  ;;  %9892 = vrot.lane.b32.xlu1 %v16253_v63, %s14498_s29 }
 0x454   : > { %v7962_v0 = vpop.permute.xlu1 %7961  ;;  %v7966_v43 = vpop.permute.xlu0 %7965 }
 0x455   : > { %v7972_v32 = vsel %vm2781_vm2, %v7960_v3, %v7962_v0 }
 0x456   : > { %13496 = vmatprep.subr.msk.mxu0 %vm7982_vm0, %v7972_v32  ;;  %10164 = vrot.lane.b32.xlu0 %v16215_v24, %s14518_s13 }
 0x457   : > { %9896 = vrot.lane.b32.xlu1 %v16264_v26, %s14498_s29  ;;  %13497 = vmatpush1.msk.msra.mxu0 %vm7982_vm0, %v7971_v55 }
 0x458   : > { %v7947_v51 = vpop.permute.xlu1 %7946  ;;  %v7970_v28 = vpop.permute.xlu0 %7969 }
 0x459   : > { %13498 = vmatmul.mubr.msk.f32.vlgmr.msra.gmra.mrb[4].mxu0 %vm7977_vm10, %v7947_v51 }
 0x45a   : > { %10174 = vrot.lane.b32.xlu0 %v16276_v15, %s17072_s27  ;;  %8065 = vmatprep.mubr.f32.mxu0 %v16094_v27 }
 0x45b   : > { %10170 = vrot.lane.b32.xlu1 %v16270_v37, %s17072_s27 }
 0x45c   : > { %v7964_v57 = vpop.permute.xlu1 %7963  ;;  %v8231_v61 = vpop.permute.xlu0 %8230 }
 0x45d   : > { %v7973_v29 = vsel %vm2781_vm2, %v7962_v0, %v7964_v57  ;;  %13499 = vmatmul.mubr.msk.f32.gmra.mrb[6].mxu0 %vm7977_vm10, %v7949_v50  ;;  %v7974_v56 = vsel %vm2781_vm2, %v7964_v57, %v7966_v43  ;;  %v10443_v57 = vld [vmem:[%s17061_s6 + $0x8] sm:$0xff] }
 0x45e   : > { %10446 = vperm.xlu0 %14188, %v10442_v46   ;;  %13500 = vmatprep.subr.msk.mxu0 %vm7982_vm0, %v7974_v56 }
 0x45f   : > { %10162 = vrot.lane.b32.xlu1 %v16262_v40, %s14518_s13  ;;  %13501 = vmatpush1.msk.msra.mxu0 %vm7982_vm0, %v7973_v29 }
 0x460   : > { %v7968_v6 = vpop.permute.xlu1 %7967  ;;  %8136 = vmatprep.mubr.f32.mxu0 %v16094_v27  ;;  %v8233_v9 = vpop.permute.xlu0 %8232 }
 0x461   : > { %v7975_v42 = vsel %vm2781_vm2, %v7966_v43, %v7968_v6  ;;  %13502 = vmatmul.mubr.msk.f32.vlgmr.msra.gmra.mrb[8].mxu0 %vm7977_vm10, %v7947_v51  ;;  %v7976_v53 = vsel %vm2781_vm2, %v7968_v6, %v7970_v28  ;;  %v8242_v33 = vsel %vm2486_vm1, %v8231_v61, %v8233_v9 }
 0x462   : > { %13504 = vmatprep.subr.msk.mxu0 %vm7982_vm0, %v7976_v53  ;;  %8142 = vmatprep.mubr.f32.mxu0 %v16094_v27 }
 0x463   : > { %10172 = vrot.lane.b32.xlu1 %v16253_v63, %s17072_s27  ;;  %13505 = vmatpush1.msk.msra.mxu0 %vm7982_vm0, %v7975_v42 }
 0x464   : > { %v8229_v10 = vpop.permute.xlu1 %8228  ;;  %v8237_v52 = vpop.permute.xlu0 %8236 }
 0x465   : > { %13503 = vmatmul.mubr.msk.f32.gmra.mrb[10].mxu0 %vm7977_vm10, %v7949_v50  ;;  %v8241_v49 = vsel %vm2486_vm1, %v8229_v10, %v8231_v61 }
 0x466   : > { %13508 = vmatprep.subr.msk.mxu0 %vm7982_vm0, %v8241_v49  ;;  %8213 = vmatprep.mubr.f32.mxu0 %v16094_v27 }
 0x467   : > { %10176 = vrot.lane.b32.xlu1 %v16264_v26, %s17072_s27 }
 0x468   : > { %v8227_v22 = vpop.permute.xlu1 %8226  ;;  %v8500_v38 = vpop.permute.xlu0 %8499 }
 0x469   : > { %v8240_v11 = vsel %vm2486_vm1, %v8227_v22, %v8229_v10  ;;  %13506 = vmatmul.mubr.msk.f32.vlgmr.msra.gmra.mrb[12].mxu0 %vm7977_vm10, %v7947_v51 }
 0x46a   : > { %13509 = vmatpush1.msk.msra.mxu0 %vm7982_vm0, %v8240_v11  ;;  %8219 = vmatprep.mubr.f32.mxu0 %v16094_v27 }
 0x46b   : > { %10451 = vperm.xlu1 %14189, %v10443_v57  }
 0x46c   : > { %v8235_v39 = vpop.permute.xlu1 %8234  ;;  %v8498_v54 = vpop.permute.xlu0 %8497 }
 0x46d   : > { %13507 = vmatmul.mubr.msk.f32.gmra.mrb[14].mxu0 %vm7977_vm10, %v7949_v50  ;;  %v8243_v62 = vsel %vm2486_vm1, %v8233_v9, %v8235_v39  ;;  %v8244_v12 = vsel %vm2486_vm1, %v8235_v39, %v8237_v52  ;;  %v8511_v14 = vsel %vm3076_vm3, %v8498_v54, %v8500_v38 }
 0x46e   : > { %13512 = vmatprep.subr.msk.mxu0 %vm7982_vm0, %v8243_v62  ;;  %8326 = vmatprep.mubr.f32.mxu0 %v16094_v27 }
 0x470   : > { %v8239_v13 = vpop.permute.xlu1 %8238  ;;  %v8496_v60 = vpop.permute.xlu0 %8495 }
 0x471   : > { %v8245_v35 = vsel %vm2486_vm1, %v8237_v52, %v8239_v13  ;;  %13510 = vmatmul.mubr.msk.f32.vlgmr.msra.gmra.mrb[4].mxu0 %vm7977_vm10, %v16262_v40 }
 0x472   : > { %13513 = vmatpush1.msk.msra.mxu0 %vm7982_vm0, %v8242_v33  ;;  %8332 = vmatprep.mubr.f32.mxu0 %v16094_v27 }
 0x473   : > { %13516 = vmatprep.subr.msk.mxu0 %vm7982_vm0, %v8245_v35 }
 0x474   : > { %v8502_v4 = vpop.permute.xlu1 %8501  ;;  %v8506_v18 = vpop.permute.xlu0 %8505 }
 0x475   : > { %13511 = vmatmul.mubr.msk.f32.gmra.mrb[6].mxu0 %vm7977_vm10, %v16215_v24  ;;  %v8512_v23 = vsel %vm3076_vm3, %v8500_v38, %v8502_v4 }
 0x476   : > { %8403 = vmatprep.mubr.f32.mxu0 %v16094_v27 }
 0x478   : > { %v8494_v16 = vpop.permute.xlu1 %8493  ;;  %v8510_v59 = vpop.permute.xlu0 %8509 }
 0x479   : > { %13514 = vmatmul.mubr.msk.f32.vlgmr.msra.gmra.mrb[8].mxu0 %vm7977_vm10, %v16262_v40 }
 0x47a   : > { %13517 = vmatpush1.msk.msra.mxu0 %vm7982_vm0, %v8244_v12  ;;  %8409 = vmatprep.mubr.f32.mxu0 %v16094_v27 }
 0x47b   : > { %13520 = vmatprep.subr.msk.mxu0 %vm7982_vm0, %v8512_v23 }
 0x47c   : > { %v8504_v44 = vpop.permute.xlu1 %8503  ;;  %v8785_v7 = vpop.permute.xlu0 %8784 }
 0x47d   : > { %13515 = vmatmul.mubr.msk.f32.gmra.mrb[10].mxu0 %vm7977_vm10, %v16215_v24  ;;  %v8514_v5 = vsel %vm3076_vm3, %v8504_v44, %v8506_v18  ;;  %v8513_v1 = vsel %vm3076_vm3, %v8502_v4, %v8504_v44 }
 0x47e   : > { %8480 = vmatprep.mubr.f32.mxu0 %v16094_v27 }
 0x480   : > { %v8508_v17 = vpop.permute.xlu1 %8507  ;;  %v8777_v2 = vpop.permute.xlu0 %8776 }
 0x481   : > { %13518 = vmatmul.mubr.msk.f32.vlgmr.msra.gmra.mrb[12].mxu0 %vm7977_vm10, %v16262_v40  ;;  %v8516_v31 = vsel %vm3076_vm3, %v8508_v17, %v8510_v59 }
 0x482   : > { %13521 = vmatpush1.msk.msra.mxu0 %vm7982_vm0, %v8511_v14  ;;  %8486 = vmatprep.mubr.f32.mxu0 %v16094_v27 }
 0x483   : > { %13524 = vmatprep.subr.msk.mxu0 %vm7982_vm0, %v8514_v5 }
 0x484   : > { %v8783_v20 = vpop.permute.xlu1 %8782  ;;  %v8787_v3 = vpop.permute.xlu0 %8786 }
 0x485   : > { %13519 = vmatmul.mubr.msk.f32.gmra.mrb[14].mxu0 %vm7977_vm10, %v16215_v24  ;;  %v8515_v24 = vsel %vm3076_vm3, %v8506_v18, %v8508_v17  ;;  %v8795_v40 = vsel %vm3960_vm5, %v8783_v20, %v8785_v7  ;;  %v8796_v55 = vsel %vm3960_vm5, %v8785_v7, %v8787_v3 }
 0x486   : > { %8597 = vmatprep.mubr.f32.mxu0 %v16094_v27 }
 0x488   : > { %v8781_v21 = vpop.permute.xlu1 %8780  ;;  %v8791_v51 = vpop.permute.xlu0 %8790 }
 0x489   : > { %13522 = vmatmul.mubr.msk.f32.vlgmr.msra.gmra.mrb[4].mxu0 %vm7977_vm10, %v8494_v16  ;;  %v8794_v0 = vsel %vm3960_vm5, %v8781_v21, %v8783_v20 }
 0x48a   : > { %13525 = vmatpush1.msk.msra.mxu0 %vm7982_vm0, %v8513_v1  ;;  %8603 = vmatprep.mubr.f32.mxu0 %v16094_v27 }
 0x48b   : > { %13528 = vmatprep.subr.msk.mxu0 %vm7982_vm0, %v8516_v31 }
 0x48c   : > { %v8779_v48 = vpop.permute.xlu1 %8778  ;;  %v9060_v29 = vpop.permute.xlu0 %9059 }
 0x48d   : > { %13523 = vmatmul.mubr.msk.f32.gmra.mrb[6].mxu0 %vm7977_vm10, %v8496_v60 }
 0x48e   : > { %8674 = vmatprep.mubr.f32.mxu0 %v16094_v27 }
 0x490   : > { %v8789_v50 = vpop.permute.xlu1 %8788  ;;  %v9329_v61 = vpop.permute.xlu0 %9328 }
 0x491   : > { %13526 = vmatmul.mubr.msk.f32.vlgmr.msra.gmra.mrb[8].mxu0 %vm7977_vm10, %v8494_v16  ;;  %v8797_v43 = vsel %vm3960_vm5, %v8787_v3, %v8789_v50  ;;  %v8798_v46 = vsel %vm3960_vm5, %v8789_v50, %v8791_v51 }
 0x492   : > { %13529 = vmatpush1.msk.msra.mxu0 %vm7982_vm0, %v8515_v24  ;;  %8680 = vmatprep.mubr.f32.mxu0 %v16094_v27  ;;  %v16583_v24 = vld [vmem:[#allocation4] sm:$0xff] }
 0x493   : > { %13532 = vmatprep.subr.msk.mxu0 %vm7982_vm0, %v8795_v40  ;;  %v16624_v57 = vpack.i.bf16 %v16583_v24, %v16583_v24 }
 0x494   : > { %v8793_v32 = vpop.permute.xlu1 %8792 }
 0x495   : > { %13527 = vmatmul.mubr.msk.f32.gmra.mrb[10].mxu0 %vm7977_vm10, %v8496_v60  ;;  %v8799_v28 = vsel %vm3960_vm5, %v8791_v51, %v8793_v32  ;;  %14191 = vrot.lane.b32.xlu0 %v16624_v57, %s14490_s25 }
 0x496   : > { %8751 = vmatprep.mubr.f32.mxu0 %v16094_v27 }
 0x499   : > { %13530 = vmatmul.mubr.msk.f32.vlgmr.msra.gmra.mrb[12].mxu0 %vm7977_vm10, %v8494_v16  ;;  %14196 = vrot.lane.b32.xlu0 %v16624_v57, %s14488_s24 }
 0x49a   : > { %13533 = vmatpush1.msk.msra.mxu0 %vm7982_vm0, %v8794_v0  ;;  %8757 = vmatprep.mubr.f32.mxu0 %v16094_v27 }
 0x49b   : > { %13536 = vmatprep.subr.msk.mxu0 %vm7982_vm0, %v8797_v43 }
 0x49d   : > { %13531 = vmatmul.mubr.msk.f32.gmra.mrb[14].mxu0 %vm7977_vm10, %v8496_v60 }
 0x49e   : > { %8880 = vmatprep.mubr.f32.mxu0 %v16094_v27 }
 0x4a1   : > { %13534 = vmatmul.mubr.msk.f32.vlgmr.msra.gmra.mrb[4].mxu0 %vm7977_vm10, %v8777_v2 }
 0x4a2   : > { %13537 = vmatpush1.msk.msra.mxu0 %vm7982_vm0, %v8796_v55  ;;  %8886 = vmatprep.mubr.f32.mxu0 %v16094_v27 }
 0x4a3   : > { %13540 = vmatprep.subr.msk.mxu0 %vm7982_vm0, %v8799_v28 }
 0x4a5   : > { %13535 = vmatmul.mubr.msk.f32.gmra.mrb[6].mxu0 %vm7977_vm10, %v8779_v48 }
 0x4a6   : > { %8957 = vmatprep.mubr.f32.mxu0 %v16094_v27 }
 0x4a9   : > { %13538 = vmatmul.mubr.msk.f32.vlgmr.msra.gmra.mrb[8].mxu0 %vm7977_vm10, %v8777_v2 }
 0x4aa   : > { %13541 = vmatpush1.msk.msra.mxu0 %vm7982_vm0, %v8798_v46  ;;  %8963 = vmatprep.mubr.f32.mxu0 %v16094_v27 }
 0x4ab   : > { %13544 = vmatprep.subr.msk.mxu0 %vm7982_vm0, %v16251_v41  ;;  %v9062_v41 = vpop.permute.xlu1 %9061 }
 0x4ad   : > { %13539 = vmatmul.mubr.msk.f32.gmra.mrb[10].mxu0 %vm7977_vm10, %v8779_v48 }
 0x4ae   : > { %9034 = vmatprep.mubr.f32.mxu0 %v16094_v27 }
 0x4af   : > { %v9331_v56 = vpop.permute.xlu1 %9330 }
 0x4b0   : > { %v9339_v6 = vsel %vm4511_vm6, %v9329_v61, %v9331_v56 }
 0x4b1   : > { %13542 = vmatmul.mubr.msk.f32.vlgmr.msra.gmra.mrb[12].mxu0 %vm7977_vm10, %v8777_v2 }
 0x4b2   : > { %13545 = vmatpush1.msk.msra.mxu0 %vm7982_vm0, %v16246_v30  ;;  %9040 = vmatprep.mubr.f32.mxu0 %v16094_v27  ;;  %v9327_v30 = vpop.permute.xlu0 %9326 }
 0x4b3   : > { %13548 = vmatprep.subr.msk.mxu0 %vm7982_vm0, %v16253_v63  ;;  %v9323_v63 = vpop.permute.xlu1 %9322  ;;  %v9338_v42 = vsel %vm4511_vm6, %v9327_v30, %v9329_v61 }
 0x4b5   : > { %13543 = vmatmul.mubr.msk.f32.gmra.mrb[14].mxu0 %vm7977_vm10, %v8779_v48 }
 0x4b6   : > { %9143 = vmatprep.mubr.f32.mxu0 %v16094_v27 }
 0x4b9   : > { %13546 = vmatmul.mubr.msk.f32.vlgmr.msra.gmra.mrb[4].mxu0 %vm7977_vm10, %v9060_v29 }
 0x4ba   : > { %13549 = vmatpush1.msk.msra.mxu0 %vm7982_vm0, %v16270_v37  ;;  %9149 = vmatprep.mubr.f32.mxu0 %v16094_v27  ;;  %v9325_v37 = vpop.permute.xlu0 %9324 }
 0x4bb   : > { %13552 = vmatprep.subr.msk.mxu0 %vm7982_vm0, %v16264_v26  ;;  %v9333_v26 = vpop.permute.xlu1 %9332 }
 0x4bc   : > { %v9340_v49 = vsel %vm4511_vm6, %v9331_v56, %v9333_v26 }
 0x4bd   : > { %13547 = vmatmul.mubr.msk.f32.gmra.mrb[6].mxu0 %vm7977_vm10, %v9062_v41 }
 0x4be   : > { %9220 = vmatprep.mubr.f32.mxu0 %v16094_v27  ;;  %v9335_v53 = vpop.permute.xlu0 %9334 }
 0x4bf   : > { %v9341_v9 = vsel %vm4511_vm6, %v9333_v26, %v9335_v53 }
 0x4c1   : > { %13550 = vmatmul.mubr.msk.f32.vlgmr.msra.gmra.mrb[8].mxu0 %vm7977_vm10, %v9060_v29 }
 0x4c2   : > { %13553 = vmatpush1.msk.msra.mxu0 %vm7982_vm0, %v16276_v15  ;;  %9226 = vmatprep.mubr.f32.mxu0 %v16094_v27  ;;  %v9337_v15 = vpop.permute.xlu1 %9336  ;;  %v9609_v10 = vpop.permute.xlu0 %9608 }
 0x4c3   : > { %13556 = vmatprep.subr.msk.mxu0 %vm7982_vm0, %v9339_v6  ;;  %v9342_v11 = vsel %vm4511_vm6, %v9335_v53, %v9337_v15 }
 0x4c5   : > { %13551 = vmatmul.mubr.msk.f32.gmra.mrb[10].mxu0 %vm7977_vm10, %v9062_v41 }
 0x4c6   : > { %9297 = vmatprep.mubr.f32.mxu0 %v16094_v27  ;;  %v9611_v22 = vpop.permute.xlu1 %9610  ;;  %v9607_v52 = vpop.permute.xlu0 %9606 }
 0x4c7   : > { %v9619_v62 = vsel %vm5363_vm12, %v9609_v10, %v9611_v22  ;;  %v9618_v33 = vsel %vm5363_vm12, %v9607_v52, %v9609_v10 }
 0x4c9   : > { %13554 = vmatmul.mubr.msk.f32.vlgmr.msra.gmra.mrb[12].mxu0 %vm7977_vm10, %v9060_v29  ;;  %v16633_v29 = vld [vmem:[%s17062_s7] sm:$0x3] }
 0x4ca   : > { %13557 = vmatpush1.msk.msra.mxu0 %vm7982_vm0, %v9338_v42  ;;  %9303 = vmatprep.mubr.f32.mxu0 %v16094_v27  ;;  %v9603_v39 = vpop.permute.xlu1 %9602  ;;  %v9605_v38 = vpop.permute.xlu0 %9604 }
 0x4cb   : > { %13560 = vmatprep.subr.msk.mxu0 %vm7982_vm0, %v9341_v9 }
 0x4cd   : > { %13555 = vmatmul.mubr.msk.f32.gmra.mrb[14].mxu0 %vm7977_vm10, %v9062_v41  ;;  %v10524_v41 = vrot.slane %v16633_v29, %v14929_v34 }
 0x4ce   : > { %9423 = vmatprep.mubr.f32.mxu0 %v16094_v27  ;;  %v9613_v13 = vpop.permute.xlu1 %9612  ;;  %v9615_v35 = vpop.permute.xlu0 %9614 }
 0x4cf   : > { %v9621_v4 = vsel %vm5363_vm12, %v9613_v13, %v9615_v35  ;;  %v9620_v12 = vsel %vm5363_vm12, %v9611_v22, %v9613_v13  ;;  %10525 = vrot.lane.b32.xlu1 %v10524_v41, %s17073_s21 }
 0x4d1   : > { %13558 = vmatmul.mubr.msk.f32.vlgmr.msra.gmra.mrb[4].mxu0 %vm7977_vm10, %v9323_v63 }
 0x4d2   : > { %13561 = vmatpush1.msk.msra.mxu0 %vm7982_vm0, %v9340_v49  ;;  %9429 = vmatprep.mubr.f32.mxu0 %v16094_v27  ;;  %v9617_v54 = vpop.permute.xlu1 %9616  ;;  %v9889_v16 = vpop.permute.xlu0 %9888 }
 0x4d3   : > { %13564 = vmatprep.subr.msk.mxu0 %vm7982_vm0, %v9337_v15  ;;  %v9622_v44 = vsel %vm5363_vm12, %v9615_v35, %v9617_v54 }
 0x4d5   : > { %13559 = vmatmul.mubr.msk.f32.gmra.mrb[6].mxu0 %vm7977_vm10, %v9325_v37 }
 0x4d6   : > { %9500 = vmatprep.mubr.f32.mxu0 %v16094_v27  ;;  %v9891_v23 = vpop.permute.xlu1 %9890  ;;  %v9887_v60 = vpop.permute.xlu0 %9886 }
 0x4d7   : > { %v9899_v14 = vsel %vm5647_vm13, %v9889_v16, %v9891_v23  ;;  %v9898_v20 = vsel %vm5647_vm13, %v9887_v60, %v9889_v16 }
 0x4d9   : > { %13562 = vmatmul.mubr.msk.f32.vlgmr.msra.gmra.mrb[8].mxu0 %vm7977_vm10, %v9323_v63 }
 0x4da   : > { %13565 = vmatpush1.msk.msra.mxu0 %vm7982_vm0, %v9342_v11  ;;  %9506 = vmatprep.mubr.f32.mxu0 %v16094_v27  ;;  %v9883_v17 = vpop.permute.xlu1 %9882  ;;  %v9885_v18 = vpop.permute.xlu0 %9884 }
 0x4db   : > { %13568 = vmatprep.subr.msk.mxu0 %vm7982_vm0, %v9619_v62 }
 0x4dd   : > { %13563 = vmatmul.mubr.msk.f32.gmra.mrb[10].mxu0 %vm7977_vm10, %v9325_v37 }
 0x4de   : > { %9577 = vmatprep.mubr.f32.mxu0 %v16094_v27  ;;  %v9893_v5 = vpop.permute.xlu1 %9892  ;;  %v9895_v59 = vpop.permute.xlu0 %9894 }
 0x4df   : > { %v9901_v1 = vsel %vm5647_vm13, %v9893_v5, %v9895_v59  ;;  %v9900_v7 = vsel %vm5647_vm13, %v9891_v23, %v9893_v5 }
 0x4e1   : > { %13566 = vmatmul.mubr.msk.f32.vlgmr.msra.gmra.mrb[12].mxu0 %vm7977_vm10, %v9323_v63 }
 0x4e2   : > { %13569 = vmatpush1.msk.msra.mxu0 %vm7982_vm0, %v9618_v33  ;;  %9583 = vmatprep.mubr.f32.mxu0 %v16094_v27  ;;  %v9897_v31 = vpop.permute.xlu1 %9896  ;;  %v10169_v21 = vpop.permute.xlu0 %10168 }
 0x4e3   : > { %13572 = vmatprep.subr.msk.mxu0 %vm7982_vm0, %v9621_v4 }
 0x4e5   : > { %13567 = vmatmul.mubr.msk.f32.gmra.mrb[14].mxu0 %vm7977_vm10, %v9325_v37 }
 0x4e6   : > { %9703 = vmatprep.mubr.f32.mxu0 %v16094_v27  ;;  %v10171_v48 = vpop.permute.xlu1 %10170  ;;  %v10167_v40 = vpop.permute.xlu0 %10166 }
 0x4e7   : > { %v10179_v50 = vsel %vm5931_vm14, %v10169_v21, %v10171_v48  ;;  %v10178_v43 = vsel %vm5931_vm14, %v10167_v40, %v10169_v21 }
 0x4e9   : > { %13570 = vmatmul.mubr.msk.f32.vlgmr.msra.gmra.mrb[4].mxu0 %vm7977_vm10, %v9603_v39 }
 0x4ea   : > { %13573 = vmatpush1.msk.msra.mxu0 %vm7982_vm0, %v9620_v12  ;;  %9709 = vmatprep.mubr.f32.mxu0 %v16094_v27  ;;  %v10163_v2 = vpop.permute.xlu1 %10162  ;;  %v10165_v3 = vpop.permute.xlu0 %10164 }
 0x4eb   : > { %13576 = vmatprep.subr.msk.mxu0 %vm7982_vm0, %v9617_v54 }
 0x4ed   : > { %13571 = vmatmul.mubr.msk.f32.gmra.mrb[6].mxu0 %vm7977_vm10, %v9605_v38 }
 0x4ee   : > { %9780 = vmatprep.mubr.f32.mxu0 %v16094_v27  ;;  %v10173_v0 = vpop.permute.xlu1 %10172  ;;  %v10175_v32 = vpop.permute.xlu0 %10174 }
 0x4ef   : > { %v10181_v55 = vsel %vm5931_vm14, %v10173_v0, %v10175_v32  ;;  %v10180_v51 = vsel %vm5931_vm14, %v10171_v48, %v10173_v0 }
 0x4f1   : > { %13574 = vmatmul.mubr.msk.f32.vlgmr.msra.gmra.mrb[8].mxu0 %vm7977_vm10, %v9603_v39 }
 0x4f2   : > { %13577 = vmatpush1.msk.msra.mxu0 %vm7982_vm0, %v9622_v44  ;;  %9786 = vmatprep.mubr.f32.mxu0 %v16094_v27  ;;  %v10177_v28 = vpop.permute.xlu1 %10176  ;;  %v10447_v61 = vpop.permute.xlu0 %10446 }
 0x4f3   : > { %13580 = vmatprep.subr.msk.mxu0 %vm7982_vm0, %v9899_v14  ;;  %v10182_v46 = vsel %vm5931_vm14, %v10175_v32, %v10177_v28 }
 0x4f5   : > { %13575 = vmatmul.mubr.msk.f32.gmra.mrb[10].mxu0 %vm7977_vm10, %v9605_v38 }
 0x4f6   : > { %9857 = vmatprep.mubr.f32.mxu0 %v16094_v27  ;;  %v10452_v37 = vpop.permute.xlu1 %10451 }
 0x4f9   : > { %13578 = vmatmul.mubr.msk.f32.vlgmr.msra.gmra.mrb[12].mxu0 %vm7977_vm10, %v9603_v39 }
 0x4fa   : > { %13581 = vmatpush1.msk.msra.mxu0 %vm7982_vm0, %v9898_v20  ;;  %9863 = vmatprep.mubr.f32.mxu0 %v16094_v27 }
 0x4fb   : > { %13584 = vmatprep.subr.msk.mxu0 %vm7982_vm0, %v9901_v1 }
 0x4fd   : > { %13579 = vmatmul.mubr.msk.f32.gmra.mrb[14].mxu0 %vm7977_vm10, %v9605_v38 }
 0x4fe   : > { %9983 = vmatprep.mubr.f32.mxu0 %v16094_v27  ;;  %v9902_v27 = vsel %vm5647_vm13, %v9895_v59, %v9897_v31 }
 0x501   : > { %13582 = vmatmul.mubr.msk.f32.vlgmr.msra.gmra.mrb[4].mxu0 %vm7977_vm10, %v9883_v17 }
 0x502   : > { %13585 = vmatpush1.msk.msra.mxu0 %vm7982_vm0, %v9900_v7  ;;  %9989 = vmatprep.mubr.f32.mxu0 %v16583_v24 }
 0x503   : > { %13588 = vmatprep.subr.msk.mxu0 %vm7982_vm0, %v9897_v31 }
 0x505   : > { %13583 = vmatmul.mubr.msk.f32.gmra.mrb[6].mxu0 %vm7977_vm10, %v9885_v18 }
 0x506   : > { %10060 = vmatprep.mubr.f32.mxu0 %v16583_v24 }
 0x509   : > { %13586 = vmatmul.mubr.msk.f32.vlgmr.msra.gmra.mrb[8].mxu0 %vm7977_vm10, %v9883_v17 }
 0x50a   : > { %13589 = vmatpush1.msk.msra.mxu0 %vm7982_vm0, %v9902_v27  ;;  %10066 = vmatprep.mubr.f32.mxu0 %v16583_v24 }
 0x50b   : > { %13592 = vmatprep.subr.msk.mxu0 %vm7982_vm0, %v10179_v50 }
 0x50d   : > { %13587 = vmatmul.mubr.msk.f32.gmra.mrb[10].mxu0 %vm7977_vm10, %v9885_v18 }
 0x50e   : > { %10137 = vmatprep.mubr.f32.mxu0 %v16583_v24 }
 0x511   : > { %13590 = vmatmul.mubr.msk.f32.vlgmr.msra.gmra.mrb[12].mxu0 %vm7977_vm10, %v9883_v17 }
 0x512   : > { %13593 = vmatpush1.msk.msra.mxu0 %vm7982_vm0, %v10178_v43  ;;  %10143 = vmatprep.mubr.f32.mxu0 %v16583_v24 }
 0x513   : > { %13596 = vmatprep.subr.msk.mxu0 %vm7982_vm0, %v10181_v55 }
 0x515   : > { %13591 = vmatmul.mubr.msk.f32.gmra.mrb[14].mxu0 %vm7977_vm10, %v9885_v18 }
 0x516   : > { %10263 = vmatprep.mubr.f32.mxu0 %v16583_v24 }
 0x519   : > { %13594 = vmatmul.mubr.msk.f32.vlgmr.msra.gmra.mrb[4].mxu0 %vm7977_vm10, %v10163_v2 }
 0x51a   : > { %13597 = vmatpush1.msk.msra.mxu0 %vm7982_vm0, %v10180_v51  ;;  %10269 = vmatprep.mubr.f32.mxu0 %v16583_v24 }
 0x51b   : > { %13600 = vmatprep.subr.msk.mxu0 %vm7982_vm0, %v10177_v28 }
 0x51d   : > { %13595 = vmatmul.mubr.msk.f32.gmra.mrb[6].mxu0 %vm7977_vm10, %v10165_v3 }
 0x51e   : > { %10340 = vmatprep.mubr.f32.mxu0 %v16583_v24 }
 0x521   : > { %13598 = vmatmul.mubr.msk.f32.vlgmr.msra.gmra.mrb[8].mxu0 %vm7977_vm10, %v10163_v2 }
 0x522   : > { %13601 = vmatpush1.msk.msra.mxu0 %vm7982_vm0, %v10182_v46  ;;  %10346 = vmatprep.mubr.f32.mxu0 %v16583_v24 }
 0x525   : > { %13599 = vmatmul.mubr.msk.f32.gmra.mrb[10].mxu0 %vm7977_vm10, %v10165_v3 }
 0x526   : > { %10417 = vmatprep.mubr.f32.mxu0 %v16583_v24 }
 0x529   : > { %13602 = vmatmul.mubr.msk.f32.vlgmr.msra.gmra.mrb[12].mxu0 %vm7977_vm10, %v10163_v2 }
 0x52a   : > { %10423 = vmatprep.mubr.f32.mxu0 %v16583_v24 }
 0x52d   : > { %13603 = vmatmul.mubr.msk.f32.gmra.mrb[14].mxu0 %vm7977_vm10, %v10165_v3 }
 0x52e   : > { %10660 = vmatprep.mubr.f32.mxu0 %v16583_v24 }
 0x5ec   : > { %v10265_v56 = vpop.f32.mrb[4].mxu0 }
 0x5ed   : > { %v10454_v30 = vadd.f32 %v10447_v61, %v10265_v56  ;;  %v10267_v63 = vpop.f32.mrb[5].mxu0 }
 0x5ee   : > { %v10455_v6 = vadd.f32 %v10447_v61, %v10267_v63 }
 0x5ef   : > { %v10466_v26 = vmax.f32 %v10454_v30, 0.0 }
 0x5f0   : > { %v10467_v42 = vmax.f32 %v10455_v6, 0.0  ;;  %v10271_v53 = vpop.f32.mrb[6].mxu0 }
 0x5f1   : > { %v16639_v9 = vmul.f32 %v10466_v26, %v16225_v45  ;;  %v10460_v15 = vadd.f32 %v10452_v37, %v10271_v53  ;;  %v10273_v10 = vpop.f32.mrb[7].mxu0 }
 0x5f2   : > { %v16642_v49 = vmul.f32 %v10467_v42, %v16228_v47  ;;  %v10461_v22 = vadd.f32 %v10452_v37, %v10273_v10  ;;  %v13610_v10 = vld.sshfl [vmem:[%s17062_s7] sm:$0x3 pattern:$0x76325410] }
 0x5f3   : > { %v10472_v52 = vmax.f32 %v10460_v15, 0.0 }
 0x5f4   : > { %v10473_v11 = vmax.f32 %v10461_v22, 0.0  ;;  %v10342_v39 = vpop.f32.mrb[8].mxu0  ;;  %v16646_v62 = vpack.i.bf16 %v16642_v49, %v16639_v9  ;;  %v14192_v22 = vpop.permute.xlu0 %14191 }
 0x5f5   : > { %v16649_v38 = vmul.f32 %v10472_v52, %v16225_v45  ;;  %v10456_v13 = vadd.f32 %v10447_v61, %v10342_v39  ;;  %v10344_v33 = vpop.f32.mrb[9].mxu0 }
 0x5f6   : > { %v16652_v35 = vmul.f32 %v10473_v11, %v16228_v47  ;;  %v10457_v4 = vadd.f32 %v10447_v61, %v10344_v33  ;;  %14201 = vrot.lane.b32.xlu0 %v16646_v62, %s14490_s25  ;;  %v16802_v11 = vpop.permute.xlu1 %10525 }
 0x5f7   : > { %v10468_v54 = vmax.f32 %v10456_v13, 0.0  ;;  %v16658_v16 = vpack.i.bf16 %v16649_v38, %v16639_v9  ;;  %v13785_v12 = vpack.c.bf16 %v16649_v38, %v16639_v9  ;;  %v14193_v13 = vunpack.i.l.bf16 %v14192_v22 }
 0x5f8   : > { %v10469_v23 = vmax.f32 %v10457_v4, 0.0  ;;  %v10348_v45 = vpop.f32.mrb[10].mxu0  ;;  %v14210_v60 = vpack.i.bf16 %v16652_v35, %v16649_v38  ;;  %v13783_v47 = vpack.c.bf16 %v16652_v35, %v16642_v49  ;;  %v16796_v52 = vpop.permute.xlu0 %14196 }
 0x5f9   : > { %v16667_v44 = vmul.f32 %v10468_v54, %v16230_v8  ;;  %v10462_v17 = vadd.f32 %v10452_v37, %v10348_v45  ;;  %v10350_v14 = vpop.f32.mrb[11].mxu0 }
 0x5fa   : > { %v16670_v18 = vmul.f32 %v10469_v23, %v16234_v25  ;;  %v10463_v5 = vadd.f32 %v10452_v37, %v10350_v14  ;;  %14211 = vrot.lane.b32.xlu1 %v14210_v60, %s14490_s25  ;;  %14206 = vrot.lane.b32.xlu0 %v16646_v62, %s14488_s24 }
 0x5fb   : > { %v10474_v20 = vmax.f32 %v10462_v17, 0.0  ;;  %v16677_v59 = vpack.i.bf16 %v16667_v44, %v16642_v49  ;;  %v13143_v17 = vld [vmem:[%s17063_s8] sm:$0x3] }
 0x5fc   : > { %v10475_v1 = vmax.f32 %v10463_v5, 0.0  ;;  %v10419_v31 = vpop.f32.mrb[12].mxu0  ;;  %v14220_v21 = vpack.i.bf16 %v16670_v18, %v16667_v44 }
 0x5fd   : > { %v16682_v7 = vmul.f32 %v10474_v20, %v16230_v8  ;;  %v10458_v48 = vadd.f32 %v10447_v61, %v10419_v31  ;;  %v10421_v40 = vpop.f32.mrb[13].mxu0 }
 0x5fe   : > { %v16685_v27 = vmul.f32 %v10475_v1, %v16234_v25  ;;  %v10459_v2 = vadd.f32 %v10447_v61, %v10421_v40  ;;  %14216 = vrot.lane.b32.xlu1 %v14210_v60, %s14488_s24 }
 0x5ff   : > { %v10470_v50 = vmax.f32 %v10458_v48, 0.0  ;;  %v16690_v3 = vpack.i.bf16 %v16682_v7, %v16652_v35  ;;  %v13789_v0 = vpack.c.bf16 %v16682_v7, %v16667_v44 }
 0x600   : > { %v10471_v43 = vmax.f32 %v10459_v2, 0.0  ;;  %v10425_v32 = vpop.f32.mrb[14].mxu0  ;;  %v14230_v8 = vpack.i.bf16 %v16685_v27, %v16682_v7  ;;  %v13787_v25 = vpack.c.bf16 %v16685_v27, %v16670_v18 }
 0x601   : > { %v16699_v55 = vmul.f32 %v10470_v50, %v16239_v19  ;;  %v10464_v51 = vadd.f32 %v10452_v37, %v10425_v32  ;;  %v10427_v28 = vpop.f32.mrb[15].mxu0 }
 0x602   : > { %v10483_v46 = vmul.f32 %v10471_v43, %v16242_v58  ;;  %v10465_v41 = vadd.f32 %v10452_v37, %v10427_v28  ;;  %14221 = vrot.lane.b32.xlu1 %v14220_v21, %s14490_s25  ;;  %14231 = vrot.lane.b32.xlu0 %v14230_v8, %s14490_s25 }
 0x603   : > { %v10476_v61 = vmax.f32 %v10464_v51, 0.0  ;;  %v16706_v56 = vpack.i.bf16 %v16699_v55, %v16670_v18 }
 0x604   : > { %10495 = vst.msk [vmem:[#allocation4 + $0x30] sm:$0xff] %vm355_vm7, %v10483_v46  ;;  %v10477_v30 = vmax.f32 %v10465_v41, 0.0 }
 0x605   : > { %v16710_v63 = vmul.f32 %v10476_v61, %v16239_v19 }
 0x606   : > { %v10489_v6 = vmul.f32 %v10477_v30, %v16242_v58  ;;  %14226 = vrot.lane.b32.xlu1 %v14220_v21, %s14488_s24  ;;  %14236 = vrot.lane.b32.xlu0 %v14230_v8, %s14488_s24 }
 0x607   : > { %v16717_v37 = vpack.i.bf16 %v16710_v63, %v16685_v27  ;;  %v13793_v26 = vpack.c.bf16 %v16710_v63, %v16699_v55 }
 0x608   : > { %10501 = vst.msk [vmem:[#allocation4 + $0x70] sm:$0xff] %vm355_vm7, %v10489_v6 }
 0x60b   : > { %v16722_v42 = vld [vmem:[#allocation4 + $0x30] sm:$0xff] }
 0x60c   : > { %v14240_v19 = vpack.i.bf16 %v16722_v42, %v16699_v55 }
 0x60e   : > { %14241 = vrot.lane.b32.xlu0 %v14240_v19, %s14490_s25 }
 0x60f   : > { %v16727_v58 = vld [vmem:[#allocation4 + $0x70] sm:$0xff] }
 0x610   : > { %v14245_v53 = vpack.i.bf16 %v16727_v58, %v16710_v63  ;;  %v13791_v15 = vpack.c.bf16 %v16727_v58, %v16722_v42 }
 0x612   : > { %14246 = vrot.lane.b32.xlu1 %v14245_v53, %s14490_s25  ;;  %14261 = vrot.lane.b32.xlu0 %v14210_v60, %s14492_s11  ;;  %s14521_s25 = smov 48  }
 0x616   : > { %14251 = vrot.lane.b32.xlu1 %v14240_v19, %s14488_s24  ;;  %14271 = vrot.lane.b32.xlu0 %v14220_v21, %s14492_s11 }
 0x61a   : > { %14256 = vrot.lane.b32.xlu1 %v16646_v62, %s14492_s11  ;;  %14281 = vrot.lane.b32.xlu0 %v14245_v53, %s14488_s24  ;;  %s14520_s24 = smov 64  }
 0x61e   : > { %14266 = vrot.lane.b32.xlu1 %v16624_v57, %s14492_s11  ;;  %11099 = vrot.lane.b32.xlu0 %v13610_v10, %s17074_s23 }
 0x622   : > { %14276 = vrot.lane.b32.xlu1 %v14230_v8, %s14492_s11  ;;  %14296 = vrot.lane.b32.xlu0 %v14210_v60, %s14499_s12 }
 0x626   : > { %14286 = vrot.lane.b32.xlu1 %v14240_v19, %s14492_s11  ;;  %14306 = vrot.lane.b32.xlu0 %v14245_v53, %s14492_s11  ;;  %s14522_s11 = smov 32  }
 0x62a   : > { %14291 = vrot.lane.b32.xlu1 %v16646_v62, %s14499_s12  ;;  %14311 = vrot.lane.b32.xlu0 %v14220_v21, %s14499_s12  ;;  %v14194_v62 = vunpack.i.h.bf16 %v14192_v22 }
 0x62e   : > { %14301 = vrot.lane.b32.xlu1 %v16624_v57, %s14499_s12  ;;  %11411 = vrot.lane.b32.xlu0 %v13610_v10, %s14518_s13  ;;  %v14370_v57 = vpack.i.bf16 %v16727_v58, %v16722_v42 }
 0x632   : > { %14316 = vrot.lane.b32.xlu1 %v14230_v8, %s14499_s12  ;;  %14326 = vrot.lane.b32.xlu0 %v14245_v53, %s14499_s12  ;;  %v14199_v53 = vunpack.i.h.bf16 %v16796_v52 }
 0x636   : > { %14321 = vrot.lane.b32.xlu1 %v14240_v19, %s14499_s12  ;;  %14331 = vrot.lane.b32.xlu0 %v16677_v59, %s14502_s28  ;;  %s14523_s12 = smov 16  }
 0x63a   : > { %11721 = vrot.lane.b32.xlu1 %v13610_v10, %s14520_s24  ;;  %14341 = vrot.lane.b32.xlu0 %v16658_v16, %s14502_s28 }
 0x63e   : > { %14336 = vrot.lane.b32.xlu1 %v16690_v3, %s14502_s28  ;;  %14351 = vrot.lane.b32.xlu0 %v16717_v37, %s14502_s28 }
 0x642   : > { %14346 = vrot.lane.b32.xlu1 %v16706_v56, %s14502_s28  ;;  %14361 = vrot.lane.b32.xlu0 %v16690_v3, %s14506_s19 }
 0x646   : > { %11965 = vrot.lane.b32.xlu1 %v13610_v10, %s14521_s25  ;;  %14371 = vrot.lane.b32.xlu0 %v14370_v57, %s14502_s28 }
 0x64a   : > { %14356 = vrot.lane.b32.xlu1 %v16677_v59, %s14506_s19  ;;  %14376 = vrot.lane.b32.xlu0 %v16706_v56, %s14506_s19 }
 0x64e   : > { %14366 = vrot.lane.b32.xlu1 %v16658_v16, %s14506_s19  ;;  %12267 = vrot.lane.b32.xlu0 %v13610_v10, %s14522_s11 }
 0x652   : > { %14381 = vrot.lane.b32.xlu1 %v16717_v37, %s14506_s19  ;;  %14386 = vrot.lane.b32.xlu0 %v16677_v59, %s14498_s29 }
 0x656   : > { %14391 = vrot.lane.b32.xlu1 %v16690_v3, %s14498_s29  ;;  %14396 = vrot.lane.b32.xlu0 %v16658_v16, %s14498_s29 }
 0x65a   : > { %14401 = vrot.lane.b32.xlu1 %v14370_v57, %s14506_s19  ;;  %14411 = vrot.lane.b32.xlu0 %v16717_v37, %s14498_s29 }
 0x65e   : > { %14406 = vrot.lane.b32.xlu1 %v16706_v56, %s14498_s29  ;;  %14421 = vrot.lane.b32.xlu0 %v14370_v57, %s14498_s29 }
 0x662   : > { %12569 = vrot.lane.b32.xlu1 %v13610_v10, %s14523_s12  ;;  %14426 = vrot.lane.b32.xlu0 %v16690_v3, %s17072_s27  ;;  %v14198_v10 = vunpack.i.l.bf16 %v16796_v52 }
 0x666   : > { %14416 = vrot.lane.b32.xlu1 %v16677_v59, %s17072_s27  ;;  %14436 = vrot.lane.b32.xlu0 %v16706_v56, %s17072_s27 }
 0x668   : > { %v14202_v39 = vpop.permute.xlu0 %14201 }
 0x669   : > { %v14204_v33 = vunpack.i.h.bf16 %v14202_v39  ;;  %v14203_v4 = vunpack.i.l.bf16 %v14202_v39 }
 0x66a   : > { %14431 = vrot.lane.b32.xlu1 %v16658_v16, %s17072_s27  ;;  %14446 = vrot.lane.b32.xlu0 %v14370_v57, %s17072_s27 }
 0x66b   : > { %v10569_v60 = vsel %vm2781_vm2, %v14193_v13, %v14203_v4  ;;  %v10570_v14 = vsel %vm2781_vm2, %v14203_v4, %v14204_v33 }
 0x66c   : > { %v14212_v54 = vpop.permute.xlu1 %14211  ;;  %v16816_v59 = vpop.permute.xlu0 %14206 }
 0x66d   : > { %v14214_v23 = vunpack.i.h.bf16 %v14212_v54  ;;  %v14213_v45 = vunpack.i.l.bf16 %v14212_v54  ;;  %v14209_v57 = vunpack.i.h.bf16 %v16816_v59 }
 0x66e   : > { %14441 = vrot.lane.b32.xlu1 %v16717_v37, %s17072_s27  ;;  %s14131_s27 = smul.u32 12, %s17076_s10 }
 0x66f   : > { %v10575_v16 = vsel %vm2781_vm2, %v14194_v62, %v14213_v45  ;;  %v10576_v5 = vsel %vm2781_vm2, %v14213_v45, %v14214_v23  ;;  %v14208_v62 = vunpack.i.l.bf16 %v16816_v59 }
 0x670   : > { %v13737_v20 = vpack.c.bf16 %v10575_v16, %v10569_v60  ;;  %v16818_v1 = vpop.permute.xlu1 %14216  ;;  %v13735_v31 = vpack.c.bf16 %v10576_v5, %v10570_v14  ;;  %s329_s22 = scalar_lea.vmem %s17064_s9, %s14131_s27 }
 0x671   : > { %v14219_v30 = vunpack.i.h.bf16 %v16818_v1  ;;  %v14218_v6 = vunpack.i.l.bf16 %v16818_v1 }
 0x672   : > { %13146 = vperm.xlu1 %14189, %v13143_v17   ;;  %13736 = vmatprep.subr.bf16.mxu0 %v13735_v31 }
 0x673   : > { %13738 = vmatpush1.bf16.msra.mxu0 %v13737_v20  ;;  %v10844_v4 = vsel %vm2486_vm1, %v14218_v6, %v14219_v30  ;;  %v10843_v31 = vsel %vm2486_vm1, %v14199_v53, %v14218_v6 }
 0x674   : > { %v14222_v21 = vpop.permute.xlu1 %14221  ;;  %v14232_v48 = vpop.permute.xlu0 %14231 }
 0x675   : > { %v14224_v40 = vunpack.i.h.bf16 %v14222_v21  ;;  %v14223_v2 = vunpack.i.l.bf16 %v14222_v21  ;;  %v14234_v50 = vunpack.i.h.bf16 %v14232_v48  ;;  %v14233_v3 = vunpack.i.l.bf16 %v14232_v48 }
 0x676   : > { %13604 = vmatmul.mubr.msk.f32.vlgmr.msra.gmra.mrb[16].mxu0 %vm10593_vm11, %v16802_v11  ;;  %v10838_v21 = vsel %vm2486_vm1, %v14208_v62, %v14209_v57 }
 0x677   : > { %v10571_v43 = vsel %vm2781_vm2, %v14204_v33, %v14223_v2  ;;  %v10577_v32 = vsel %vm2781_vm2, %v14214_v23, %v14233_v3  ;;  %v10572_v8 = vsel %vm2781_vm2, %v14223_v2, %v14224_v40  ;;  %v10578_v51 = vsel %vm2781_vm2, %v14233_v3, %v14234_v50  ;;  %10731 = vmatprep.mubr.f32.mxu0 %v16583_v24 }
 0x678   : > { %v13741_v28 = vpack.c.bf16 %v10577_v32, %v10571_v43  ;;  %v13739_v46 = vpack.c.bf16 %v10578_v51, %v10572_v8  ;;  %v16827_v41 = vpop.permute.xlu0 %14236  ;;  %v16832_v61 = vpop.permute.xlu1 %14226  ;;  %v13747_v48 = vpack.c.bf16 %v10844_v4, %v10838_v21  ;;  %v10837_v2 = vsel %vm2486_vm1, %v14198_v10, %v14208_v62 }
 0x679   : > { %v14229_v54 = vunpack.i.h.bf16 %v16832_v61  ;;  %v14228_v23 = vunpack.i.l.bf16 %v16832_v61  ;;  %v14239_v45 = vunpack.i.h.bf16 %v16827_v41  ;;  %v14238_v60 = vunpack.i.l.bf16 %v16827_v41 }
 0x67a   : > { %13740 = vmatprep.subr.bf16.mxu0 %v13739_v46  ;;  %v13749_v3 = vpack.c.bf16 %v10843_v31, %v10837_v2 }
 0x67b   : > { %13742 = vmatpush1.bf16.msra.mxu0 %v13741_v28  ;;  %v10839_v43 = vsel %vm2486_vm1, %v14209_v57, %v14228_v23  ;;  %v10845_v32 = vsel %vm2486_vm1, %v14219_v30, %v14238_v60 }
 0x67e   : > { %13605 = vmatmul.mubr.msk.f32.vlgmr.msra.gmra.mrb[18].mxu0 %vm10593_vm11, %v16802_v11 }
 0x67f   : > { %10802 = vmatprep.mubr.f32.mxu0 %v16583_v24 }
 0x680   : > { %v14242_v56 = vpop.permute.xlu0 %14241 }
 0x681   : > { %v14244_v37 = vunpack.i.h.bf16 %v14242_v56  ;;  %v14243_v19 = vunpack.i.l.bf16 %v14242_v56 }
 0x683   : > { %v10573_v17 = vsel %vm2781_vm2, %v14224_v40, %v14243_v19  ;;  %v10574_v16 = vsel %vm2781_vm2, %v14243_v19, %v14244_v37  ;;  %v10840_v40 = vsel %vm2486_vm1, %v14228_v23, %v14229_v54  ;;  %v13753_v19 = vpack.c.bf16 %v10845_v32, %v10839_v43 }
 0x684   : > { %v14247_v22 = vpop.permute.xlu1 %14246  ;;  %v16839_v39 = vpop.permute.xlu0 %14261 }
 0x685   : > { %v14249_v13 = vunpack.i.h.bf16 %v14247_v22  ;;  %v14248_v33 = vunpack.i.l.bf16 %v14247_v22  ;;  %v14264_v53 = vunpack.i.h.bf16 %v16839_v39  ;;  %v14263_v10 = vunpack.i.l.bf16 %v16839_v39 }
 0x687   : > { %v10579_v52 = vsel %vm2781_vm2, %v14234_v50, %v14248_v33  ;;  %v10580_v14 = vsel %vm2781_vm2, %v14248_v33, %v14249_v13  ;;  %v10846_v50 = vsel %vm2486_vm1, %v14238_v60, %v14239_v45 }
 0x688   : > { %v13745_v5 = vpack.c.bf16 %v10579_v52, %v10573_v17  ;;  %v14252_v20 = vpop.permute.xlu1 %14251  ;;  %v13743_v59 = vpack.c.bf16 %v10580_v14, %v10574_v16  ;;  %v16851_v1 = vpop.permute.xlu0 %14271  ;;  %v13751_v56 = vpack.c.bf16 %v10846_v50, %v10840_v40  ;;  %v11150_v14 = vsel %vm3076_vm3, %v14263_v10, %v14264_v53 }
 0x689   : > { %v14254_v28 = vunpack.i.h.bf16 %v14252_v20  ;;  %v14253_v46 = vunpack.i.l.bf16 %v14252_v20  ;;  %v14274_v60 = vunpack.i.h.bf16 %v16851_v1  ;;  %v14273_v52 = vunpack.i.l.bf16 %v16851_v1 }
 0x68a   : > { %13744 = vmatprep.subr.bf16.mxu0 %v13743_v59 }
 0x68b   : > { %13746 = vmatpush1.bf16.msra.mxu0 %v13745_v5  ;;  %v10842_v33 = vsel %vm2486_vm1, %v14253_v46, %v14254_v28  ;;  %v10841_v23 = vsel %vm2486_vm1, %v14229_v54, %v14253_v46  ;;  %v11146_v40 = vsel %vm3076_vm3, %v14273_v52, %v14274_v60 }
 0x68c   : > { %v16860_v8 = vpop.permute.xlu1 %14256  ;;  %13748 = vmatprep.subr.bf16.mxu0 %v13747_v48  ;;  %v14282_v51 = vpop.permute.xlu0 %14281 }
 0x68d   : > { %v14284_v41 = vunpack.i.h.bf16 %v14282_v51  ;;  %v14283_v61 = vunpack.i.l.bf16 %v14282_v51  ;;  %v14259_v6 = vunpack.i.h.bf16 %v16860_v8  ;;  %v14258_v37 = vunpack.i.l.bf16 %v16860_v8 }
 0x68e   : > { %13606 = vmatmul.mubr.msk.f32.vlgmr.msra.gmra.mrb[20].mxu0 %vm10593_vm11, %v16802_v11 }
 0x68f   : > { %13750 = vmatpush1.bf16.msra.mxu0 %v13749_v3  ;;  %10927 = vmatprep.mubr.f32.mxu0 %v16583_v24  ;;  %v10848_v30 = vsel %vm2486_vm1, %v14283_v61, %v14284_v41  ;;  %v10847_v13 = vsel %vm2486_vm1, %v14239_v45, %v14283_v61  ;;  %v11144_v39 = vsel %vm3076_vm3, %v14258_v37, %v14259_v6 }
 0x690   : > { %v14267_v57 = vpop.permute.xlu1 %14266  ;;  %13752 = vmatprep.subr.bf16.mxu0 %v13751_v56  ;;  %v16870_v22 = vpop.permute.xlu0 %11099  ;;  %v13755_v4 = vpack.c.bf16 %v10848_v30, %v10842_v33  ;;  %v13757_v17 = vpack.c.bf16 %v10847_v13, %v10841_v23  ;;  %v13759_v31 = vpack.c.bf16 %v11150_v14, %v11144_v39  ;;  %v11145_v46 = vsel %vm3076_vm3, %v14259_v6, %v14273_v52 }
 0x691   : > { %v14269_v11 = vunpack.i.h.bf16 %v14267_v57  ;;  %v14268_v62 = vunpack.i.l.bf16 %v14267_v57 }
 0x692   : > { %13607 = vmatmul.mubr.msk.f32.vlgmr.msra.gmra.mrb[16].mxu0 %vm10593_vm11, %v16633_v29 }
 0x693   : > { %13754 = vmatpush1.bf16.msra.mxu0 %v13753_v19  ;;  %10998 = vmatprep.mubr.f32.mxu0 %v16583_v24  ;;  %v11143_v5 = vsel %vm3076_vm3, %v14268_v62, %v14258_v37  ;;  %v11149_v54 = vsel %vm3076_vm3, %v14269_v11, %v14263_v10 }
 0x694   : > { %v14277_v16 = vpop.permute.xlu1 %14276  ;;  %13756 = vmatprep.subr.bf16.mxu0 %v13755_v4  ;;  %v16881_v45 = vpop.permute.xlu0 %14296  ;;  %v13761_v21 = vpack.c.bf16 %v11149_v54, %v11143_v5 }
 0x695   : > { %v14279_v20 = vunpack.i.h.bf16 %v14277_v16  ;;  %v14278_v59 = vunpack.i.l.bf16 %v14277_v16  ;;  %v14299_v41 = vunpack.i.h.bf16 %v16881_v45  ;;  %v14298_v19 = vunpack.i.l.bf16 %v16881_v45 }
 0x696   : > { %13608 = vmatmul.mubr.msk.f32.vlgmr.msra.gmra.mrb[18].mxu0 %vm10593_vm11, %v16633_v29 }
 0x697   : > { %13758 = vmatpush1.bf16.msra.mxu0 %v13757_v17  ;;  %11069 = vmatprep.mubr.f32.mxu0 %v16583_v24  ;;  %v11152_v1 = vsel %vm3076_vm3, %v14278_v59, %v14279_v20  ;;  %v11151_v8 = vsel %vm3076_vm3, %v14264_v53, %v14278_v59  ;;  %v11462_v39 = vsel %vm3960_vm5, %v14298_v19, %v14299_v41 }
 0x698   : > { %v14287_v48 = vpop.permute.xlu1 %14286  ;;  %13760 = vmatprep.subr.bf16.mxu0 %v13759_v31  ;;  %v14307_v2 = vpop.permute.xlu0 %14306  ;;  %v13763_v51 = vpack.c.bf16 %v11152_v1, %v11146_v40  ;;  %v13765_v30 = vpack.c.bf16 %v11151_v8, %v11145_v46 }
 0x699   : > { %v14289_v50 = vunpack.i.h.bf16 %v14287_v48  ;;  %v14288_v3 = vunpack.i.l.bf16 %v14287_v48  ;;  %v14309_v43 = vunpack.i.h.bf16 %v14307_v2  ;;  %v14308_v32 = vunpack.i.l.bf16 %v14307_v2 }
 0x69a   : > { %13609 = vmatmul.mubr.msk.f32.vlgmr.msra.gmra.mrb[20].mxu0 %vm10593_vm11, %v16633_v29 }
 0x69b   : > { %13762 = vmatpush1.bf16.msra.mxu0 %v13761_v21  ;;  %11233 = vmatprep.mubr.f32.mxu0 %v16583_v24  ;;  %v11148_v28 = vsel %vm3076_vm3, %v14288_v3, %v14289_v50  ;;  %v11154_v37 = vsel %vm3076_vm3, %v14308_v32, %v14309_v43  ;;  %v11147_v10 = vsel %vm3076_vm3, %v14274_v60, %v14288_v3 }
 0x69c   : > { %v14292_v61 = vpop.permute.xlu1 %14291  ;;  %13764 = vmatprep.subr.bf16.mxu0 %v13763_v51  ;;  %v14312_v56 = vpop.permute.xlu0 %14311  ;;  %v11153_v57 = vsel %vm3076_vm3, %v14279_v20, %v14308_v32  ;;  %v13767_v6 = vpack.c.bf16 %v11154_v37, %v11148_v28 }
 0x69d   : > { %v14294_v53 = vunpack.i.h.bf16 %v14292_v61  ;;  %v14293_v29 = vunpack.i.l.bf16 %v14292_v61  ;;  %v13769_v33 = vpack.c.bf16 %v11153_v57, %v11147_v10  ;;  %v14313_v60 = vunpack.i.l.bf16 %v14312_v56 }
 0x69e   : > { %13611 = vmatmul.mubr.msk.f32.vlgmr.msra.gmra.mrb[16].mxu0 %vm10593_vm11, %v16870_v22  ;;  %v14314_v45 = vunpack.i.h.bf16 %v14312_v56 }
 0x69f   : > { %13766 = vmatpush1.bf16.msra.mxu0 %v13765_v30  ;;  %11304 = vmatprep.mubr.f32.mxu0 %v16583_v24  ;;  %v11456_v11 = vsel %vm3960_vm5, %v14293_v29, %v14294_v53  ;;  %v11457_v31 = vsel %vm3960_vm5, %v14294_v53, %v14313_v60 }
 0x6a0   : > { %v14302_v62 = vpop.permute.xlu1 %14301  ;;  %13768 = vmatprep.subr.bf16.mxu0 %v13767_v6  ;;  %v11412_v13 = vpop.permute.xlu0 %11411  ;;  %v13771_v52 = vpack.c.bf16 %v11462_v39, %v11456_v11  ;;  %v11458_v2 = vsel %vm3960_vm5, %v14313_v60, %v14314_v45 }
 0x6a1   : > { %v14304_v4 = vunpack.i.h.bf16 %v14302_v62  ;;  %v14303_v23 = vunpack.i.l.bf16 %v14302_v62 }
 0x6a2   : > { %13612 = vmatmul.mubr.msk.f32.vlgmr.msra.gmra.mrb[18].mxu0 %vm10593_vm11, %v16870_v22 }
 0x6a3   : > { %v11455_v17 = vsel %vm3960_vm5, %v14303_v23, %v14293_v29  ;;  %v11461_v16 = vsel %vm3960_vm5, %v14304_v4, %v14298_v19  ;;  %13770 = vmatpush1.bf16.msra.mxu0 %v13769_v33  ;;  %11375 = vmatprep.mubr.f32.mxu0 %v16583_v24 }
 0x6a4   : > { %v13773_v14 = vpack.c.bf16 %v11461_v16, %v11455_v17  ;;  %v14317_v5 = vpop.permute.xlu1 %14316  ;;  %13772 = vmatprep.subr.bf16.mxu0 %v13771_v52  ;;  %v14327_v54 = vpop.permute.xlu0 %14326 }
 0x6a5   : > { %v14319_v20 = vunpack.i.h.bf16 %v14317_v5  ;;  %v14318_v59 = vunpack.i.l.bf16 %v14317_v5  ;;  %v14328_v1 = vunpack.i.l.bf16 %v14327_v54  ;;  %v14329_v48 = vunpack.i.h.bf16 %v14327_v54 }
 0x6a6   : > { %13613 = vmatmul.mubr.msk.f32.vlgmr.msra.gmra.mrb[20].mxu0 %vm10593_vm11, %v16870_v22 }
 0x6a7   : > { %v11463_v21 = vsel %vm3960_vm5, %v14299_v41, %v14318_v59  ;;  %13774 = vmatpush1.bf16.msra.mxu0 %v13773_v14  ;;  %11545 = vmatprep.mubr.f32.mxu0 %v16583_v24  ;;  %v11464_v40 = vsel %vm3960_vm5, %v14318_v59, %v14319_v20  ;;  %v11465_v28 = vsel %vm3960_vm5, %v14319_v20, %v14328_v1 }
 0x6a8   : > { %v13777_v50 = vpack.c.bf16 %v11463_v21, %v11457_v31  ;;  %v14322_v3 = vpop.permute.xlu1 %14321  ;;  %v13775_v43 = vpack.c.bf16 %v11464_v40, %v11458_v2  ;;  %v14332_v32 = vpop.permute.xlu0 %14331  ;;  %v11466_v41 = vsel %vm3960_vm5, %v14328_v1, %v14329_v48 }
 0x6a9   : > { %v14324_v8 = vunpack.i.h.bf16 %v14322_v3  ;;  %v14323_v51 = vunpack.i.l.bf16 %v14322_v3  ;;  %v14334_v49 = vunpack.i.h.bf16 %v14332_v32  ;;  %v14333_v35 = vunpack.i.l.bf16 %v14332_v32 }
 0x6aa   : > { %13615 = vmatmul.mubr.msk.f32.vlgmr.msra.gmra.mrb[16].mxu0 %vm10593_vm11, %v11412_v13  ;;  %13776 = vmatprep.subr.bf16.mxu0 %v13775_v43 }
 0x6ab   : > { %v11459_v22 = vsel %vm3960_vm5, %v14314_v45, %v14323_v51  ;;  %13778 = vmatpush1.bf16.msra.mxu0 %v13777_v50  ;;  %11616 = vmatprep.mubr.f32.mxu0 %v16583_v24  ;;  %v11460_v46 = vsel %vm3960_vm5, %v14323_v51, %v14324_v8 }
 0x6ac   : > { %v13781_v61 = vpack.c.bf16 %v11465_v28, %v11459_v22  ;;  %v11722_v56 = vpop.permute.xlu1 %11721  ;;  %v13779_v37 = vpack.c.bf16 %v11466_v41, %v11460_v46  ;;  %v14342_v30 = vpop.permute.xlu0 %14341 }
 0x6ad   : > { %v14344_v38 = vunpack.i.h.bf16 %v14342_v30 }
 0x6ae   : > { %13616 = vmatmul.mubr.msk.f32.vlgmr.msra.gmra.mrb[18].mxu0 %vm10593_vm11, %v11412_v13  ;;  %13780 = vmatprep.subr.bf16.mxu0 %v13779_v37 }
 0x6af   : > { %13782 = vmatpush1.bf16.msra.mxu0 %v13781_v61  ;;  %11687 = vmatprep.mubr.f32.mxu0 %v16583_v24 }
 0x6b0   : > { %v14337_v19 = vpop.permute.xlu1 %14336  ;;  %13784 = vmatprep.subr.bf16.mxu0 %v13783_v47  ;;  %v14352_v53 = vpop.permute.xlu0 %14351 }
 0x6b1   : > { %v14339_v29 = vunpack.i.h.bf16 %v14337_v19  ;;  %v14338_v10 = vunpack.i.l.bf16 %v14337_v19  ;;  %v14353_v62 = vunpack.i.l.bf16 %v14352_v53 }
 0x6b2   : > { %13617 = vmatmul.mubr.msk.f32.vlgmr.msra.gmra.mrb[20].mxu0 %vm10593_vm11, %v11412_v13  ;;  %v12004_v13 = vsel %vm4511_vm6, %v14333_v35, %v14334_v49 }
 0x6b3   : > { %13786 = vmatpush1.bf16.msra.mxu0 %v13785_v12  ;;  %11789 = vmatprep.mubr.f32.mxu0 %v16583_v24  ;;  %v12009_v9 = vsel %vm4511_vm6, %v14338_v10, %v14339_v29  ;;  %v14343_v12 = vunpack.i.l.bf16 %v14342_v30  ;;  %v12008_v44 = vsel %vm4511_vm6, %v14344_v38, %v14338_v10  ;;  %v12010_v52 = vsel %vm4511_vm6, %v14339_v29, %v14353_v62 }
 0x6b4   : > { %v14347_v57 = vpop.permute.xlu1 %14346  ;;  %13788 = vmatprep.subr.bf16.mxu0 %v13787_v25  ;;  %v16938_v6 = vpop.permute.xlu0 %14361  ;;  %v14354_v25 = vunpack.i.h.bf16 %v14352_v53  ;;  %v13795_v7 = vpack.c.bf16 %v12009_v9, %v12004_v13 }
 0x6b5   : > { %v14349_v47 = vunpack.i.h.bf16 %v14347_v57  ;;  %v14348_v11 = vunpack.i.l.bf16 %v14347_v57  ;;  %v12003_v42 = vsel %vm4511_vm6, %v14343_v12, %v14333_v35  ;;  %v14364_v17 = vunpack.i.h.bf16 %v16938_v6 }
 0x6b6   : > { %13619 = vmatmul.mubr.msk.f32.vlgmr.msra.gmra.mrb[16].mxu0 %vm10593_vm11, %v11722_v56  ;;  %v13797_v33 = vpack.c.bf16 %v12008_v44, %v12003_v42  ;;  %v12011_v39 = vsel %vm4511_vm6, %v14353_v62, %v14354_v25  ;;  %v14363_v16 = vunpack.i.l.bf16 %v16938_v6  ;;  %v17001_v44 = vld [vmem:[#allocation4] sm:$0xff] }
 0x6b7   : > { %13790 = vmatpush1.bf16.msra.mxu0 %v13789_v0  ;;  %11860 = vmatprep.mubr.f32.mxu0 %v16583_v24  ;;  %v12006_v0 = vsel %vm4511_vm6, %v14348_v11, %v14349_v47  ;;  %v12005_v60 = vsel %vm4511_vm6, %v14334_v49, %v14348_v11 }
 0x6b8   : > { %v16946_v18 = vpop.permute.xlu1 %11965  ;;  %13792 = vmatprep.subr.bf16.mxu0 %v13791_v15  ;;  %v14372_v27 = vpop.permute.xlu0 %14371  ;;  %v13799_v55 = vpack.c.bf16 %v12011_v39, %v12006_v0  ;;  %v13801_v5 = vpack.c.bf16 %v12010_v52, %v12005_v60  ;;  %v12311_v50 = vsel %vm5363_vm12, %v14363_v16, %v14364_v17 }
 0x6b9   : > { %v14374_v4 = vunpack.i.h.bf16 %v14372_v27  ;;  %v14373_v23 = vunpack.i.l.bf16 %v14372_v27 }
 0x6ba   : > { %13620 = vmatmul.mubr.msk.f32.vlgmr.msra.gmra.mrb[18].mxu0 %vm10593_vm11, %v11722_v56 }
 0x6bb   : > { %13794 = vmatpush1.bf16.msra.mxu0 %v13793_v26  ;;  %11931 = vmatprep.mubr.f32.mxu0 %v16583_v24  ;;  %v12007_v54 = vsel %vm4511_vm6, %v14349_v47, %v14373_v23  ;;  %v12012_v20 = vsel %vm4511_vm6, %v14354_v25, %v14374_v4  ;;  %v13803_v59 = vpack.c.bf16 %v14374_v4, %v14373_v23 }
 0x6bc   : > { %v14357_v58 = vpop.permute.xlu1 %14356  ;;  %13796 = vmatprep.subr.bf16.mxu0 %v13795_v7  ;;  %v16960_v15 = vpop.permute.xlu0 %14376  ;;  %v13805_v48 = vpack.c.bf16 %v12012_v20, %v12007_v54 }
 0x6bd   : > { %v14359_v63 = vunpack.i.h.bf16 %v14357_v58  ;;  %v14358_v26 = vunpack.i.l.bf16 %v14357_v58  ;;  %v14379_v3 = vunpack.i.h.bf16 %v16960_v15  ;;  %v14378_v43 = vunpack.i.l.bf16 %v16960_v15 }
 0x6be   : > { %13621 = vmatmul.mubr.msk.f32.vlgmr.msra.gmra.mrb[20].mxu0 %vm10593_vm11, %v11722_v56 }
 0x6bf   : > { %13798 = vmatpush1.bf16.msra.mxu0 %v13797_v33  ;;  %12091 = vmatprep.mubr.f32.mxu0 %v16583_v24  ;;  %v12306_v21 = vsel %vm5363_vm12, %v14358_v26, %v14359_v63  ;;  %v12308_v37 = vsel %vm5363_vm12, %v14378_v43, %v14379_v3  ;;  %v12307_v10 = vsel %vm5363_vm12, %v14359_v63, %v14378_v43 }
 0x6c0   : > { %v14367_v45 = vpop.permute.xlu1 %14366  ;;  %13800 = vmatprep.subr.bf16.mxu0 %v13799_v55  ;;  %v16969_v14 = vpop.permute.xlu0 %12267  ;;  %v13807_v22 = vpack.c.bf16 %v12311_v50, %v12306_v21 }
 0x6c1   : > { %v14369_v31 = vunpack.i.h.bf16 %v14367_v45  ;;  %v14368_v1 = vunpack.i.l.bf16 %v14367_v45 }
 0x6c2   : > { %13623 = vmatmul.mubr.msk.f32.vlgmr.msra.gmra.mrb[16].mxu0 %vm10593_vm11, %v16946_v18 }
 0x6c3   : > { %13802 = vmatpush1.bf16.msra.mxu0 %v13801_v5  ;;  %12162 = vmatprep.mubr.f32.mxu0 %v16583_v24  ;;  %v12305_v51 = vsel %vm5363_vm12, %v14368_v1, %v14358_v26  ;;  %v12310_v28 = vsel %vm5363_vm12, %v14369_v31, %v14363_v16 }
 0x6c4   : > { %v14382_v2 = vpop.permute.xlu1 %14381  ;;  %13804 = vmatprep.subr.bf16.mxu0 %v13803_v59  ;;  %v16977_v40 = vpop.permute.xlu0 %14386  ;;  %v13809_v56 = vpack.c.bf16 %v12310_v28, %v12305_v51 }
 0x6c5   : > { %v14384_v32 = vunpack.i.h.bf16 %v14382_v2  ;;  %v14383_v8 = vunpack.i.l.bf16 %v14382_v2  ;;  %v14389_v57 = vunpack.i.h.bf16 %v16977_v40  ;;  %v14388_v6 = vunpack.i.l.bf16 %v16977_v40 }
 0x6c6   : > { %13624 = vmatmul.mubr.msk.f32.vlgmr.msra.gmra.mrb[18].mxu0 %vm10593_vm11, %v16946_v18 }
 0x6c7   : > { %13806 = vmatpush1.bf16.msra.mxu0 %v13805_v48  ;;  %12233 = vmatprep.mubr.f32.mxu0 %v16583_v24  ;;  %v12313_v46 = vsel %vm5363_vm12, %v14383_v8, %v14384_v32  ;;  %v12312_v30 = vsel %vm5363_vm12, %v14364_v17, %v14383_v8  ;;  %v12608_v0 = vsel %vm5647_vm13, %v14388_v6, %v14389_v57 }
 0x6c8   : > { %v14392_v41 = vpop.permute.xlu1 %14391  ;;  %13808 = vmatprep.subr.bf16.mxu0 %v13807_v22  ;;  %v14397_v61 = vpop.permute.xlu0 %14396  ;;  %v13811_v19 = vpack.c.bf16 %v12313_v46, %v12308_v37  ;;  %v13813_v47 = vpack.c.bf16 %v12312_v30, %v12307_v10 }
 0x6c9   : > { %v14394_v53 = vunpack.i.h.bf16 %v14392_v41  ;;  %v14393_v29 = vunpack.i.l.bf16 %v14392_v41  ;;  %v14399_v38 = vunpack.i.h.bf16 %v14397_v61  ;;  %v14398_v12 = vunpack.i.l.bf16 %v14397_v61 }
 0x6ca   : > { %13625 = vmatmul.mubr.msk.f32.vlgmr.msra.gmra.mrb[20].mxu0 %vm10593_vm11, %v16946_v18 }
 0x6cb   : > { %13810 = vmatpush1.bf16.msra.mxu0 %v13809_v56  ;;  %12393 = vmatprep.mubr.f32.mxu0 %v16583_v24  ;;  %v12613_v25 = vsel %vm5647_vm13, %v14393_v29, %v14394_v53  ;;  %v12612_v4 = vsel %vm5647_vm13, %v14399_v38, %v14393_v29  ;;  %v12607_v23 = vsel %vm5647_vm13, %v14398_v12, %v14388_v6 }
 0x6cc   : > { %v14402_v49 = vpop.permute.xlu1 %14401  ;;  %13812 = vmatprep.subr.bf16.mxu0 %v13811_v19  ;;  %v14412_v35 = vpop.permute.xlu0 %14411  ;;  %v13819_v39 = vpack.c.bf16 %v12613_v25, %v12608_v0  ;;  %v13821_v26 = vpack.c.bf16 %v12612_v4, %v12607_v23 }
 0x6cd   : > { %v14404_v11 = vunpack.i.h.bf16 %v14402_v49  ;;  %v14403_v9 = vunpack.i.l.bf16 %v14402_v49  ;;  %v14414_v15 = vunpack.i.h.bf16 %v14412_v35  ;;  %v14413_v33 = vunpack.i.l.bf16 %v14412_v35  ;;  %v12850_v35 = vld [vmem:[%s17062_s7 + $0x2] sm:$0x3] }
 0x6ce   : > { %13627 = vmatmul.mubr.msk.f32.vlgmr.msra.gmra.mrb[16].mxu0 %vm10593_vm11, %v16969_v14 }
 0x6cf   : > { %v12309_v18 = vsel %vm5363_vm12, %v14379_v3, %v14403_v9  ;;  %v12314_v24 = vsel %vm5363_vm12, %v14384_v32, %v14404_v11  ;;  %v13815_v27 = vpack.c.bf16 %v14404_v11, %v14403_v9  ;;  %13814 = vmatpush1.bf16.msra.mxu0 %v13813_v47  ;;  %12464 = vmatprep.mubr.f32.mxu0 %v17001_v44 }
 0x6d0   : > { %v13817_v62 = vpack.c.bf16 %v12314_v24, %v12309_v18  ;;  %v14407_v13 = vpop.permute.xlu1 %14406  ;;  %v14422_v7 = vpop.permute.xlu0 %14421  ;;  %v12615_v17 = vsel %vm5647_vm13, %v14413_v33, %v14414_v15  ;;  %v12614_v54 = vsel %vm5647_vm13, %v14394_v53, %v14413_v33 }
 0x6d1   : > { %v14409_v42 = vunpack.i.h.bf16 %v14407_v13  ;;  %v14408_v58 = vunpack.i.l.bf16 %v14407_v13  ;;  %13816 = vmatprep.subr.bf16.mxu0 %v13815_v27  ;;  %v14424_v16 = vunpack.i.h.bf16 %v14422_v7  ;;  %v14423_v45 = vunpack.i.l.bf16 %v14422_v7 }
 0x6d2   : > { %13628 = vmatmul.mubr.msk.f32.vlgmr.msra.gmra.mrb[18].mxu0 %vm10593_vm11, %v16969_v14 }
 0x6d3   : > { %13818 = vmatpush1.bf16.msra.mxu0 %v13817_v62  ;;  %12535 = vmatprep.mubr.f32.mxu0 %v17001_v44  ;;  %v12610_v63 = vsel %vm5647_vm13, %v14408_v58, %v14409_v42  ;;  %v12609_v52 = vsel %vm5647_vm13, %v14389_v57, %v14408_v58  ;;  %v12611_v40 = vsel %vm5647_vm13, %v14409_v42, %v14423_v45 }
 0x6d4   : > { %v12570_v60 = vpop.permute.xlu1 %12569  ;;  %13820 = vmatprep.subr.bf16.mxu0 %v13819_v39  ;;  %v14427_v55 = vpop.permute.xlu0 %14426  ;;  %v13823_v5 = vpack.c.bf16 %v12615_v17, %v12610_v63  ;;  %v13825_v20 = vpack.c.bf16 %v12614_v54, %v12609_v52  ;;  %v12616_v50 = vsel %vm5647_vm13, %v14414_v15, %v14424_v16  ;;  %v13827_v3 = vpack.c.bf16 %v14424_v16, %v14423_v45 }
 0x6d5   : > { %v14429_v21 = vunpack.i.h.bf16 %v14427_v55  ;;  %v14428_v48 = vunpack.i.l.bf16 %v14427_v55  ;;  %v13829_v32 = vpack.c.bf16 %v12616_v50, %v12611_v40 }
 0x6d6   : > { %13629 = vmatmul.mubr.msk.f32.vlgmr.msra.gmra.mrb[20].mxu0 %vm10593_vm11, %v16969_v14 }
 0x6d7   : > { %13822 = vmatpush1.bf16.msra.mxu0 %v13821_v26  ;;  %12695 = vmatprep.mubr.f32.mxu0 %v17001_v44  ;;  %v12905_v28 = vsel %vm5931_vm14, %v14428_v48, %v14429_v21 }
 0x6d8   : > { %v14417_v59 = vpop.permute.xlu1 %14416  ;;  %13824 = vmatprep.subr.bf16.mxu0 %v13823_v5  ;;  %v14437_v2 = vpop.permute.xlu0 %14436 }
 0x6d9   : > { %v14419_v31 = vunpack.i.h.bf16 %v14417_v59  ;;  %v14418_v1 = vunpack.i.l.bf16 %v14417_v59  ;;  %v14438_v22 = vunpack.i.l.bf16 %v14437_v2  ;;  %v14439_v56 = vunpack.i.h.bf16 %v14437_v2 }
 0x6da   : > { %13631 = vmatmul.mubr.msk.f32.vlgmr.msra.gmra.mrb[16].mxu0 %vm10593_vm11, %v12570_v60 }
 0x6db   : > { %13826 = vmatpush1.bf16.msra.mxu0 %v13825_v20  ;;  %12766 = vmatprep.mubr.f32.mxu0 %v17001_v44  ;;  %v12900_v14 = vsel %vm5931_vm14, %v14418_v1, %v14419_v31  ;;  %v12901_v10 = vsel %vm5931_vm14, %v14419_v31, %v14438_v22  ;;  %v12902_v47 = vsel %vm5931_vm14, %v14438_v22, %v14439_v56 }
 0x6dc   : > { %v14432_v43 = vpop.permute.xlu1 %14431  ;;  %13828 = vmatprep.subr.bf16.mxu0 %v13827_v3  ;;  %v13831_v46 = vpack.c.bf16 %v12905_v28, %v12900_v14  ;;  %v14447_v37 = vpop.permute.xlu0 %14446 }
 0x6dd   : > { %v14434_v8 = vunpack.i.h.bf16 %v14432_v43  ;;  %v14433_v51 = vunpack.i.l.bf16 %v14432_v43  ;;  %v14449_v57 = vunpack.i.h.bf16 %v14447_v37  ;;  %v14448_v6 = vunpack.i.l.bf16 %v14447_v37 }
 0x6de   : > { %13632 = vmatmul.mubr.msk.f32.vlgmr.msra.gmra.mrb[18].mxu0 %vm10593_vm11, %v12570_v60 }
 0x6df   : > { %v12899_v41 = vsel %vm5931_vm14, %v14433_v51, %v14418_v1  ;;  %v12904_v61 = vsel %vm5931_vm14, %v14434_v8, %v14428_v48  ;;  %13830 = vmatpush1.bf16.msra.mxu0 %v13829_v32  ;;  %12837 = vmatprep.mubr.f32.mxu0 %v17001_v44  ;;  %v13839_v18 = vpack.c.bf16 %v14449_v57, %v14448_v6 }
 0x6e0   : > { %v13833_v30 = vpack.c.bf16 %v12904_v61, %v12899_v41  ;;  %v14442_v19 = vpop.permute.xlu1 %14441  ;;  %13832 = vmatprep.subr.bf16.mxu0 %v13831_v46  ;;  %v12903_v24 = vsel %vm5931_vm14, %v14439_v56, %v14448_v6 }
 0x6e1   : > { %v14444_v53 = vunpack.i.h.bf16 %v14442_v19  ;;  %v14443_v29 = vunpack.i.l.bf16 %v14442_v19 }
 0x6e2   : > { %13633 = vmatmul.mubr.msk.f32.vlgmr.msra.gmra.mrb[20].mxu0 %vm10593_vm11, %v12570_v60 }
 0x6e3   : > { %v12906_v49 = vsel %vm5931_vm14, %v14429_v21, %v14443_v29  ;;  %13834 = vmatpush1.bf16.msra.mxu0 %v13833_v30  ;;  %12988 = vmatprep.mubr.f32.mxu0 %v17001_v44  ;;  %v12907_v11 = vsel %vm5931_vm14, %v14443_v29, %v14444_v53  ;;  %v12908_v12 = vsel %vm5931_vm14, %v14444_v53, %v14449_v57 }
 0x6e4   : > { %v13837_v9 = vpack.c.bf16 %v12906_v49, %v12901_v10  ;;  %v13835_v38 = vpack.c.bf16 %v12907_v11, %v12902_v47  ;;  %v13841_v27 = vpack.c.bf16 %v12908_v12, %v12903_v24 }
 0x6e6   : > { %13634 = vmatmul.mubr.msk.f32.vlgmr.msra.gmra.mrb[16].mxu0 %vm10593_vm11, %v12850_v35  ;;  %13836 = vmatprep.subr.bf16.mxu0 %v13835_v38 }
 0x6e7   : > { %13838 = vmatpush1.bf16.msra.mxu0 %v13837_v9  ;;  %13059 = vmatprep.mubr.f32.mxu0 %v17001_v44 }
 0x6e8   : > { %13840 = vmatprep.subr.bf16.mxu0 %v13839_v18 }
 0x6ea   : > { %13635 = vmatmul.mubr.msk.f32.vlgmr.msra.gmra.mrb[18].mxu0 %vm10593_vm11, %v12850_v35 }
 0x6eb   : > { %13842 = vmatpush1.bf16.msra.mxu0 %v13841_v27  ;;  %13130 = vmatprep.mubr.f32.mxu0 %v17001_v44 }
 0x6ee   : > { %13636 = vmatmul.mubr.msk.f32.vlgmr.msra.gmra.mrb[20].mxu0 %vm10593_vm11, %v12850_v35 }
 0x6f1   : > { %v13147_v25 = vpop.permute.xlu1 %13146 }
 0x7b9   : > { %v12990_v62 = vpop.f32.mrb[16].mxu0 }
 0x7ba   : > { %v13149_v13 = vadd.f32 %v13147_v25, %v12990_v62  ;;  %v12992_v7 = vpop.f32.mrb[17].mxu0 }
 0x7bb   : > { %v13150_v0 = vadd.f32 %v13147_v25, %v12992_v7 }
 0x7bc   : > { %v13155_v42 = vmax.f32 %v13149_v13, 0.0 }
 0x7bd   : > { %v13156_v58 = vmax.f32 %v13150_v0, 0.0  ;;  %v13061_v15 = vpop.f32.mrb[18].mxu0 }
 0x7be   : > { %v13151_v33 = vadd.f32 %v13147_v25, %v13061_v15  ;;  %v13063_v4 = vpop.f32.mrb[19].mxu0 }
 0x7bf   : > { %v13167_v23 = vcombine.low %v13155_v42, %v13156_v58  ;;  %v13152_v39 = vadd.f32 %v13147_v25, %v13063_v4 }
 0x7c0   : > { %v13157_v60 = vmax.f32 %v13151_v33, 0.0 }
 0x7c1   : > { %v13158_v55 = vmax.f32 %v13152_v39, 0.0  ;;  %v13132_v63 = vpop.f32.mrb[20].mxu0  ;;  %v13175_v45 = vrot.slane %v13167_v23, %v14929_v34 }
 0x7c2   : > { %v13153_v44 = vadd.f32 %v13147_v25, %v13132_v63  ;;  %v13134_v26 = vpop.f32.mrb[21].mxu0 }
 0x7c3   : > { %v13168_v52 = vcombine.low %v13157_v60, %v13158_v55  ;;  %v13154_v17 = vadd.f32 %v13147_v25, %v13134_v26 }
 0x7c4   : > { %v13159_v16 = vmax.f32 %v13153_v44, 0.0 }
 0x7c5   : > { %v13182_v5 = vrot.slane %v13168_v52, %v14929_v34  ;;  %v13160_v54 = vmax.f32 %v13154_v17, 0.0 }
 0x7c7   : > { %v13183_v20 = vcombine.low %v13175_v45, %v13182_v5  ;;  %v13184_v59 = vcombine.low %v13159_v16, %v13160_v54 }
 0x7c9   : > { %13194 = vst [vmem:[%s329_s22] sm:$0xff] %v13183_v20  ;;  %v13191_v31 = vrot.slane %v13184_v59, %v14929_v34 }
 0x7cb   : > { %13195 = vst.msk [vmem:[%s329_s22 + $0x8] sm:$0xf] %vm14932_vm8, %v13191_v31 }
 0x7cc PF: > { %s19_s30 = sadd.s32 1, %s14474_s30  }
 0x7cd   : > { %p16_p4 = scmp.ge.s32.totalorder %s19_s30, 4  }
 0x7cf   :  { %18 = sbr.rel (!%p16_p4) target bundleno = 1 (0x1), region = 86 }

</bundles_post_ra>
